<compile_context>
chip_gen: v7x
topology: tpu7x:2x2x1
jax: 0.10.0
libtpu: 0.0.40
codegen_flags: <defaults>
</compile_context>

<pallas_src>
import jax
import jax.numpy as jnp
from jax.experimental import pallas as pl
from jax.experimental.pallas import tpu as pltpu

MEASURE_SEQ_LEN = 18     # fixed by the module (num_beats_per_measure=3, ticks=6)
Z_DIM = 32               # fixed by the module
NUM_NOTES = 16           # len(dataset.note2index_dicts) - dataset dependent, chosen small
ENC_HIDDEN = 64
DEC_HIDDEN = 64
LOGITS_DIM = MEASURE_SEQ_LEN * NUM_NOTES   # 288


def bar_vae_kernel(x_ref, eps_ref,
                   we1_ref, be1_ref, wmuls_ref, bmuls_ref,
                   wd1_ref, bd1_ref, wd2_ref, bd2_ref,
                   gsum_ref, gbcast_ref,
                   weights_ref, samples_ref, mustd_ref):
    x = x_ref[...]                                              # (TB, S) f32

    # ---------------- encoder MLP (weights already bf16) ----------------
    h = jnp.dot(x.astype(jnp.bfloat16), we1_ref[...],
                preferred_element_type=jnp.float32) + be1_ref[...]
    h = jnp.maximum(h, 0.0)                                     # ReLU

    # fused mu | log_std projection -> (TB, 2*Z)
    ms = jnp.dot(h.astype(jnp.bfloat16), wmuls_ref[...],
                 preferred_element_type=jnp.float32) + bmuls_ref[...]

    # fused [mu | std] tile (exp only takes effect on the log_std lanes)
    lane = jax.lax.broadcasted_iota(jnp.int32, ms.shape, 1)
    mustd = jnp.where(lane < Z_DIM, ms, jnp.exp(ms))            # (TB, 2*Z) = [mu | std]
    mu = mustd[:, :Z_DIM]                                       # single lane split
    std = mustd[:, Z_DIM:]

    # ---------------- reparameterized sample (z_dist.rsample()) ----------------
    z = mu + std * eps_ref[...]                                 # (TB, Z)

    # ---------------- decoder MLP ----------------
    hd = jnp.dot(z.astype(jnp.bfloat16), wd1_ref[...],
                 preferred_element_type=jnp.float32) + bd1_ref[...]
    hd = jnp.maximum(hd, 0.0)                                   # ReLU
    logits = jnp.dot(hd.astype(jnp.bfloat16), wd2_ref[...],
                     preferred_element_type=jnp.float32) + bd2_ref[...]   # (TB, 288)

    # ---------------- lane-dense grouped softmax over the 16-note groups ----------
    # Subtract a per-row *global* max (shift-invariance => identical per-group
    # softmax), exp on the flat lane-dense tile, then per-group sums and the
    # reciprocal broadcast via constant block-diagonal matmuls on the MXU.
    m = jnp.max(logits, axis=-1, keepdims=True)                 # (TB, 1)
    e = jnp.exp(logits - m)                                     # (TB, 288) lane-dense
    gsum = jnp.dot(e, gsum_ref[...],
                   preferred_element_type=jnp.float32)          # (TB, 18) per-tick sums
    inv = pl.reciprocal(gsum, approx=False)                     # exact: rows sum to 1
    inv_flat = jnp.dot(inv, gbcast_ref[...],
                       preferred_element_type=jnp.float32)      # (TB, 288) broadcast
    weights_ref[...] = (e * inv_flat).astype(weights_ref.dtype)

    # ---------------- argmax per tick (only consumer of the (TB,S,N) layout) ------
    tb = logits.shape[0]
    logits3 = logits.reshape(tb, MEASURE_SEQ_LEN, NUM_NOTES)
    m3 = jnp.max(logits3, axis=-1, keepdims=True)
    note_idx = jax.lax.broadcasted_iota(jnp.int32, logits3.shape, 2)
    samples = jnp.min(jnp.where(logits3 == m3, note_idx, NUM_NOTES), axis=-1)
    samples_ref[...] = samples.astype(jnp.int32)                # (TB, S)

    # fused mu|std output (one dense store instead of two 32-lane masked stores)
    mustd_ref[...] = mustd


def _round_up(x, m):
    return ((x + m - 1) // m) * m


def _default_batch_tile(b):
    # >= 2 grid steps whenever possible (megacore sharding on v7x), MXU-M aligned
    # (256 for v6e/v7x, also 2x128 for v5e's 4x128 MXUs), capped so double-buffered
    # blocks + in-kernel temporaries stay far under the scoped VMEM limit.
    tb = _round_up(pl.cdiv(b, 2), 8)
    if tb >= 256:
        tb = _round_up(tb, 256)
    elif tb >= 128:
        tb = _round_up(tb, 128)
    return min(1024, max(8, tb))


def _group_matrices():
    # Block-diagonal "ones" matrices used for segment-sum / broadcast on the MXU.
    groups = jnp.repeat(jnp.arange(MEASURE_SEQ_LEN), NUM_NOTES)             # (288,)
    g = (groups[:, None] == jnp.arange(MEASURE_SEQ_LEN)[None, :])
    g = g.astype(jnp.float32)                                               # (288, 18)
    return g, g.T                                                           # + (18, 288)


def prepare_params(raw_params):
    """Hoist the mu/log_std fusion and the bf16 weight casts out of the per-call
    path (ideally done once at init / checkpoint load)."""
    (we1, be1, wmu, bmu, wls, bls, wd1, bd1, wd2, bd2) = raw_params
    wmuls = jnp.concatenate([wmu, wls], axis=1)                # (H, 2*Z)
    bmuls = jnp.concatenate([bmu, bls], axis=1)                # (1, 2*Z)
    return (we1.astype(jnp.bfloat16), be1.astype(jnp.float32),
            wmuls.astype(jnp.bfloat16), bmuls.astype(jnp.float32),
            wd1.astype(jnp.bfloat16), bd1.astype(jnp.float32),
            wd2.astype(jnp.bfloat16), bd2.astype(jnp.float32))


def bar_vae_forward(measure_score_tensor, params, eps, *, batch_tile=None,
                    weights_dtype=jnp.float32):
    """Mirrors MyBarVAE.forward.

    params: output of prepare_params / init_params (bf16 weights, fused mu|log_std head)
    Returns: (weights (B,S,N), samples (B,1,S) int32,
              z_dist=(mu, std), prior_dist=(zeros(Z), ones(Z)))
    """
    x = measure_score_tensor.astype(jnp.float32)               # .type(torch.FloatTensor)
    B, S = x.shape
    assert S == MEASURE_SEQ_LEN

    (we1, be1, wmuls, bmuls, wd1, bd1, wd2, bd2) = params
    gsum_mat, gbcast_mat = _group_matrices()

    TB = batch_tile if batch_tile is not None else _default_batch_tile(B)
    n_blocks = pl.cdiv(B, TB)
    B_pad = n_blocks * TB
    if B_pad != B:
        x = jnp.pad(x, ((0, B_pad - B), (0, 0)))
        eps = jnp.pad(eps, ((0, B_pad - B), (0, 0)))

    def batch_spec(cols):
        return pl.BlockSpec((TB, cols), lambda i: (i, 0))

    def const_spec(arr):
        return pl.BlockSpec(arr.shape, lambda i: (0, 0))       # resident block, no re-fetch

    in_specs = [
        batch_spec(MEASURE_SEQ_LEN),          # x
        batch_spec(Z_DIM),                    # eps
        const_spec(we1), const_spec(be1),
        const_spec(wmuls), const_spec(bmuls),
        const_spec(wd1), const_spec(bd1),
        const_spec(wd2), const_spec(bd2),
        const_spec(gsum_mat), const_spec(gbcast_mat),
    ]

    out_shapes = (
        jax.ShapeDtypeStruct((B_pad, LOGITS_DIM), weights_dtype),     # weights (flat, lane-dense)
        jax.ShapeDtypeStruct((B_pad, MEASURE_SEQ_LEN), jnp.int32),    # samples (flat)
        jax.ShapeDtypeStruct((B_pad, 2 * Z_DIM), jnp.float32),        # [mu | std] fused
    )
    out_specs = (
        batch_spec(LOGITS_DIM),
        batch_spec(MEASURE_SEQ_LEN),
        batch_spec(2 * Z_DIM),
    )

    weights_flat, samples_flat, mustd = pl.pallas_call(
        bar_vae_kernel,
        out_shape=out_shapes,
        grid=(n_blocks,),
        in_specs=in_specs,
        out_specs=out_specs,
        compiler_params=pltpu.CompilerParams(
            dimension_semantics=("parallel",),        # megacore-shardable batch axis (v7x)
            vmem_limit_bytes=32 * 1024 * 1024),
    )(x, eps, we1, be1, wmuls, bmuls, wd1, bd1, wd2, bd2, gsum_mat, gbcast_mat)

    weights = (weights_flat[:B].astype(jnp.float32)
               .reshape(B, MEASURE_SEQ_LEN, NUM_NOTES))
    samples = samples_flat[:B].reshape(B, 1, MEASURE_SEQ_LEN)
    z_dist = (mustd[:B, :Z_DIM], mustd[:B, Z_DIM:])            # Normal(mu, std)
    prior_dist = (jnp.zeros((Z_DIM,), jnp.float32),            # Normal(0, 1)
                  jnp.ones((Z_DIM,), jnp.float32))
    return weights, samples, z_dist, prior_dist


def init_params(key):
    ks = jax.random.split(key, 10)
    scale = 0.1

    def w(k, shape):
        return (scale * jax.random.normal(k, shape)).astype(jnp.float32)

    we1 = w(ks[0], (MEASURE_SEQ_LEN, ENC_HIDDEN))
    be1 = jnp.zeros((1, ENC_HIDDEN), jnp.float32)
    wmu = w(ks[1], (ENC_HIDDEN, Z_DIM))
    bmu = jnp.zeros((1, Z_DIM), jnp.float32)
    wls = w(ks[2], (ENC_HIDDEN, Z_DIM))
    bls = jnp.zeros((1, Z_DIM), jnp.float32)
    wd1 = w(ks[3], (Z_DIM, DEC_HIDDEN))
    bd1 = jnp.zeros((1, DEC_HIDDEN), jnp.float32)
    wd2 = w(ks[4], (DEC_HIDDEN, LOGITS_DIM))
    bd2 = jnp.zeros((1, LOGITS_DIM), jnp.float32)
    raw = (we1, be1, wmu, bmu, wls, bls, wd1, bd1, wd2, bd2)
    return prepare_params(raw)   # bf16 weights + fused mu/log_std head, done once


if __name__ == "__main__":
    key = jax.random.PRNGKey(0)
    k_params, k_x, k_eps = jax.random.split(key, 3)

    B = 32
    # measure_score_tensor: integer note indices per tick, shape (B, 18)
    measure_score = jax.random.randint(
        k_x, (B, MEASURE_SEQ_LEN), 0, NUM_NOTES).astype(jnp.int32)
    eps = jax.random.normal(k_eps, (B, Z_DIM), jnp.float32)    # reparam noise for rsample
    params = init_params(k_params)

    # default tile: TB=16 => 2 grid steps (exercises the batch-tiled pipeline)
    weights, samples, z_dist, prior_dist = bar_vae_forward(
        measure_score, params, eps)
    jax.block_until_ready(weights)
    jax.block_until_ready(samples)
    jax.block_until_ready(z_dist)
    jax.block_until_ready(prior_dist)

    assert weights.shape == (B, MEASURE_SEQ_LEN, NUM_NOTES)
    assert samples.shape == (B, 1, MEASURE_SEQ_LEN)
    assert z_dist[0].shape == (B, Z_DIM) and z_dist[1].shape == (B, Z_DIM)
    # softmax rows sum to 1 (exact reciprocal => tight tolerance)
    assert bool(jnp.all(jnp.abs(jnp.sum(weights, axis=-1) - 1.0) < 1e-3))
    # samples are valid note indices
    assert bool(jnp.all((samples >= 0) & (samples < NUM_NOTES)))
    # std must be positive
    assert bool(jnp.all(z_dist[1] > 0.0))
    print("KERNEL_OK")
</pallas_src>

<mosaic_0001>
module attributes {stable_mosaic.version = 11 : i64} {
  func.func @bar_vae_kernel(%arg0: i32, %arg1: memref<16x18xf32, #tpu.memory_space<vmem>>, %arg2: memref<16x32xf32, #tpu.memory_space<vmem>>, %arg3: memref<18x64xbf16, #tpu.memory_space<vmem>>, %arg4: memref<1x64xf32, #tpu.memory_space<vmem>>, %arg5: memref<64x64xbf16, #tpu.memory_space<vmem>>, %arg6: memref<1x64xf32, #tpu.memory_space<vmem>>, %arg7: memref<32x64xbf16, #tpu.memory_space<vmem>>, %arg8: memref<1x64xf32, #tpu.memory_space<vmem>>, %arg9: memref<64x288xbf16, #tpu.memory_space<vmem>>, %arg10: memref<1x288xf32, #tpu.memory_space<vmem>>, %arg11: memref<288x18xf32, #tpu.memory_space<vmem>>, %arg12: memref<18x288xf32, #tpu.memory_space<vmem>>, %arg13: memref<16x288xf32, #tpu.memory_space<vmem>>, %arg14: memref<16x18xi32, #tpu.memory_space<vmem>>, %arg15: memref<16x64xf32, #tpu.memory_space<vmem>>) attributes {dimension_semantics = [#tpu.dimension_semantics<parallel>], iteration_bounds = array<i64: 2>, scalar_prefetch = 0 : i64, scratch_operands = 0 : i64, tpu.core_type = #tpu.core_type<tc>, window_params = [{transform_indices = @transform_0, window_bounds = array<i64: 16, 18>}, {transform_indices = @transform_1, window_bounds = array<i64: 16, 32>}, {pipeline_mode = #tpu.pipeline_mode<synchronous>, transform_indices = @transform_2, window_bounds = array<i64: 18, 64>}, {pipeline_mode = #tpu.pipeline_mode<synchronous>, transform_indices = @transform_3, window_bounds = array<i64: 1, 64>}, {pipeline_mode = #tpu.pipeline_mode<synchronous>, transform_indices = @transform_4, window_bounds = array<i64: 64, 64>}, {pipeline_mode = #tpu.pipeline_mode<synchronous>, transform_indices = @transform_5, window_bounds = array<i64: 1, 64>}, {pipeline_mode = #tpu.pipeline_mode<synchronous>, transform_indices = @transform_6, window_bounds = array<i64: 32, 64>}, {pipeline_mode = #tpu.pipeline_mode<synchronous>, transform_indices = @transform_7, window_bounds = array<i64: 1, 64>}, {pipeline_mode = #tpu.pipeline_mode<synchronous>, transform_indices = @transform_8, window_bounds = array<i64: 64, 288>}, {pipeline_mode = #tpu.pipeline_mode<synchronous>, transform_indices = @transform_9, window_bounds = array<i64: 1, 288>}, {pipeline_mode = #tpu.pipeline_mode<synchronous>, transform_indices = @transform_10, window_bounds = array<i64: 288, 18>}, {pipeline_mode = #tpu.pipeline_mode<synchronous>, transform_indices = @transform_11, window_bounds = array<i64: 18, 288>}, {transform_indices = @transform_12, window_bounds = array<i64: 16, 288>}, {transform_indices = @transform_13, window_bounds = array<i64: 16, 18>}, {transform_indices = @transform_14, window_bounds = array<i64: 16, 64>}]} {
    %c0 = arith.constant 0 : index
    %c0_0 = arith.constant 0 : index
    %0 = vector.load %arg1[%c0, %c0_0] : memref<16x18xf32, #tpu.memory_space<vmem>>, vector<16x18xf32>
    %1 = arith.truncf %0 : vector<16x18xf32> to vector<16x18xbf16>
    %c0_1 = arith.constant 0 : index
    %c0_2 = arith.constant 0 : index
    %2 = vector.load %arg3[%c0_1, %c0_2] : memref<18x64xbf16, #tpu.memory_space<vmem>>, vector<18x64xbf16>
    %cst = arith.constant dense<0.000000e+00> : vector<16x64xf32>
    %3 = tpu.matmul %1, %2, %cst {dimension_numbers = #tpu.dot_dimension_numbers<[1], [0], [0], [1], [0, 0, 1, 1], [], []>} : vector<16x18xbf16>, vector<18x64xbf16>, vector<16x64xf32> -> vector<16x64xf32>
    %c0_3 = arith.constant 0 : index
    %c0_4 = arith.constant 0 : index
    %4 = vector.load %arg4[%c0_3, %c0_4] : memref<1x64xf32, #tpu.memory_space<vmem>>, vector<1x64xf32>
    %5 = vector.broadcast %4 : vector<1x64xf32> to vector<16x64xf32>
    %6 = arith.addf %3, %5 : vector<16x64xf32>
    %cst_5 = arith.constant 0.000000e+00 : f32
    %7 = vector.broadcast %cst_5 : f32 to vector<16x64xf32>
    %8 = arith.maximumf %6, %7 : vector<16x64xf32>
    %9 = arith.truncf %8 : vector<16x64xf32> to vector<16x64xbf16>
    %c0_6 = arith.constant 0 : index
    %c0_7 = arith.constant 0 : index
    %10 = vector.load %arg5[%c0_6, %c0_7] : memref<64x64xbf16, #tpu.memory_space<vmem>>, vector<64x64xbf16>
    %cst_8 = arith.constant dense<0.000000e+00> : vector<16x64xf32>
    %11 = tpu.matmul %9, %10, %cst_8 {dimension_numbers = #tpu.dot_dimension_numbers<[1], [0], [0], [1], [0, 0, 1, 1], [], []>} : vector<16x64xbf16>, vector<64x64xbf16>, vector<16x64xf32> -> vector<16x64xf32>
    %c0_9 = arith.constant 0 : index
    %c0_10 = arith.constant 0 : index
    %12 = vector.load %arg6[%c0_9, %c0_10] : memref<1x64xf32, #tpu.memory_space<vmem>>, vector<1x64xf32>
    %13 = vector.broadcast %12 : vector<1x64xf32> to vector<16x64xf32>
    %14 = arith.addf %11, %13 : vector<16x64xf32>
    %15 = tpu.iota {dimensions = array<i32: 1>} : vector<16x64xi32>
    %c32_i32 = arith.constant 32 : i32
    %16 = vector.broadcast %c32_i32 : i32 to vector<16x64xi32>
    %17 = arith.cmpi slt, %15, %16 : vector<16x64xi32>
    %18 = math.exp %14 : vector<16x64xf32>
    %19 = arith.select %17, %14, %18 : vector<16x64xi1>, vector<16x64xf32>
    %20 = vector.extract_strided_slice %19 {offsets = [0, 0], sizes = [16, 32], strides = [1, 1]} : vector<16x64xf32> to vector<16x32xf32>
    %21 = vector.extract_strided_slice %19 {offsets = [0, 32], sizes = [16, 32], strides = [1, 1]} : vector<16x64xf32> to vector<16x32xf32>
    %c0_11 = arith.constant 0 : index
    %c0_12 = arith.constant 0 : index
    %22 = vector.load %arg2[%c0_11, %c0_12] : memref<16x32xf32, #tpu.memory_space<vmem>>, vector<16x32xf32>
    %23 = arith.mulf %21, %22 : vector<16x32xf32>
    %24 = arith.addf %20, %23 : vector<16x32xf32>
    %25 = arith.truncf %24 : vector<16x32xf32> to vector<16x32xbf16>
    %c0_13 = arith.constant 0 : index
    %c0_14 = arith.constant 0 : index
    %26 = vector.load %arg7[%c0_13, %c0_14] : memref<32x64xbf16, #tpu.memory_space<vmem>>, vector<32x64xbf16>
    %cst_15 = arith.constant dense<0.000000e+00> : vector<16x64xf32>
    %27 = tpu.matmul %25, %26, %cst_15 {dimension_numbers = #tpu.dot_dimension_numbers<[1], [0], [0], [1], [0, 0, 1, 1], [], []>} : vector<16x32xbf16>, vector<32x64xbf16>, vector<16x64xf32> -> vector<16x64xf32>
    %c0_16 = arith.constant 0 : index
    %c0_17 = arith.constant 0 : index
    %28 = vector.load %arg8[%c0_16, %c0_17] : memref<1x64xf32, #tpu.memory_space<vmem>>, vector<1x64xf32>
    %29 = vector.broadcast %28 : vector<1x64xf32> to vector<16x64xf32>
    %30 = arith.addf %27, %29 : vector<16x64xf32>
    %cst_18 = arith.constant 0.000000e+00 : f32
    %31 = vector.broadcast %cst_18 : f32 to vector<16x64xf32>
    %32 = arith.maximumf %30, %31 : vector<16x64xf32>
    %33 = arith.truncf %32 : vector<16x64xf32> to vector<16x64xbf16>
    %c0_19 = arith.constant 0 : index
    %c0_20 = arith.constant 0 : index
    %34 = vector.load %arg9[%c0_19, %c0_20] : memref<64x288xbf16, #tpu.memory_space<vmem>>, vector<64x288xbf16>
    %cst_21 = arith.constant dense<0.000000e+00> : vector<16x288xf32>
    %35 = tpu.matmul %33, %34, %cst_21 {dimension_numbers = #tpu.dot_dimension_numbers<[1], [0], [0], [1], [0, 0, 1, 1], [], []>} : vector<16x64xbf16>, vector<64x288xbf16>, vector<16x288xf32> -> vector<16x288xf32>
    %c0_22 = arith.constant 0 : index
    %c0_23 = arith.constant 0 : index
    %36 = vector.load %arg10[%c0_22, %c0_23] : memref<1x288xf32, #tpu.memory_space<vmem>>, vector<1x288xf32>
    %37 = vector.broadcast %36 : vector<1x288xf32> to vector<16x288xf32>
    %38 = arith.addf %35, %37 : vector<16x288xf32>
    %cst_24 = arith.constant dense<0xFF800000> : vector<16xf32>
    %39 = vector.multi_reduction <maximumf>, %38, %cst_24 [1] : vector<16x288xf32> to vector<16xf32>
    %40 = vector.shape_cast %39 : vector<16xf32> to vector<16x1xf32>
    %41 = vector.broadcast %40 : vector<16x1xf32> to vector<16x288xf32>
    %42 = arith.subf %38, %41 : vector<16x288xf32>
    %43 = math.exp %42 : vector<16x288xf32>
    %c0_25 = arith.constant 0 : index
    %c0_26 = arith.constant 0 : index
    %44 = vector.load %arg11[%c0_25, %c0_26] : memref<288x18xf32, #tpu.memory_space<vmem>>, vector<288x18xf32>
    %cst_27 = arith.constant dense<0.000000e+00> : vector<16x18xf32>
    %45 = tpu.matmul %43, %44, %cst_27 {dimension_numbers = #tpu.dot_dimension_numbers<[1], [0], [0], [1], [0, 0, 1, 1], [], []>} : vector<16x288xf32>, vector<288x18xf32>, vector<16x18xf32> -> vector<16x18xf32>
    %46 = tpu.reciprocal %45 : vector<16x18xf32> -> vector<16x18xf32>
    %c0_28 = arith.constant 0 : index
    %c0_29 = arith.constant 0 : index
    %47 = vector.load %arg12[%c0_28, %c0_29] : memref<18x288xf32, #tpu.memory_space<vmem>>, vector<18x288xf32>
    %cst_30 = arith.constant dense<0.000000e+00> : vector<16x288xf32>
    %48 = tpu.matmul %46, %47, %cst_30 {dimension_numbers = #tpu.dot_dimension_numbers<[1], [0], [0], [1], [0, 0, 1, 1], [], []>} : vector<16x18xf32>, vector<18x288xf32>, vector<16x288xf32> -> vector<16x288xf32>
    %49 = arith.mulf %43, %48 : vector<16x288xf32>
    %c0_31 = arith.constant 0 : index
    %c0_32 = arith.constant 0 : index
    %50 = vector.load %arg13[%c0_31, %c0_32] : memref<16x288xf32, #tpu.memory_space<vmem>>, vector<16x288xf32>
    tpu.vector_store %arg13[%c0_31, %c0_32], %49 {strides = array<i32>} : memref<16x288xf32, #tpu.memory_space<vmem>>, vector<16x288xf32>,
    %51 = vector.shape_cast %38 : vector<16x288xf32> to vector<16x18x16xf32>
    %cst_33 = arith.constant dense<0xFF800000> : vector<16x18xf32>
    %52 = vector.multi_reduction <maximumf>, %51, %cst_33 [2] : vector<16x18x16xf32> to vector<16x18xf32>
    %53 = vector.shape_cast %52 : vector<16x18xf32> to vector<16x18x1xf32>
    %54 = tpu.iota {dimensions = array<i32: 2>} : vector<16x18x16xi32>
    %55 = vector.broadcast %53 : vector<16x18x1xf32> to vector<16x18x16xf32>
    %56 = arith.cmpf oeq, %51, %55 : vector<16x18x16xf32>
    %c16_i32 = arith.constant 16 : i32
    %57 = vector.broadcast %c16_i32 : i32 to vector<16x18x16xi32>
    %58 = arith.select %56, %54, %57 : vector<16x18x16xi1>, vector<16x18x16xi32>
    %cst_34 = arith.constant dense<2147483647> : vector<16x18xi32>
    %59 = vector.multi_reduction <minsi>, %58, %cst_34 [2] : vector<16x18x16xi32> to vector<16x18xi32>
    %c0_35 = arith.constant 0 : index
    %c0_36 = arith.constant 0 : index
    %60 = vector.load %arg14[%c0_35, %c0_36] : memref<16x18xi32, #tpu.memory_space<vmem>>, vector<16x18xi32>
    tpu.vector_store %arg14[%c0_35, %c0_36], %59 {strides = array<i32>} : memref<16x18xi32, #tpu.memory_space<vmem>>, vector<16x18xi32>,
    %c0_37 = arith.constant 0 : index
    %c0_38 = arith.constant 0 : index
    %61 = vector.load %arg15[%c0_37, %c0_38] : memref<16x64xf32, #tpu.memory_space<vmem>>, vector<16x64xf32>
    tpu.vector_store %arg15[%c0_37, %c0_38], %19 {strides = array<i32>} : memref<16x64xf32, #tpu.memory_space<vmem>>, vector<16x64xf32>,
    return
  }
  func.func @transform_0(%arg0: i32) -> (i32, i32) {
    %c0_i32 = arith.constant 0 : i32
    %c0_i32_0 = arith.constant 0 : i32
    return %arg0, %c0_i32 : i32, i32
  }
  func.func @transform_1(%arg0: i32) -> (i32, i32) {
    %c0_i32 = arith.constant 0 : i32
    %c0_i32_0 = arith.constant 0 : i32
    return %arg0, %c0_i32 : i32, i32
  }
  func.func @transform_2(%arg0: i32) -> (i32, i32) {
    %c0_i32 = arith.constant 0 : i32
    %c0_i32_0 = arith.constant 0 : i32
    %c0_i32_1 = arith.constant 0 : i32
    return %c0_i32, %c0_i32_0 : i32, i32
  }
  func.func @transform_3(%arg0: i32) -> (i32, i32) {
    %c0_i32 = arith.constant 0 : i32
    %c0_i32_0 = arith.constant 0 : i32
    %c0_i32_1 = arith.constant 0 : i32
    return %c0_i32, %c0_i32_0 : i32, i32
  }
  func.func @transform_4(%arg0: i32) -> (i32, i32) {
    %c0_i32 = arith.constant 0 : i32
    %c0_i32_0 = arith.constant 0 : i32
    %c0_i32_1 = arith.constant 0 : i32
    return %c0_i32, %c0_i32_0 : i32, i32
  }
  func.func @transform_5(%arg0: i32) -> (i32, i32) {
    %c0_i32 = arith.constant 0 : i32
    %c0_i32_0 = arith.constant 0 : i32
    %c0_i32_1 = arith.constant 0 : i32
    return %c0_i32, %c0_i32_0 : i32, i32
  }
  func.func @transform_6(%arg0: i32) -> (i32, i32) {
    %c0_i32 = arith.constant 0 : i32
    %c0_i32_0 = arith.constant 0 : i32
    %c0_i32_1 = arith.constant 0 : i32
    return %c0_i32, %c0_i32_0 : i32, i32
  }
  func.func @transform_7(%arg0: i32) -> (i32, i32) {
    %c0_i32 = arith.constant 0 : i32
    %c0_i32_0 = arith.constant 0 : i32
    %c0_i32_1 = arith.constant 0 : i32
    return %c0_i32, %c0_i32_0 : i32, i32
  }
  func.func @transform_8(%arg0: i32) -> (i32, i32) {
    %c0_i32 = arith.constant 0 : i32
    %c0_i32_0 = arith.constant 0 : i32
    %c0_i32_1 = arith.constant 0 : i32
    return %c0_i32, %c0_i32_0 : i32, i32
  }
  func.func @transform_9(%arg0: i32) -> (i32, i32) {
    %c0_i32 = arith.constant 0 : i32
    %c0_i32_0 = arith.constant 0 : i32
    %c0_i32_1 = arith.constant 0 : i32
    return %c0_i32, %c0_i32_0 : i32, i32
  }
  func.func @transform_10(%arg0: i32) -> (i32, i32) {
    %c0_i32 = arith.constant 0 : i32
    %c0_i32_0 = arith.constant 0 : i32
    %c0_i32_1 = arith.constant 0 : i32
    return %c0_i32, %c0_i32_0 : i32, i32
  }
  func.func @transform_11(%arg0: i32) -> (i32, i32) {
    %c0_i32 = arith.constant 0 : i32
    %c0_i32_0 = arith.constant 0 : i32
    %c0_i32_1 = arith.constant 0 : i32
    return %c0_i32, %c0_i32_0 : i32, i32
  }
  func.func @transform_12(%arg0: i32) -> (i32, i32) {
    %c0_i32 = arith.constant 0 : i32
    %c0_i32_0 = arith.constant 0 : i32
    return %arg0, %c0_i32 : i32, i32
  }
  func.func @transform_13(%arg0: i32) -> (i32, i32) {
    %c0_i32 = arith.constant 0 : i32
    %c0_i32_0 = arith.constant 0 : i32
    return %arg0, %c0_i32 : i32, i32
  }
  func.func @transform_14(%arg0: i32) -> (i32, i32) {
    %c0_i32 = arith.constant 0 : i32
    %c0_i32_0 = arith.constant 0 : i32
    return %arg0, %c0_i32 : i32, i32
  }
}

</mosaic_0001>

<bundles_post_ra>
// kernel: tpu_custom_call.1
= control target key start
LH: loop header
LB: loop body
LE: loop exit
PB: predicated region body
PF: predicated region fallthrough
CT: control target
= control target key end

     0   :  { %s6015_s0 = inlined_call_operand.vmem [shape: f32[32,18], index: 0, kind: input, shape index: {}]   ;;  %s6016_s1 = inlined_call_operand.vmem [shape: f32[32,32], index: 1, kind: input, shape index: {}]   ;;  %s6017_s2 = inlined_call_operand.vmem [shape: bf16[18,64], index: 2, kind: input, shape index: {}]   ;;  %s6018_s3 = inlined_call_operand.vmem [shape: f32[1,64], index: 3, kind: input, shape index: {}]   ;;  %s6019_s4 = inlined_call_operand.vmem [shape: bf16[64,64], index: 4, kind: input, shape index: {}]   ;;  %s6020_s5 = inlined_call_operand.vmem [shape: f32[1,64], index: 5, kind: input, shape index: {}]   ;;  %s6021_s6 = inlined_call_operand.vmem [shape: bf16[32,64], index: 6, kind: input, shape index: {}]   ;;  %s6022_s7 = inlined_call_operand.vmem [shape: f32[1,64], index: 7, kind: input, shape index: {}]   ;;  %s6023_s8 = inlined_call_operand.vmem [shape: bf16[64,288], index: 8, kind: input, shape index: {}]   ;;  %s6024_s9 = inlined_call_operand.vmem [shape: f32[1,288], index: 9, kind: input, shape index: {}]   ;;  %s6025_s10 = inlined_call_operand.vmem [shape: f32[288,18], index: 10, kind: input, shape index: {}]   ;;  %s6026_s11 = inlined_call_operand.vmem [shape: f32[18,288], index: 11, kind: input, shape index: {}]   ;;  %s6027_s12 = inlined_call_operand.hbm [shape: f32[32,288], index: 12, kind: output, shape index: {0}]   ;;  %s6028_s13 = inlined_call_operand.vmem [shape: s32[32,18], index: 13, kind: output, shape index: {1}]   ;;  %s6029_s14 = inlined_call_operand.hbm [shape: f32[32,64], index: 14, kind: output, shape index: {2}]  }
   0x1   :  { %6107 = sst [smem:[#allocation61_spill]] %s6015_s0 }
   0x2   :  { %6108 = sst [smem:[#allocation62_spill]] %s6016_s1 }
   0x3   :  { %6109 = sst [smem:[#allocation63_spill]] %s6017_s2 }
   0x4   :  { %6110 = sst [smem:[#allocation64_spill]] %s6018_s3 }
   0x5   :  { %6111 = sst [smem:[#allocation65_spill]] %s6019_s4 }
   0x6   :  { %6112 = sst [smem:[#allocation66_spill]] %s6020_s5 }
   0x7   :  { %6113 = sst [smem:[#allocation67_spill]] %s6021_s6 }
   0x8   :  { %6114 = sst [smem:[#allocation68_spill]] %s6022_s7 }
   0x9   :  { %6115 = sst [smem:[#allocation69_spill]] %s6023_s8 }
   0xa   :  { %6116 = sst [smem:[#allocation70_spill]] %s6024_s9 }
   0xb   :  { %20 = vsyncpa [#allocation3], 0 }
   0xc   :  { %22 = vsyncpa [#allocation3 + $0x1], 0 }
   0xd   :  { %23 = vsyncpa [#allocation5], 0 }
   0xe   :  { %25 = vsyncpa [#allocation5 + $0x1], 0  ;;  %s4061_s29 = smov 0   ;;  %s4063_s30 = smov 0  }
   0xf   :  { %s4065_s15 = smov 0   ;;  %s4067_s16 = smov 0  }
  0x10 LB: > { %s4082_s17 = sadd.s32 4294967295, %s3966_s16   ;;  %s3536_s18 = sadd.s32 4294967294, %s3966_s16   ;;  %s3966_s16 = sphi %s4067_s16, %s6282_s16   ;;  %s3962_s15 = sphi %s4065_s15, %s6281_s15   ;;  %s3958_s30 = sphi %s4063_s30, %s6280_s30   ;;  %s3954_s29 = sphi %s4061_s29, %s6279_s29  }
  0x11   : > { %s4086_s19 = sadd.s32 1, %s3966_s16   ;;  %s300_s20 = sadd.s32 1, %s3962_s15 }
  0x12   : > { %s297_s21 = ssub.s32 %s3966_s16, %s4086_s19  ;;  %p310_p0 = scmp.ne.s32.totalorder %s3962_s15, %s3958_s30 }
  0x13   : > { %p298_p1 = scmp.eq.s32.totalorder %s297_s21, 0  ;;  %p311_p2 = scmp.eq.s32.totalorder %s4082_s17, 1 }
  0x14   : > { %p316_p3 = scmp.ne.s32.totalorder %s3958_s30, %s3954_s29  ;;  %p317_p4 = scmp.eq.s32.totalorder %s3536_s18, 1 }
  0x15   : > { %s4097_s22 = scalar_select %p298_p1, %s3962_s15, %s300_s20  }
  0x16   : > { %p4099_p5 = por %p311_p2, %p310_p0  ;;  %p4103_p6 = por %p317_p4, %p316_p3 }
  0x17   : > { %p3539_p7 = scmp.ge.s32.totalorder %s3966_s16, 1  ;;  %p435_p8 = scmp.lt.s32.totalorder %s3966_s16, 3 }
  0x19   : > { %p436_p9 = pnand %p3539_p7, %p435_p8 }
  0x1b   : > { %439 = sbr.rel (%p436_p9) target bundleno = 1864 (0x748), region = 68 }
  0x22   : > { %s6119_s2 = sld [smem:[#allocation63_spill]]  ;;  %v6038_v1 = vmov 0.0   ;;  %vm543_vm0 = vcmask 1040384   ;;  %s3541_s18 = sshll.u32 %s4082_s17, 1  ;;  %vm3969_vm1 = vmmov 0   ;;  %vm539_vm2 = vcmask 146432  }
  0x23   : > { %3658 = vmatprep.subr.bf16.mxu1 %v6038_v1  ;;  %3678 = vmatprep.subr.bf16.mxu0 %v6038_v1  ;;  %p497_p10 = scmp.lt.s32.totalorder %s3541_s18, 3  ;;  %s6120_s4 = sld [smem:[#allocation65_spill]]  ;;  %vm630_vm3 = vcmask 523264   ;;  %v675_v32 = vlaneseq  ;;  %vm730_vm5 = vcmask 261120   ;;  %v3972_v61 = vmov 0  }
  0x24   : > { %3662 = vmatprep.mubr.msk.bf16.mxu1 %vm3969_vm1, %v6038_v1  ;;  %3682 = vmatprep.mubr.msk.bf16.mxu0 %vm3969_vm1, %v6038_v1  ;;  %s6121_s0 = sld [smem:[#allocation61_spill]]  ;;  %s6122_s1 = sld [smem:[#allocation62_spill]]  ;;  %vm2152_vm6 = vcmask 123904   ;;  %vm2145_vm7 = vcmask 130048   ;;  %vm1199_vm8 = vcmask 1041408  }
  0x25   : > { %s6284_s18 = smov (!%p497_p10, %s3541_s18), 3  ;;  %s6123_s3 = sld [smem:[#allocation64_spill]]  ;;  %v4172_v34 = vand.u32 127, %v675_v32 }
  0x26   : > { %s4123_s20 = sshll.u32 %s6284_s18, 3  ;;  %s6124_s5 = sld [smem:[#allocation66_spill]] }
  0x27   : > { %s6125_s6 = sld [smem:[#allocation67_spill]]  ;;  %6126 = vst [vmem:[#allocation8_spill] sm:$0xff] %v4172_v34  ;;  %vm677_vm4 = vcmp.lt.s32.totalorder %v4172_v34, 32  ;;  %s6127_s8 = sld [smem:[#allocation69_spill]] }
  0x28   : > { %v3828_v0 = vld [vmem:[%s6119_s2] sm:$0xff]   ;;  %v3829_v2 = vld [vmem:[%s6119_s2 + $0x8] ss:$0 sps:$4 sm:$0x11]   ;;  %s6032_s25 = smov 96   ;;  %s6128_s7 = sld [smem:[#allocation68_spill]] }
  0x29   : > { %3659 = vmatpush3.bf16.msra.mxu1 %v3828_v0  ;;  %v545_v3 = vsel %vm543_vm0, %v3829_v2, 0  ;;  %v3830_v4 = vld [vmem:[%s6120_s4] sm:$0xff]   ;;  %v3831_v8 = vld [vmem:[%s6120_s4 + $0x8] sm:$0xff]   ;;  %v3832_v9 = vld [vmem:[%s6120_s4 + $0x10] sm:$0xff]   ;;  %s6130_s9 = sld [smem:[#allocation70_spill]]  ;;  %s3975_s27 = smov 64  }
  0x2a   : > { %3660 = vmatprep.subr.bf16.mxu1 %v6038_v1  ;;  %s500_s28 = scalar_lea.vmem %s6121_s0, %s4123_s20  ;;  %v3833_v10 = vld [vmem:[%s6120_s4 + $0x18] sm:$0xff]   ;;  %s506_s18 = scalar_lea.vmem %s6122_s1, %s4123_s20 }
  0x2b   : > { %v517_v5 = vld [vmem:[%s500_s28] sm:$0xff]  ;;  %v518_v6 = vld [vmem:[%s500_s28 + $0x8] sm:$0xff]  ;;  %s6030_s0 = smov 32   ;;  %s6131_s1 = smov 96  }
  0x2c   : > { %v519_v7 = vpack.c.bf16 %v518_v6, %v517_v5  ;;  %v684_v11 = vld [vmem:[%s506_s18] sm:$0xff]  ;;  %v685_v12 = vld [vmem:[%s506_s18 + $0x8] sm:$0xff]  ;;  %s4168_s18 = sand.u32 1, %s3958_s30  }
  0x2d   : > { %3661 = vmatpush3.bf16.msra.mxu1 %v545_v3  ;;  %688 = vrot.lane.b32.xlu0 %v684_v11, %s6030_s0  ;;  %v3547_v13 = vld [vmem:[%s6123_s3] ss:$0 sm:$0xff]  ;;  %v3835_v35 = vld [vmem:[%s6125_s6 + $0x8] sm:$0xff]   ;;  %s3540_s26 = sshll.u32 %s4168_s18, 4  ;;  %v3838_v37 = vld [vmem:[%s6127_s8 + $0x4] ss:$12 sps:$4 sm:$0xff]  }
  0x2e   : > { %3666 = vmatprep.subr.bf16.mxu1 %v6038_v1  ;;  %v3551_v23 = vld [vmem:[%s6124_s5] ss:$0 sm:$0xff]  ;;  %v3839_v39 = vld [vmem:[%s6127_s8 + $0x8] ss:$12 sps:$4 sm:$0xff]   ;;  %s4185_s21 = scalar_lea.vmem [#allocation4], %s3540_s26  ;;  %s3976_s3 = smov 48  }
  0x2f   : > { %v3834_v33 = vld [vmem:[%s6125_s6] sm:$0xff]   ;;  %v3842_v53 = vld [vmem:[%s6127_s8 + $0x1c] ss:$12 sps:$4 sm:$0xff]   ;;  %v3850_v58 = vld [vmem:[%s6127_s8 + $0x4c] ss:$12 sps:$4 sm:$0xff]   ;;  %s3977_s26 = smov 16  }
  0x30   : > { %3663 = vmatmul.mubr.msk.bf16.vlgmr.msra.gmra.mrb[0].mxu1 %vm539_vm2, %v519_v7  ;;  %3679 = vmatpush3.bf16.msra.mxu0 %v3834_v33  ;;  %v3843_v45 = vld [vmem:[%s6127_s8 + $0x20] ss:$12 sps:$4 sm:$0xff]   ;;  %v3840_v54 = vld [vmem:[%s6127_s8 + $0x18] ss:$12 sps:$4 sm:$0xff]   ;;  %v3844_v56 = vld [vmem:[%s6127_s8 + $0x30] ss:$12 sps:$4 sm:$0xff]  }
  0x31   : > { %3667 = vmatpush3.bf16.msra.mxu1 %v3830_v4  ;;  %3674 = vmatprep.mubr.msk.bf16.mxu1 %vm3969_vm1, %v6038_v1  ;;  %v3836_v51 = vld [vmem:[%s6127_s8] ss:$12 sps:$4 sm:$0xff]   ;;  %v3847_v57 = vld [vmem:[%s6127_s8 + $0x38] ss:$12 sps:$4 sm:$0xff]   ;;  %v3848_v59 = vld [vmem:[%s6127_s8 + $0x48] ss:$12 sps:$4 sm:$0xff]  }
  0x32   : > { %3668 = vmatprep.subr.bf16.mxu1 %v6038_v1  ;;  %690 = vrot.lane.b32.xlu0 %v685_v12, %s6030_s0  ;;  %v3846_v55 = vld [vmem:[%s6127_s8 + $0x34] ss:$12 sps:$4 sm:$0xff]   ;;  %v3851_v60 = vld [vmem:[%s6127_s8 + $0x50] ss:$12 sps:$4 sm:$0xff]   ;;  %s6034_s0 = smov 112   ;;  %s6133_s5 = smov 112  }
  0x33   : > { %3680 = vmatprep.subr.bf16.mxu0 %v6038_v1  ;;  %v3557_v62 = vld [vmem:[%s6128_s7] ss:$0 sm:$0xff]  ;;  %s3361_s2 = scalar_lea.sflag [#allocation3], %s4168_s18 }
  0x34   : > { %3681 = vmatpush3.bf16.msra.mxu0 %v3835_v35  ;;  %v990_v11 = vld [vmem:[%s6025_s10] sm:$0xff]  ;;  %v4281_v35 = vshrl.u32 %v675_v32, 7 }
  0x35   : > { %3669 = vmatpush3.bf16.msra.mxu1 %v3831_v8  ;;  %878 = vmatprep.subr.bf16.mxu0 %v3838_v37 }
  0x36   : > { %3670 = vmatprep.subr.bf16.mxu1 %v6038_v1  ;;  %6129 = vst [vmem:[#allocation9_spill] sm:$0xff] %v4281_v35  ;;  %v806_v37 = vsub.s32 2, %v4281_v35 }
  0x39   : > { %3671 = vmatpush3.bf16.msra.mxu1 %v3832_v9  ;;  %v1006_v9 = vld [vmem:[%s6025_s10 + $0x80] sm:$0xff] }
  0x3a   : > { %3672 = vmatprep.subr.bf16.mxu1 %v6038_v1 }
  0x3d   : > { %3673 = vmatpush3.bf16.msra.mxu1 %v3833_v10  ;;  %v1007_v10 = vld [vmem:[%s6025_s10 + $0x88] sm:$0xff] }
  0x3e   : > { %3686 = vmatprep.subr.bf16.mxu1 %v6038_v1  ;;  %v3718_v12 = vpack.c.bf16 %v1007_v10, %v1006_v9  ;;  %v1001_v9 = vld [vmem:[%s6025_s10 + $0x58] sm:$0xff] }
  0x9f   : > { %v689_v36 = vpop.permute.xlu0 %688 }
  0xa4   : > { %v691_v43 = vpop.permute.xlu0 %690 }
 0x103   : > { %v581_v14 = vpop.f32.mrb[0].mxu1 }
 0x104   : > { %v582_v15 = vadd.f32 %v3547_v13, %v581_v14  ;;  %v3664_v16 = vpop.f32.mrb[1].mxu1  ;;  %v1008_v14 = vld [vmem:[%s6025_s10 + $0x90] sm:$0xff] }
 0x105   : > { %v584_v17 = vpop.f32.mrb[2].mxu1 }
 0x106   : > { %v585_v18 = vadd.f32 %v3547_v13, %v584_v17  ;;  %v3665_v19 = vpop.f32.mrb[3].mxu1  ;;  %v588_v20 = vmax.f32 %v582_v15, 0.0  ;;  %v991_v13 = vld [vmem:[%s6025_s10 + $0x8] sm:$0xff]  ;;  %v1009_v15 = vld [vmem:[%s6025_s10 + $0x98] sm:$0xff] }
 0x107   : > { %v3720_v16 = vpack.c.bf16 %v991_v13, %v990_v11  ;;  %v3722_v17 = vpack.c.bf16 %v1009_v15, %v1008_v14  ;;  %v993_v19 = vld [vmem:[%s6025_s10 + $0x18] sm:$0xff]  ;;  %v1018_v11 = vld [vmem:[%s6025_s10 + $0xe0] sm:$0xff]  ;;  %v1003_v15 = vld [vmem:[%s6025_s10 + $0x68] sm:$0xff] }
 0x108   : > { %v589_v21 = vmax.f32 %v585_v18, 0.0  ;;  %v992_v18 = vld [vmem:[%s6025_s10 + $0x10] sm:$0xff]  ;;  %v1002_v14 = vld [vmem:[%s6025_s10 + $0x60] sm:$0xff] }
 0x10a   : > { %v590_v22 = vpack.c.bf16 %v589_v21, %v588_v20  ;;  %v1010_v20 = vld [vmem:[%s6025_s10 + $0xa0] sm:$0xff]  ;;  %v1011_v21 = vld [vmem:[%s6025_s10 + $0xa8] sm:$0xff] }
 0x10c   : > { %3675 = vmatmul.mubr.msk.bf16.vlgmr.msra.gmra.mrb[4].mxu1 %vm630_vm3, %v590_v22  ;;  %v3724_v22 = vpack.c.bf16 %v993_v19, %v992_v18  ;;  %v1023_v18 = vld [vmem:[%s6025_s10 + $0x108] sm:$0xff] }
 0x10d   : > { %3694 = vmatprep.mubr.msk.bf16.mxu1 %vm3969_vm1, %v6038_v1  ;;  %3687 = vmatpush3.bf16.msra.mxu1 %v3839_v39  ;;  %v802_v39 = vsub.s32 1, %v4281_v35 }
 0x10e   : > { %3688 = vmatprep.subr.bf16.mxu1 %v6038_v1 }
 0x111   : > { %3689 = vmatpush3.bf16.msra.mxu1 %v3843_v45 }
 0x112   : > { %3690 = vmatprep.subr.bf16.mxu1 %v6038_v1 }
 0x115   : > { %3691 = vmatpush3.bf16.msra.mxu1 %v3847_v57 }
 0x116   : > { %3692 = vmatprep.subr.bf16.mxu1 %v6038_v1 }
 0x119   : > { %3693 = vmatpush3.bf16.msra.mxu1 %v3851_v60 }
 0x1df   : > { %v668_v24 = vpop.f32.mrb[4].mxu1 }
 0x1e0   : > { %v669_v25 = vadd.f32 %v3551_v23, %v668_v24  ;;  %v3676_v26 = vpop.f32.mrb[5].mxu1  ;;  %v994_v24 = vld [vmem:[%s6025_s10 + $0x20] sm:$0xff] }
 0x1e1   : > { %v671_v27 = vpop.f32.mrb[6].mxu1  ;;  %v1012_v26 = vld [vmem:[%s6025_s10 + $0xb0] sm:$0xff] }
 0x1e2   : > { %v678_v28 = vmul.f32 1.442695, %v669_v25  ;;  %v672_v29 = vadd.f32 %v3551_v23, %v671_v27  ;;  %v3677_v30 = vpop.f32.mrb[7].mxu1  ;;  %v3726_v23 = vpack.c.bf16 %v1011_v21, %v1010_v20  ;;  %v1013_v27 = vld [vmem:[%s6025_s10 + $0xb8] sm:$0xff]  ;;  %v1020_v20 = vld [vmem:[%s6025_s10 + $0xf0] sm:$0xff] }
 0x1e3   : > { %v996_v30 = vld [vmem:[%s6025_s10 + $0x30] sm:$0xff]  ;;  %v1021_v21 = vld [vmem:[%s6025_s10 + $0xf8] sm:$0xff] }
 0x1e4   : > { %3852 = vpow2.f32 %v678_v28  ;;  %v680_v31 = vmul.f32 1.442695, %v672_v29 }
 0x1e6   : > { %3854 = vpow2.f32 %v680_v31  ;;  %v997_v31 = vld [vmem:[%s6025_s10 + $0x38] sm:$0xff] }
 0x1e7   : > { %v3732_v33 = vpack.c.bf16 %v997_v31, %v996_v30 }
 0x1ee   : > { %v3853_v38 = vpop.eup %3852 }
 0x1ef   : > { %v682_v40 = vsel %vm677_vm4, %v669_v25, %v3853_v38  ;;  %v995_v25 = vld [vmem:[%s6025_s10 + $0x28] sm:$0xff]  ;;  %v794_v38 = vld [vmem:[%s6130_s9] sm:$0x7] }
 0x1f0   : > { %v3855_v41 = vpop.eup %3854  ;;  %v694_v42 = vmul.f32 %v689_v36, %v682_v40  ;;  %3358 = vst.msk [vmem:[%s4185_s21] sm:$0xff] %vm630_vm3, %v682_v40  ;;  %v3728_v28 = vpack.c.bf16 %v995_v25, %v994_v24  ;;  %v798_v36 = vsub.s32 0, %v4281_v35  ;;  %v1005_v24 = vld [vmem:[%s6025_s10 + $0x78] sm:$0xff]  ;;  %v1024_v25 = vld [vmem:[%s6025_s10 + $0x110] sm:$0xff] }
 0x1f1   : > { %v683_v44 = vsel %vm677_vm4, %v672_v29, %v3855_v41  ;;  %v3730_v29 = vpack.c.bf16 %v1013_v27, %v1012_v26  ;;  %v807_v41 = vrot.slane %v794_v38, %v806_v37  ;;  %v1025_v27 = vld [vmem:[%s6025_s10 + $0x118] sm:$0xff] }
 0x1f2   : > { %3359 = vst.msk [vmem:[%s4185_s21 + $0x8] sm:$0xff] %vm630_vm3, %v683_v44  ;;  %698 = vrot.lane.b32.xlu1 %v694_v42, %s6032_s25  ;;  %v695_v46 = vmul.f32 %v691_v43, %v683_v44 }
 0x1f6   : > { %700 = vrot.lane.b32.xlu1 %v695_v46, %s6032_s25  ;;  %s6132_s25 = smov 32  }
 0x264   : > { %v699_v47 = vpop.permute.xlu1 %698 }
 0x265   : > { %v704_v49 = vadd.f32 %v699_v47, %v682_v40  ;;  %v799_v40 = vrot.slane %v794_v38, %v798_v36 }
 0x268   : > { %v701_v48 = vpop.permute.xlu1 %700 }
 0x269   : > { %v705_v50 = vadd.f32 %v701_v48, %v683_v44  ;;  %v803_v44 = vrot.slane %v794_v38, %v802_v39 }
 0x26b   : > { %v706_v52 = vpack.c.bf16 %v705_v50, %v704_v49 }
 0x26d   : > { %3683 = vmatmul.mubr.msk.bf16.vlgmr.msra.gmra.mrb[0].mxu0 %vm730_vm5, %v706_v52 }
 0x26e   : > { %879 = vmatpush1.bf16.msra.mxu0 %v3836_v51  ;;  %910 = vmatprep.mubr.bf16.mxu0 %v3972_v61 }
 0x26f   : > { %880 = vmatprep.subr.bf16.mxu0 %v3842_v53 }
 0x272   : > { %881 = vmatpush1.bf16.msra.mxu0 %v3840_v54 }
 0x273   : > { %882 = vmatprep.subr.bf16.mxu0 %v3846_v55 }
 0x276   : > { %883 = vmatpush1.bf16.msra.mxu0 %v3844_v56 }
 0x277   : > { %884 = vmatprep.subr.bf16.mxu0 %v3850_v58 }
 0x27a   : > { %885 = vmatpush1.bf16.msra.mxu0 %v3848_v59 }
 0x27b   : > { %3719 = vmatprep.subr.bf16.mxu0 %v3718_v12  ;;  %v1019_v12 = vld [vmem:[%s6025_s10 + $0xe8] sm:$0xff] }
 0x27c   : > { %v3742_v13 = vpack.c.bf16 %v1019_v12, %v1018_v11 }
 0x340   : > { %v768_v63 = vpop.f32.mrb[0].mxu0 }
 0x341   : > { %v769_v0 = vadd.f32 %v3557_v62, %v768_v63  ;;  %v3684_v2 = vpop.f32.mrb[1].mxu0  ;;  %v1015_v63 = vld [vmem:[%s6025_s10 + $0xc8] sm:$0xff] }
 0x342   : > { %v771_v3 = vpop.f32.mrb[2].mxu0  ;;  %v998_v2 = vld [vmem:[%s6025_s10 + $0x40] sm:$0xff] }
 0x343   : > { %v772_v4 = vadd.f32 %v3557_v62, %v771_v3  ;;  %v3685_v5 = vpop.f32.mrb[3].mxu0  ;;  %v775_v6 = vmax.f32 %v769_v0, 0.0  ;;  %v1014_v62 = vld [vmem:[%s6025_s10 + $0xc0] sm:$0xff]  ;;  %v999_v3 = vld [vmem:[%s6025_s10 + $0x48] sm:$0xff] }
 0x344   : > { %v3734_v0 = vpack.c.bf16 %v1015_v63, %v1014_v62  ;;  %v1016_v5 = vld [vmem:[%s6025_s10 + $0xd0] sm:$0xff] }
 0x345   : > { %v776_v7 = vmax.f32 %v772_v4, 0.0  ;;  %v3736_v4 = vpack.c.bf16 %v999_v3, %v998_v2 }
 0x347   : > { %v777_v8 = vpack.c.bf16 %v776_v7, %v775_v6  ;;  %v1017_v6 = vld [vmem:[%s6025_s10 + $0xd8] sm:$0xff] }
 0x348   : > { %v3738_v7 = vpack.c.bf16 %v1017_v6, %v1016_v5 }
 0x349   : > { %3573 = vmatmul.mubr.msk.bf16.vlgmr.msra.gmra.mrb[4].mxu0 %vm630_vm3, %v777_v8  ;;  %3695 = vmatmul.mubr.msk.bf16.vlgmr.msra.gmra.mrb[8].mxu1 %vm630_vm3, %v777_v8  ;;  %v1000_v8 = vld [vmem:[%s6025_s10 + $0x50] sm:$0xff] }
 0x34a   : > { %3721 = vmatpush3.bf16.msra.mxu0 %v3720_v16  ;;  %v3740_v10 = vpack.c.bf16 %v1001_v9, %v1000_v8  ;;  %v1022_v16 = vld [vmem:[%s6025_s10 + $0x100] sm:$0xff] }
 0x34b   : > { %3723 = vmatprep.subr.bf16.mxu0 %v3722_v17  ;;  %v3744_v17 = vpack.c.bf16 %v1003_v15, %v1002_v14  ;;  %v3750_v19 = vpack.c.bf16 %v1023_v18, %v1022_v16 }
 0x34d   : > { %3751 = vmatprep.subr.bf16.mxu1 %v3750_v19 }
 0x34e   : > { %3725 = vmatpush3.bf16.msra.mxu0 %v3724_v22  ;;  %v3746_v22 = vpack.c.bf16 %v1021_v21, %v1020_v20  ;;  %3753 = vmatpush3.bf16.msra.mxu1 %v3750_v19 }
 0x34f   : > { %3727 = vmatprep.subr.bf16.mxu0 %v3726_v23  ;;  %v1004_v23 = vld [vmem:[%s6025_s10 + $0x70] sm:$0xff] }
 0x350   : > { %v3748_v26 = vpack.c.bf16 %v1005_v24, %v1004_v23  ;;  %v3979_v23 = vmov 1934713408  }
 0x351   : > { %v1536_v24 = vunpack.c.l.s4 %v3979_v23 }
 0x352   : > { %3729 = vmatpush3.bf16.msra.mxu0 %v3728_v28  ;;  %v3754_v28 = vpack.c.bf16 %v1025_v27, %v1024_v25 }
 0x353   : > { %3731 = vmatprep.subr.bf16.mxu0 %v3730_v29 }
 0x354   : > { %3755 = vmatprep.subr.bf16.mxu1 %v3754_v28 }
 0x355   : > { %3757 = vmatpush3.bf16.msra.mxu1 %v3754_v28 }
 0x356   : > { %3733 = vmatpush3.bf16.msra.mxu0 %v3732_v33 }
 0x357   : > { %3735 = vmatprep.subr.bf16.mxu0 %v3734_v0 }
 0x35a   : > { %3737 = vmatpush3.bf16.msra.mxu0 %v3736_v4 }
 0x35b   : > { %3739 = vmatprep.subr.bf16.mxu0 %v3738_v7 }
 0x35e   : > { %3741 = vmatpush3.bf16.msra.mxu0 %v3740_v10 }
 0x35f   : > { %3743 = vmatprep.subr.bf16.mxu0 %v3742_v13 }
 0x362   : > { %3745 = vmatpush3.bf16.msra.mxu0 %v3744_v17  ;;  %v3978_v17 = vmov 1983009808  }
 0x363   : > { %3747 = vmatprep.subr.bf16.mxu0 %v3746_v22  ;;  %v1472_v18 = vunpack.c.l.s4 %v3978_v17 }
 0x365   : > { %v1473_v21 = vunpack.c.0.s8 %v1472_v18 }
 0x366   : > { %3749 = vmatpush3.bf16.msra.mxu0 %v3748_v26 }
 0x367   : > { %v4499_v26 = vsub.s32 %v1473_v21, %v4281_v35 }
 0x41c   : > { %v912_v42 = vpop.f32.mrb[4].mxu0  ;;  %v955_v43 = vpop.f32.mrb[8].mxu1 }
 0x41d   : > { %v4289_v45 = vadd.f32 %v912_v42, %v799_v40  ;;  %v4291_v46 = vadd.f32 %v955_v43, %v807_v41  ;;  %v914_v32 = vpop.f32.mrb[5].mxu0  ;;  %v3696_v47 = vpop.f32.mrb[9].mxu1 }
 0x41e   : > { %v916_v48 = vpop.f32.mrb[6].mxu0  ;;  %v958_v49 = vpop.f32.mrb[10].mxu1  ;;  %v4299_v55 = vadd.f32 %v914_v32, %v803_v44 }
 0x41f   : > { %v4293_v50 = vadd.f32 %v916_v48, %v799_v40  ;;  %v4295_v51 = vadd.f32 %v958_v49, %v807_v41  ;;  %v918_v52 = vpop.f32.mrb[7].mxu0  ;;  %v3697_v53 = vpop.f32.mrb[11].mxu1  ;;  %v962_v54 = vsel %vm730_vm5, %v4291_v46, -inf }
 0x420   : > { %v963_v56 = vmax.f32 %v4289_v45, %v962_v54  ;;  %v4304_v58 = vadd.f32 %v918_v52, %v803_v44 }
 0x421   : > { %v967_v57 = vsel %vm730_vm5, %v4295_v51, -inf }
 0x422   : > { %v964_v59 = vmax.f32 %v963_v56, %v4299_v55  ;;  %v968_v60 = vmax.f32 %v4293_v50, %v967_v57 }
 0x424   : > { %965 = vmax.xlane.f32.xlu0 %v964_v59  ;;  %v969_v61 = vmax.f32 %v968_v60, %v4304_v58 }
 0x426   : > { %970 = vmax.xlane.f32.xlu1 %v969_v61 }
 0x437   : > { %1377 = vrot.lane.b32.xlu1 %v4293_v50, %s6034_s0 }
 0x43a   : > { %1375 = vrot.lane.b32.xlu0 %v4289_v45, %s6034_s0  ;;  %s3974_s0 = smov 80  }
 0x43b   : > { %1383 = vrot.lane.b32.xlu1 %v4293_v50, %s6131_s1 }
 0x43e   : > { %1381 = vrot.lane.b32.xlu0 %v4289_v45, %s6131_s1 }
 0x43f   : > { %1389 = vrot.lane.b32.xlu1 %v4293_v50, %s3974_s0 }
 0x442   : > { %1387 = vrot.lane.b32.xlu0 %v4289_v45, %s3974_s0 }
 0x443   : > { %1395 = vrot.lane.b32.xlu1 %v4293_v50, %s3975_s27 }
 0x446   : > { %1393 = vrot.lane.b32.xlu0 %v4289_v45, %s3975_s27 }
 0x447   : > { %1401 = vrot.lane.b32.xlu1 %v4293_v50, %s3976_s3 }
 0x44a   : > { %1399 = vrot.lane.b32.xlu0 %v4289_v45, %s3976_s3 }
 0x44b   : > { %1407 = vrot.lane.b32.xlu1 %v4293_v50, %s6132_s25 }
 0x44e   : > { %1405 = vrot.lane.b32.xlu0 %v4289_v45, %s6132_s25 }
 0x44f   : > { %1413 = vrot.lane.b32.xlu1 %v4293_v50, %s3977_s26 }
 0x452   : > { %1411 = vrot.lane.b32.xlu0 %v4289_v45, %s3977_s26 }
 0x453   : > { %1421 = vrot.lane.b32.xlu1 %v4304_v58, %s6133_s5 }
 0x456   : > { %1419 = vrot.lane.b32.xlu0 %v4299_v55, %s6133_s5 }
 0x457   : > { %1427 = vrot.lane.b32.xlu1 %v4304_v58, %s6131_s1 }
 0x45a   : > { %1425 = vrot.lane.b32.xlu0 %v4299_v55, %s6131_s1  ;;  %s3767_s1 = smul.u32 768, %s4082_s17 }
 0x45b   : > { %1433 = vrot.lane.b32.xlu1 %v4304_v58, %s3974_s0 }
 0x45c   : > { %s5657_s4 = scalar_lea.hbm %s6027_s12, %s3767_s1 }
 0x45e   : > { %1431 = vrot.lane.b32.xlu0 %v4299_v55, %s3974_s0 }
 0x45f   : > { %1439 = vrot.lane.b32.xlu1 %v4304_v58, %s3975_s27 }
 0x462   : > { %1437 = vrot.lane.b32.xlu0 %v4299_v55, %s3975_s27  ;;  %s3980_s27 = smov [#allocation2]  }
 0x463   : > { %1445 = vrot.lane.b32.xlu1 %v4304_v58, %s3976_s3 }
 0x466   : > { %1443 = vrot.lane.b32.xlu0 %v4299_v55, %s3976_s3  ;;  %s3766_s3 = smul.u32 48, %s4168_s18 }
 0x467   : > { %1451 = vrot.lane.b32.xlu1 %v4304_v58, %s6132_s25 }
 0x46a   : > { %1449 = vrot.lane.b32.xlu0 %v4299_v55, %s6132_s25  ;;  %s5562_s25 = scalar_lea.vmem [#allocation2], %s3766_s3  ;;  %s3876_s3 = sshll.u32 %s3980_s27, 4  ;;  %s3877_s3 = int_to_ptr.vmem [resolvable:$false] %s3876_s3 }
 0x46b   : > { %1457 = vrot.lane.b32.xlu1 %v4304_v58, %s3977_s26 }
 0x46e   : > { %1455 = vrot.lane.b32.xlu0 %v4299_v55, %s3977_s26  ;;  %s3405_s26 = sshll.u32 %s4185_s21, 4  ;;  %s5646_s26 = int_to_ptr.vmem [resolvable:$true] %s3405_s26 }
 0x46f   : > { %1465 = vrot.lane.b32.xlu1 %v4295_v51, %s6133_s5 }
 0x472   : > { %1463 = vrot.lane.b32.xlu0 %v4291_v46, %s6133_s5  ;;  %s3385_s5 = sshll.u32 %s5562_s25, 4  ;;  %s5649_s5 = int_to_ptr.vmem [resolvable:$true] %s3385_s5 }
 0x473   : > { %s3872_s28 = scalar_lea.vmem %s5649_s5, 768  ;;  %p3879_p0 = scmp.lt.s32.totalorder %s5649_s5, %s3877_s3 }
 0x474   : > { %p3873_p11 = scmp.ne.s32.totalorder %s5649_s5, %s3872_s28 }
 0x476   : > { %p3874_p12 = pnand %p3873_p11, %p4099_p5 }
 0x478   : > { %p3875_p13 = pneg %p3874_p12 }
 0x4b1   : > { %v966_v29 = vpop.xlane.xlu0 %965 }
 0x4b2   : > { %v972_v30 = vsub.f32 %v4289_v45, %v966_v29  ;;  %v973_v31 = vsub.f32 %v4299_v55, %v966_v29  ;;  %v974_v33 = vsub.f32 %v4291_v46, %v966_v29  ;;  %v1741_v29 = vcombine.high %v4291_v46, %v6038_v1 }
 0x4b3   : > { %v971_v36 = vpop.xlane.xlu1 %970 }
 0x4b4   : > { %v978_v37 = vmul.f32 1.442695, %v972_v30  ;;  %v980_v38 = vmul.f32 1.442695, %v973_v31  ;;  %v982_v39 = vmul.f32 1.442695, %v974_v33  ;;  %v975_v40 = vsub.f32 %v4293_v50, %v971_v36 }
 0x4b5   : > { %v976_v41 = vsub.f32 %v4304_v58, %v971_v36  ;;  %v977_v42 = vsub.f32 %v4295_v51, %v971_v36  ;;  %v4423_v43 = vpop.permute.xlu0 %1375  ;;  %v1537_v30 = vunpack.c.0.s8 %v1536_v24 }
 0x4b6   : > { %3856 = vpow2.f32 %v978_v37  ;;  %v984_v48 = vmul.f32 1.442695, %v975_v40  ;;  %v1748_v37 = vrot.slane %v4291_v46, %v4499_v26 }
 0x4b7   : > { %3858 = vpow2.f32 %v980_v38  ;;  %v986_v44 = vmul.f32 1.442695, %v976_v41  ;;  %v988_v32 = vmul.f32 1.442695, %v977_v42  ;;  %v4425_v47 = vpop.permute.xlu1 %1377  ;;  %v1755_v42 = vrot.slane %v1741_v29, %v4499_v26 }
 0x4b8   : > { %3860 = vpow2.f32 %v982_v39  ;;  %v4521_v18 = vsub.s32 %v1537_v30, %v4281_v35 }
 0x4b9   : > { %v4427_v49 = vpop.permute.xlu0 %1381  ;;  %3862 = vpow2.f32 %v986_v44 }
 0x4ba   : > { %3864 = vpow2.f32 %v988_v32  ;;  %v1469_v40 = vcombine.low %v4289_v45, %v4427_v49 }
 0x4bb   : > { %v4429_v52 = vpop.permute.xlu1 %1383  ;;  %3866 = vpow2.f32 %v984_v48 }
 0x4bc   : > { %v1477_v29 = vrot.slane %v1469_v40, %v4499_v26  ;;  %v2086_v40 = vrot.slane %v4295_v51, %v4499_v26 }
 0x4bd   : > { %v4431_v53 = vpop.permute.xlu0 %1387 }
 0x4be   : > { %v1485_v31 = vcombine.low %v4423_v43, %v4431_v53 }
 0x4bf   : > { %v4433_v54 = vpop.permute.xlu1 %1389 }
 0x4c0   : > { %v4435_v56 = vpop.eup %3856  ;;  %v1493_v46 = vrot.slane %v1485_v31, %v4499_v26 }
 0x4c1   : > { %6134 = vst [vmem:[#allocation10_spill] sm:$0xff] %v4435_v56  ;;  %v4437_v57 = vpop.eup %3858  ;;  %v4439_v59 = vpop.permute.xlu0 %1393 }
 0x4c2   : > { %6135 = vst [vmem:[#allocation11_spill] sm:$0xff] %v4437_v57  ;;  %v4441_v60 = vpop.eup %3860  ;;  %1096 = vmatprep.mubr.f32.mxu0 %v4437_v57 }
 0x4c3   : > { %6136 = vst [vmem:[#allocation12_spill] sm:$0xff] %v4441_v60  ;;  %3706 = vmatprep.mubr.msk.f32.mxu1 %vm730_vm5, %v4441_v60  ;;  %1097 = vmatmul.mubr.f32.vlgmr.msra.gmra.mrb[8].mxu0 %v4435_v56  ;;  %v4447_v61 = vpop.permute.xlu1 %1395  ;;  %v4449_v62 = vpop.eup %3862 }
 0x4c4   : > { %6137 = vst [vmem:[#allocation13_spill] sm:$0xff] %v4449_v62  ;;  %v4451_v63 = vpop.eup %3864  ;;  %1101 = vmatprep.mubr.f32.mxu0 %v4449_v62 }
 0x4c5   : > { %6138 = vst [vmem:[#allocation14_spill] sm:$0xff] %v4451_v63  ;;  %v4454_v0 = vpop.permute.xlu0 %1399  ;;  %v4456_v2 = vpop.eup %3866  ;;  %3707 = vmatmul.mubr.msk.f32.vlgmr.msra.gmra.mrb[12].mxu1 %vm730_vm5, %v4451_v63 }
 0x4c6   : > { %6139 = vst [vmem:[#allocation15_spill] sm:$0xff] %v4456_v2  ;;  %1273 = vmatprep.mubr.f32.mxu1 %v6038_v1 }
 0x4c7   : > { %1102 = vmatmul.mubr.f32.gmra.mrb[10].mxu0 %v4456_v2  ;;  %v4461_v3 = vpop.permute.xlu1 %1401 }
 0x4c9   : > { %v4464_v4 = vpop.permute.xlu0 %1405 }
 0x4ca   : > { %v1501_v33 = vcombine.low %v4439_v59, %v4464_v4 }
 0x4cb   : > { %v4466_v5 = vpop.permute.xlu1 %1407 }
 0x4cc   : > { %v1509_v21 = vrot.slane %v1501_v33, %v4499_v26 }
 0x4cd   : > { %v4468_v6 = vpop.permute.xlu0 %1411 }
 0x4ce   : > { %v1517_v27 = vcombine.low %v4454_v0, %v4468_v6 }
 0x4cf   : > { %v4470_v7 = vpop.permute.xlu1 %1413 }
 0x4d0   : > { %v1525_v41 = vrot.slane %v1517_v27, %v4499_v26  ;;  %v1856_v56 = vcombine.high %v4461_v3, %v4470_v7 }
 0x4d1   : > { %v4472_v8 = vpop.permute.xlu0 %1419 }
 0x4d2   : > { %v1566_v2 = vcombine.high %v1509_v21, %v1525_v41 }
 0x4d3   : > { %v4474_v9 = vpop.permute.xlu1 %1421 }
 0x4d5   : > { %v4476_v10 = vpop.permute.xlu0 %1425 }
 0x4d7   : > { %v4478_v11 = vpop.permute.xlu1 %1427 }
 0x4d9   : > { %v4480_v12 = vpop.permute.xlu0 %1431 }
 0x4db   : > { %v4482_v13 = vpop.permute.xlu1 %1433 }
 0x4dd   : > { %v4484_v14 = vpop.permute.xlu0 %1437 }
 0x4df   : > { %v4486_v15 = vpop.permute.xlu1 %1439 }
 0x4e1   : > { %v4488_v16 = vpop.permute.xlu0 %1443 }
 0x4e3   : > { %v4490_v19 = vpop.permute.xlu1 %1445 }
 0x4e5   : > { %v4492_v20 = vpop.permute.xlu0 %1449 }
 0x4e7   : > { %v4494_v22 = vpop.permute.xlu1 %1451 }
 0x4e9   : > { %v4496_v25 = vpop.permute.xlu0 %1455 }
 0x4eb   : > { %v4503_v28 = vpop.permute.xlu1 %1457 }
 0x4ed   : > { %v1464_v36 = vpop.permute.xlu0 %1463 }
 0x4ee   : > { %v1756_v38 = vcombine.high %v1464_v36, %v6038_v1  ;;  %v1763_v39 = vrot.slane %v1464_v36, %v4499_v26 }
 0x4ef   : > { %v1466_v17 = vpop.permute.xlu1 %1465 }
 0x4f0   : > { %v1770_v44 = vrot.slane %v1756_v38, %v4499_v26  ;;  %v1771_v32 = vcombine.low %v1748_v37, %v1763_v39  ;;  %v1772_v48 = vcombine.high %v1748_v37, %v1763_v39  ;;  %v2101_v36 = vrot.slane %v1466_v17, %v4499_v26 }
 0x4f1   : > { %v1565_v38 = vcombine.low %v1509_v21, %v1525_v41 }
 0x4f2   : > { %v4526_v23 = vrot.slane %v1771_v32, %v4521_v18  ;;  %v4529_v24 = vrot.slane %v1772_v48, %v4521_v18  ;;  %v1787_v27 = vcombine.low %v1755_v42, %v1770_v44  ;;  %v1788_v37 = vcombine.high %v1755_v42, %v1770_v44 }
 0x4f3   : > { %v1533_v42 = vcombine.low %v1477_v29, %v1493_v46  ;;  %v1518_v44 = vcombine.high %v4454_v0, %v4468_v6  ;;  %v2109_v32 = vcombine.low %v2086_v40, %v2101_v36  ;;  %v1573_v48 = vrot.slane %v1565_v38, %v4521_v18 }
 0x4f4   : > { %v2153_v30 = vsel %vm2152_vm6, %v4526_v23, -inf  ;;  %v2171_v31 = vsel %vm2152_vm6, %v4529_v24, -inf  ;;  %v4539_v33 = vcombine.high %v4526_v23, %v6038_v1  ;;  %v4542_v39 = vrot.slane %v1787_v27, %v4521_v18 }
 0x4f5   : > { %2154 = vmax.xlane.f32.xlu0 %v2153_v30  ;;  %2172 = vmax.xlane.f32.xlu1 %v2171_v31  ;;  %v6140_v27 = vmov 0.0   ;;  %v4558_v30 = vrot.slane %v1788_v37, %v4521_v18  ;;  %v1486_v31 = vcombine.high %v4423_v43, %v4431_v53  ;;  %v1502_v0 = vcombine.high %v4439_v59, %v4464_v4 }
 0x4f6   : > { %v2162_v35 = vsel %vm2152_vm6, %v4539_v33, -inf  ;;  %v2189_v1 = vsel %vm2152_vm6, %v4542_v39, -inf  ;;  %v4555_v60 = vcombine.high %v4529_v24, %v6140_v27  ;;  %v1541_v6 = vrot.slane %v1533_v42, %v4521_v18 }
 0x4f7   : > { %v1470_v38 = vcombine.high %v4289_v45, %v4427_v49  ;;  %v1532_v63 = vrot.slane %v1518_v44, %v4499_v26  ;;  %v2110_v37 = vcombine.high %v2086_v40, %v2101_v36  ;;  %v2207_v43 = vsel %vm2152_vm6, %v4558_v30, -inf }
 0x4f8   : > { %v4568_v62 = vcombine.low %v1541_v6, %v1573_v48  ;;  %v2180_v57 = vsel %vm2152_vm6, %v4555_v60, -inf  ;;  %v1516_v53 = vrot.slane %v1502_v0, %v4499_v26  ;;  %v1534_v45 = vcombine.high %v1477_v29, %v1493_v46 }
 0x4f9   : > { %2163 = vmax.xlane.f32.xlu0 %v2162_v35  ;;  %2190 = vmax.xlane.f32.xlu1 %v2189_v1  ;;  %v4575_v35 = vrot.slane %v2109_v32, %v4521_v18  ;;  %v1500_v1 = vrot.slane %v1486_v31, %v4499_v26  ;;  %v1484_v49 = vrot.slane %v1470_v38, %v4499_v26 }
 0x4fa   : > { %v1580_v59 = vrot.slane %v1566_v2, %v4521_v18  ;;  %v1581_v4 = vcombine.low %v1516_v53, %v1532_v63  ;;  %v2146_v41 = vsel %vm2145_vm7, %v4568_v62, -inf  ;;  %v4585_v36 = vcombine.high %v1541_v6, %v1573_v48 }
 0x4fb   : > { %v2225_v21 = vsel %vm2152_vm6, %v4575_v35, -inf  ;;  %v4588_v40 = vrot.slane %v2110_v37, %v4521_v18  ;;  %v1549_v46 = vcombine.low %v1484_v49, %v1500_v1  ;;  %v1582_v42 = vcombine.high %v1516_v53, %v1532_v63 }
 0x4fc   : > { %v1589_v2 = vrot.slane %v1581_v4, %v4521_v18  ;;  %v2094_v44 = vcombine.high %v1466_v17, %v6140_v27  ;;  %v2156_v32 = vsel %vm2145_vm7, %v4585_v36, -inf  ;;  %v1550_v6 = vcombine.high %v1484_v49, %v1500_v1 }
 0x4fd   : > { %2181 = vmax.xlane.f32.xlu0 %v2180_v57  ;;  %2208 = vmax.xlane.f32.xlu1 %v2207_v43  ;;  %v1548_v57 = vrot.slane %v1534_v45, %v4521_v18  ;;  %v2243_v48 = vsel %vm2152_vm6, %v4588_v40, -inf  ;;  %v1557_v0 = vrot.slane %v1549_v46, %v4521_v18  ;;  %v2079_v38 = vcombine.high %v4295_v51, %v6140_v27 }
 0x4fe   : > { %v1596_v17 = vrot.slane %v1582_v42, %v4521_v18  ;;  %v1653_v43 = vcombine.low %v4488_v16, %v4496_v25  ;;  %v2108_v53 = vrot.slane %v2094_v44, %v4499_v26  ;;  %v1564_v51 = vrot.slane %v1550_v6, %v4521_v18 }
 0x4ff   : > { %v4591_v29 = vcombine.high %v1548_v57, %v1580_v59  ;;  %v4599_v31 = vcombine.low %v1548_v57, %v1580_v59  ;;  %v4604_v37 = vcombine.high %v1557_v0, %v1589_v2  ;;  %v4606_v63 = vcombine.low %v1557_v0, %v1589_v2 }
 0x500   : > { %v1621_v49 = vcombine.low %v4472_v8, %v4480_v12  ;;  %v1637_v59 = vcombine.low %v4484_v14, %v4492_v20  ;;  %v2093_v4 = vrot.slane %v2079_v38, %v4499_v26  ;;  %v4626_v57 = vcombine.low %v1564_v51, %v1596_v17 }
 0x501   : > { %2147 = vmax.xlane.f32.xlu0 %v2146_v41  ;;  %2226 = vmax.xlane.f32.xlu1 %v2225_v21  ;;  %v2174_v45 = vsel %vm2145_vm7, %v4591_v29, -inf  ;;  %v2165_v1 = vsel %vm2145_vm7, %v4599_v31, -inf  ;;  %v1605_v41 = vcombine.low %v4299_v55, %v4476_v10  ;;  %v2192_v21 = vsel %vm2145_vm7, %v4604_v37, -inf }
 0x502   : > { %v1661_v46 = vrot.slane %v1653_v43, %v4499_v26  ;;  %v2183_v2 = vsel %vm2145_vm7, %v4606_v63, -inf  ;;  %v4633_v42 = vcombine.high %v4542_v39, %v6140_v27  ;;  %v2125_v44 = vcombine.low %v2093_v4, %v2108_v53 }
 0x503   : > { %v1613_v0 = vrot.slane %v1605_v41, %v4499_v26  ;;  %v2201_v6 = vsel %vm2145_vm7, %v4626_v57, -inf  ;;  %v4640_v38 = vcombine.high %v1564_v51, %v1596_v17  ;;  %v4655_v51 = vcombine.high %v4558_v30, %v6140_v27 }
 0x504   : > { %v2198_v43 = vsel %vm2152_vm6, %v4633_v42, -inf }
 0x505   : > { %2157 = vmax.xlane.f32.xlu0 %v2156_v32  ;;  %2244 = vmax.xlane.f32.xlu1 %v2243_v48  ;;  %v1629_v32 = vrot.slane %v1621_v49, %v4499_v26  ;;  %v1645_v48 = vrot.slane %v1637_v59, %v4499_v26  ;;  %v1654_v59 = vcombine.high %v4488_v16, %v4496_v25  ;;  %v2210_v41 = vsel %vm2145_vm7, %v4640_v38, -inf }
 0x506   : > { %v1638_v16 = vcombine.high %v4484_v14, %v4492_v20 }
 0x507   : > { %v1669_v49 = vcombine.low %v1613_v0, %v1629_v32 }
 0x508   : > { %v1652_v20 = vrot.slane %v1638_v16, %v4499_v26  ;;  %v1839_v16 = vcombine.low %v4447_v61, %v4466_v5 }
 0x509   : > { %2175 = vmax.xlane.f32.xlu0 %v2174_v45  ;;  %2166 = vmax.xlane.f32.xlu1 %v2165_v1  ;;  %v4645_v45 = vrot.slane %v2125_v44, %v4521_v18  ;;  %v2126_v1 = vcombine.high %v2093_v4, %v2108_v53  ;;  %v1622_v4 = vcombine.high %v4472_v8, %v4480_v12 }
 0x50a   : > { %v1677_v25 = vrot.slane %v1669_v49, %v4521_v18  ;;  %v1606_v44 = vcombine.high %v4299_v55, %v4476_v10  ;;  %v4675_v8 = vcombine.high %v4575_v35, %v6140_v27  ;;  %v1670_v55 = vcombine.high %v1613_v0, %v1629_v32 }
 0x50b   : > { %v2261_v17 = vsel %vm2152_vm6, %v4645_v45, -inf  ;;  %v1636_v14 = vrot.slane %v1622_v4, %v4499_v26  ;;  %v1807_v10 = vcombine.low %v4293_v50, %v4429_v52  ;;  %v4695_v0 = vcombine.high %v4588_v40, %v6140_v27 }
 0x50c   : > { %v1620_v49 = vrot.slane %v1606_v44, %v4499_v26  ;;  %v1684_v44 = vrot.slane %v1670_v55, %v4521_v18 }
 0x50d   : > { %2193 = vmax.xlane.f32.xlu0 %v2192_v21  ;;  %2184 = vmax.xlane.f32.xlu1 %v2183_v2  ;;  %v1701_v21 = vcombine.low %v1645_v48, %v1661_v46  ;;  %v4658_v2 = vrot.slane %v2126_v1, %v4521_v18  ;;  %v2216_v1 = vsel %vm2152_vm6, %v4655_v51, -inf  ;;  %v2252_v55 = vsel %vm2152_vm6, %v4695_v0, -inf }
 0x50f   : > { %v1709_v53 = vrot.slane %v1701_v21, %v4521_v18  ;;  %v2279_v21 = vsel %vm2152_vm6, %v4658_v2, -inf }
 0x511   : > { %2199 = vmax.xlane.f32.xlu0 %v2198_v43  ;;  %2202 = vmax.xlane.f32.xlu1 %v2201_v6  ;;  %v1668_v6 = vrot.slane %v1654_v59, %v4499_v26  ;;  %v1702_v43 = vcombine.high %v1645_v48, %v1661_v46  ;;  %v4677_v12 = vcombine.low %v1677_v25, %v1709_v53 }
 0x512   : > { %v1823_v46 = vcombine.low %v4425_v47, %v4433_v54  ;;  %v1855_v48 = vcombine.low %v4461_v3, %v4470_v7  ;;  %v4697_v4 = vcombine.high %v1677_v25, %v1709_v53  ;;  %v1840_v3 = vcombine.high %v4447_v61, %v4466_v5 }
 0x513   : > { %6141 = vst [vmem:[#allocation16_spill] sm:$0xff] %v4677_v12  ;;  %v1716_v59 = vrot.slane %v1702_v43, %v4521_v18  ;;  %v2149_v32 = vsel %vm2145_vm7, %v4677_v12, -inf  ;;  %v1685_v43 = vcombine.low %v1620_v49, %v1636_v14  ;;  %v1815_v12 = vrot.slane %v1807_v10, %v4499_v26 }
 0x514   : > { %6142 = vst [vmem:[#allocation17_spill] sm:$0xff] %v4697_v4  ;;  %v1863_v53 = vrot.slane %v1855_v48, %v4499_v26  ;;  %v1847_v7 = vrot.slane %v1839_v16, %v4499_v26  ;;  %v4725_v48 = vrot.slane %v1856_v56, %v4499_v26 }
 0x515   : > { %2211 = vmax.xlane.f32.xlu0 %v2210_v41  ;;  %2262 = vmax.xlane.f32.xlu1 %v2261_v17  ;;  %v1717_v41 = vcombine.low %v1652_v20, %v1668_v6  ;;  %v2234_v17 = vsel %vm2152_vm6, %v4675_v8, -inf  ;;  %v4709_v25 = vcombine.low %v1684_v44, %v1716_v59  ;;  %v1693_v10 = vrot.slane %v1685_v43, %v4521_v18 }
 0x516   : > { %v1904_v61 = vcombine.high %v1847_v7, %v1863_v53  ;;  %v1903_v5 = vcombine.low %v1847_v7, %v1863_v53  ;;  %v1854_v43 = vrot.slane %v1840_v3, %v4499_v26  ;;  %v1191_v3 = vld [vmem:[%s6026_s11 + $0x38] sm:$0x3] }
 0x519   : > { %2217 = vmax.xlane.f32.xlu0 %v2216_v1  ;;  %2280 = vmax.xlane.f32.xlu1 %v2279_v21  ;;  %v1808_v1 = vcombine.high %v4293_v50, %v4429_v52  ;;  %v1831_v21 = vrot.slane %v1823_v46, %v4499_v26  ;;  %v4716_v50 = vcombine.high %v1684_v44, %v1716_v59  ;;  %v1185_v59 = vld [vmem:[%s6026_s11 + $0x8] sm:$0xff]  ;;  %v1187_v44 = vld [vmem:[%s6026_s11 + $0x18] sm:$0xff] }
 0x51a   : > { %v1718_v52 = vcombine.high %v1652_v20, %v1668_v6  ;;  %v1824_v46 = vcombine.high %v4425_v47, %v4433_v54  ;;  %v2168_v6 = vsel %vm2145_vm7, %v4709_v25, -inf  ;;  %v1188_v47 = vld [vmem:[%s6026_s11 + $0x20] sm:$0xff] }
 0x51b   : > { %v1184_v54 = vld [vmem:[%s6026_s11] sm:$0xff]  ;;  %v2177_v56 = vsel %vm2145_vm7, %v4716_v50, -inf  ;;  %v3758_v16 = vpack.c.bf16 %v1188_v47, %v1185_v59  ;;  %v1871_v53 = vcombine.low %v1815_v12, %v1831_v21  ;;  %v1919_v59 = vcombine.low %v1854_v43, %v4725_v48 }
 0x51c   : > { %v1838_v7 = vrot.slane %v1824_v46, %v4499_v26 }
 0x51d   : > { %2235 = vmax.xlane.f32.xlu0 %v2234_v17  ;;  %2150 = vmax.xlane.f32.xlu1 %v2149_v32  ;;  %v1725_v17 = vrot.slane %v1717_v41, %v4521_v18  ;;  %v2159_v32 = vsel %vm2145_vm7, %v4697_v4, -inf  ;;  %v1686_v41 = vcombine.high %v1620_v49, %v1636_v14  ;;  %v1872_v4 = vcombine.high %v1815_v12, %v1831_v21 }
 0x51e   : > { %v1732_v49 = vrot.slane %v1718_v52, %v4521_v18  ;;  %3759 = vmatprep.subr.bf16.mxu1 %v3758_v16  ;;  %v1918_v52 = vrot.slane %v1904_v61, %v4521_v18  ;;  %v1879_v61 = vrot.slane %v1871_v53, %v4521_v18 }
 0x51f   : > { %v4729_v20 = vcombine.low %v1693_v10, %v1725_v17  ;;  %v4742_v14 = vcombine.high %v1693_v10, %v1725_v17  ;;  %v1700_v17 = vrot.slane %v1686_v41, %v4521_v18  ;;  %v1911_v10 = vrot.slane %v1903_v5, %v4521_v18  ;;  %v1190_v41 = vld [vmem:[%s6026_s11 + $0x30] sm:$0x3] }
 0x521   : > { %2253 = vmax.xlane.f32.xlu0 %v2252_v55  ;;  %2160 = vmax.xlane.f32.xlu1 %v2159_v32  ;;  %v3760_v55 = vpack.c.bf16 %v1187_v44, %v1184_v54  ;;  %v1822_v32 = vrot.slane %v1808_v1, %v4499_v26  ;;  %v2186_v12 = vsel %vm2145_vm7, %v4729_v20, -inf  ;;  %v2195_v1 = vsel %vm2145_vm7, %v4742_v14, -inf }
 0x522   : > { %v4762_v21 = vcombine.low %v1700_v17, %v1732_v49  ;;  %v4764_v46 = vcombine.high %v1700_v17, %v1732_v49  ;;  %v4774_v54 = vcombine.low %v1879_v61, %v1911_v10  ;;  %v1189_v49 = vld [vmem:[%s6026_s11 + $0x28] sm:$0xff]  ;;  %v1927_v44 = vrot.slane %v1919_v59, %v4521_v18 }
 0x523   : > { %3761 = vmatpush1.bf16.msra.mxu1 %v3760_v55  ;;  %v1887_v5 = vcombine.low %v1822_v32, %v1838_v7  ;;  %v4792_v17 = vcombine.high %v1879_v61, %v1911_v10  ;;  %v1959_v10 = vcombine.low %v4474_v9, %v4482_v13 }
 0x524   : > { %3577 = vmatprep.subr.msk.mxu1 %vm1199_vm8, %v1191_v3  ;;  %v2213_v16 = vsel %vm2145_vm7, %v4764_v46, -inf  ;;  %v1920_v3 = vcombine.high %v1854_v43, %v4725_v48  ;;  %v2219_v59 = vsel %vm2145_vm7, %v4774_v54, -inf  ;;  %v1975_v48 = vcombine.low %v4486_v15, %v4494_v22 }
 0x525   : > { %2169 = vmax.xlane.f32.xlu0 %v2168_v6  ;;  %2178 = vmax.xlane.f32.xlu1 %v2177_v56  ;;  %v1886_v6 = vrot.slane %v1872_v4, %v4521_v18  ;;  %v1186_v56 = vld [vmem:[%s6026_s11 + $0x10] sm:$0xff]  ;;  %v2204_v4 = vsel %vm2145_vm7, %v4762_v21, -inf  ;;  %v1895_v55 = vrot.slane %v1887_v5, %v4521_v18  ;;  %v1888_v5 = vcombine.high %v1822_v32, %v1838_v7 }
 0x526   : > { %v4788_v53 = vpack.c.bf16 %v1189_v49, %v1186_v56  ;;  %v1943_v43 = vcombine.low %v4304_v58, %v4478_v11  ;;  %v2228_v61 = vsel %vm2145_vm7, %v4792_v17, -inf  ;;  %v1934_v49 = vrot.slane %v1920_v3, %v4521_v18 }
 0x527   : > { %v4772_v47 = vcombine.high %v1886_v6, %v1918_v52  ;;  %3578 = vmatpush1.msk.msra.mxu1 %vm1199_vm8, %v1190_v41  ;;  %v4801_v41 = vcombine.high %v1895_v55, %v1927_v44  ;;  %v4811_v56 = vcombine.low %v1886_v6, %v1918_v52  ;;  %v1902_v52 = vrot.slane %v1888_v5, %v4521_v18 }
 0x528   : > { %3763 = vmatprep.subr.bf16.mxu1 %v4788_v53  ;;  %v1960_v6 = vcombine.high %v4474_v9, %v4482_v13  ;;  %v1983_v3 = vrot.slane %v1975_v48, %v4499_v26 }
 0x529   : > { %2187 = vmax.xlane.f32.xlu0 %v2186_v12  ;;  %2196 = vmax.xlane.f32.xlu1 %v2195_v1  ;;  %v1991_v12 = vcombine.low %v4490_v19, %v4503_v28  ;;  %v2246_v1 = vsel %vm2145_vm7, %v4772_v47, -inf  ;;  %v2264_v7 = vsel %vm2145_vm7, %v4801_v41, -inf }
 0x52b   : > { %v1999_v32 = vrot.slane %v1991_v12, %v4499_v26  ;;  %v1951_v12 = vrot.slane %v1943_v43, %v4499_v26 }
 0x52d   : > { %2205 = vmax.xlane.f32.xlu0 %v2204_v4  ;;  %2214 = vmax.xlane.f32.xlu1 %v2213_v16  ;;  %v1992_v4 = vcombine.high %v4490_v19, %v4503_v28  ;;  %v4821_v16 = vcombine.high %v4645_v45, %v6140_v27  ;;  %v1967_v19 = vrot.slane %v1959_v10, %v4499_v26 }
 0x52e   : > { %v1976_v28 = vcombine.high %v4486_v15, %v4494_v22  ;;  %v2040_v13 = vcombine.high %v1983_v3, %v1999_v32  ;;  %v2039_v10 = vcombine.low %v1983_v3, %v1999_v32  ;;  %v1974_v15 = vrot.slane %v1960_v6, %v4499_v26 }
 0x52f   : > { %6143 = vst [vmem:[#allocation18_spill] sm:$0xff] %v4821_v16  ;;  %v2006_v5 = vrot.slane %v1992_v4, %v4499_v26  ;;  %v2270_v9 = vsel %vm2152_vm6, %v4821_v16, -inf  ;;  %v2008_v48 = vcombine.high %v1951_v12, %v1967_v19  ;;  %v2007_v43 = vcombine.low %v1951_v12, %v1967_v19 }
 0x530   : > { %v1990_v22 = vrot.slane %v1976_v28, %v4499_v26  ;;  %v4851_v4 = vcombine.high %v4658_v2, %v6140_v27  ;;  %v2047_v6 = vrot.slane %v2039_v10, %v4521_v18 }
 0x531   : > { %2247 = vmax.xlane.f32.xlu0 %v2246_v1  ;;  %2220 = vmax.xlane.f32.xlu1 %v2219_v59  ;;  %v1944_v1 = vcombine.high %v4304_v58, %v4478_v11  ;;  %v2237_v59 = vsel %vm2145_vm7, %v4811_v56, -inf  ;;  %v4835_v58 = vcombine.low %v1895_v55, %v1927_v44  ;;  %v4837_v11 = vcombine.high %v1902_v52, %v1934_v49 }
 0x532   : > { %v2055_v28 = vcombine.low %v1990_v22, %v2006_v5  ;;  %v2288_v19 = vsel %vm2152_vm6, %v4851_v4, -inf }
 0x533   : > { %v1958_v44 = vrot.slane %v1944_v1, %v4499_v26  ;;  %v2255_v55 = vsel %vm2145_vm7, %v4835_v58, -inf  ;;  %v2282_v32 = vsel %vm2145_vm7, %v4837_v11, -inf  ;;  %v2022_v26 = vrot.slane %v2008_v48, %v4521_v18 }
 0x534   : > { %v2015_v1 = vrot.slane %v2007_v43, %v4521_v18 }
 0x535   : > { %2265 = vmax.xlane.f32.xlu0 %v2264_v7  ;;  %2229 = vmax.xlane.f32.xlu1 %v2228_v61  ;;  %v4847_v61 = vcombine.low %v1902_v52, %v1934_v49  ;;  %v2054_v7 = vrot.slane %v2040_v13, %v4521_v18  ;;  %v2023_v49 = vcombine.low %v1958_v44, %v1974_v15 }
 0x536   : > { %v4865_v12 = vcombine.low %v2015_v1, %v2047_v6  ;;  %v2024_v10 = vcombine.high %v1958_v44, %v1974_v15  ;;  %v4869_v48 = vcombine.high %v2015_v1, %v2047_v6 }
 0x537   : > { %v2273_v52 = vsel %vm2145_vm7, %v4847_v61, -inf  ;;  %v4863_v3 = vcombine.high %v2022_v26, %v2054_v7  ;;  %v2031_v13 = vrot.slane %v2023_v49, %v4521_v18  ;;  %v4885_v6 = vcombine.low %v2022_v26, %v2054_v7 }
 0x538   : > { %v2231_v15 = vsel %vm2145_vm7, %v4869_v48, -inf }
 0x539   : > { %2238 = vmax.xlane.f32.xlu1 %v2237_v59  ;;  %2271 = vmax.xlane.f32.xlu0 %v2270_v9  ;;  %v2063_v59 = vrot.slane %v2055_v28, %v4521_v18  ;;  %v2056_v9 = vcombine.high %v1990_v22, %v2006_v5  ;;  %v2249_v43 = vsel %vm2145_vm7, %v4863_v3, -inf  ;;  %v2038_v5 = vrot.slane %v2024_v10, %v4521_v18 }
 0x53a   : > { %v2240_v1 = vsel %vm2145_vm7, %v4885_v6, -inf }
 0x53b   : > { %v2070_v16 = vrot.slane %v2056_v9, %v4521_v18  ;;  %v4891_v49 = vcombine.low %v2031_v13, %v2063_v59 }
 0x53d   : > { %2256 = vmax.xlane.f32.xlu1 %v2255_v55  ;;  %2283 = vmax.xlane.f32.xlu0 %v2282_v32  ;;  %v2222_v55 = vsel %vm2145_vm7, %v4865_v12, -inf  ;;  %v4875_v32 = vcombine.high %v2031_v13, %v2063_v59  ;;  %v4883_v44 = vcombine.high %v2038_v5, %v2070_v16  ;;  %v2258_v18 = vsel %vm2145_vm7, %v4891_v49, -inf }
 0x53f   : > { %v2267_v22 = vsel %vm2145_vm7, %v4875_v32, -inf  ;;  %v2285_v28 = vsel %vm2145_vm7, %v4883_v44, -inf }
 0x541   : > { %2274 = vmax.xlane.f32.xlu1 %v2273_v52  ;;  %2289 = vmax.xlane.f32.xlu0 %v2288_v19  ;;  %v4895_v52 = vcombine.low %v2038_v5, %v2070_v16 }
 0x543   : > { %v2276_v7 = vsel %vm2145_vm7, %v4895_v52, -inf }
 0x545   : > { %2250 = vmax.xlane.f32.xlu1 %v2249_v43  ;;  %2223 = vmax.xlane.f32.xlu0 %v2222_v55 }
 0x549   : > { %2268 = vmax.xlane.f32.xlu1 %v2267_v22  ;;  %2232 = vmax.xlane.f32.xlu0 %v2231_v15 }
 0x54d   : > { %2286 = vmax.xlane.f32.xlu1 %v2285_v28  ;;  %2241 = vmax.xlane.f32.xlu0 %v2240_v1 }
 0x551   : > { %2259 = vmax.xlane.f32.xlu0 %v2258_v18 }
 0x555   : > { %2277 = vmax.xlane.f32.xlu0 %v2276_v7 }
 0x582   : > { %v2155_v26 = vpop.xlane.xlu0 %2154  ;;  %v2173_v19 = vpop.xlane.xlu1 %2172 }
 0x583   : > { %vm2293_vm9 = vcmp.eq.f32.partialorder %v4526_v23, %v2155_v26  ;;  %vm2299_vm10 = vcmp.eq.f32.partialorder %v4529_v24, %v2173_v19 }
 0x584   : > { %v2341_v59 = vsel %vm2293_vm9, %v4172_v34, 16  ;;  %v2347_v9 = vsel %vm2299_vm10, %v4172_v34, 16 }
 0x585   : > { %v4904_v13 = vsel %vm2152_vm6, %v2341_v59, 2147483647  ;;  %v4907_v16 = vsel %vm2152_vm6, %v2347_v9, 2147483647 }
 0x586   : > { %v2164_v10 = vpop.xlane.xlu0 %2163  ;;  %v2191_v43 = vpop.xlane.xlu1 %2190  ;;  %v2419_v55 = vshra.s32 %v4904_v13, 16  ;;  %v2509_v24 = vshra.s32 %v4907_v16, 16 }
 0x587   : > { %vm2296_vm11 = vcmp.eq.f32.partialorder %v4539_v33, %v2164_v10  ;;  %vm2305_vm13 = vcmp.eq.f32.partialorder %v4542_v39, %v2191_v43 }
 0x588   : > { %v2344_v23 = vsel %vm2296_vm11, %v4172_v34, 16  ;;  %v4912_v5 = vcvt.s32.f32 %v2419_v55  ;;  %v4920_v1 = vcvt.s32.f32 %v2509_v24  ;;  %v2353_v19 = vsel %vm2305_vm13, %v4172_v34, 16 }
 0x589   : > { %v4916_v22 = vsel %vm2152_vm6, %v2344_v23, 2147483647  ;;  %v4946_v23 = vsel %vm2152_vm6, %v2353_v19, 2147483647 }
 0x58a   : > { %v2182_v15 = vpop.xlane.xlu0 %2181  ;;  %2422 = vmin.xlane.f32.xlu1 %v4912_v5  ;;  %v2209_v28 = vpop.xlane.xlu1 %2208  ;;  %v2464_v18 = vshra.s32 %v4916_v22, 16  ;;  %6146 = vst [vmem:[#allocation21_spill] sm:$0xff] %v4946_v23 }
 0x58b   : > { %vm2302_vm12 = vcmp.eq.f32.partialorder %v4555_v60, %v2182_v15  ;;  %vm2311_vm0 = vcmp.eq.f32.partialorder %v4558_v30, %v2209_v28 }
 0x58c   : > { %v2350_v33 = vsel %vm2302_vm12, %v4172_v34, 16  ;;  %v4930_v59 = vcvt.s32.f32 %v2464_v18  ;;  %v2359_v30 = vsel %vm2311_vm0, %v4172_v34, 16 }
 0x58d   : > { %v4933_v9 = vsel %vm2152_vm6, %v2350_v33, 2147483647 }
 0x58e   : > { %v2148_v7 = vpop.xlane.xlu0 %2147  ;;  %2512 = vmin.xlane.f32.xlu1 %v4920_v1  ;;  %v2227_v26 = vpop.xlane.xlu1 %2226  ;;  %6144 = vst [vmem:[#allocation19_spill] sm:$0xff] %v4930_v59  ;;  %6145 = vst [vmem:[#allocation20_spill] sm:$0xff] %v4933_v9  ;;  %v2554_v55 = vshra.s32 %v4933_v9, 16 }
 0x58f   : > { %vm2291_vm14 = vcmp.eq.f32.partialorder %v4568_v62, %v2148_v7  ;;  %vm2317_vm15 = vcmp.eq.f32.partialorder %v4575_v35, %v2227_v26  ;;  %v2599_v26 = vshra.s32 %v4946_v23, 16 }
 0x590   : > { %v2365_v60 = vsel %vm2317_vm15, %v4172_v34, 16  ;;  %v2339_v39 = vsel %vm2291_vm14, %v4172_v34, 16 }
 0x591   : > { %v4938_v10 = vsel %vm2152_vm6, %v2365_v60, 2147483647  ;;  %v4953_v28 = vsel %vm2145_vm7, %v2339_v39, 2147483647 }
 0x592   : > { %v2158_v43 = vpop.xlane.xlu0 %2157  ;;  %2467 = vmin.xlane.f32.xlu1 %v4930_v59  ;;  %v2245_v62 = vpop.xlane.xlu1 %2244  ;;  %v2779_v35 = vshra.s32 %v4938_v10, 16  ;;  %6148 = vst [vmem:[#allocation23_spill] sm:$0xff] %v4953_v28  ;;  %v2389_v39 = vshra.s32 %v4953_v28, 16  ;;  %v4981_v28 = vcvt.s32.f32 %v2599_v26 }
 0x593   : > { %vm2294_vm1 = vcmp.eq.f32.partialorder %v4585_v36, %v2158_v43  ;;  %vm2323_vm3 = vcmp.eq.f32.partialorder %v4588_v40, %v2245_v62  ;;  %v4963_v43 = vcvt.s32.f32 %v2554_v55  ;;  %v4967_v62 = vsel %vm2152_vm6, %v2359_v30, 2147483647 }
 0x594   : > { %v2371_v24 = vsel %vm2323_vm3, %v4172_v34, 16  ;;  %v4950_v15 = vcvt.s32.f32 %v2779_v35  ;;  %v2342_v18 = vsel %vm2294_vm1, %v4172_v34, 16  ;;  %v4983_v9 = vcvt.s32.f32 %v2389_v39 }
 0x595   : > { %v4957_v36 = vsel %vm2152_vm6, %v2371_v24, 2147483647  ;;  %6150 = vst [vmem:[#allocation25_spill] sm:$0xff] %v4963_v43 }
 0x596   : > { %6147 = vst [vmem:[#allocation22_spill] sm:$0xff] %v4950_v15  ;;  %6149 = vst [vmem:[#allocation24_spill] sm:$0xff] %v4957_v36  ;;  %v3641_v40 = vpop.f32.mrb[8].mxu0  ;;  %v2176_v33 = vpop.xlane.xlu0 %2175  ;;  %2782 = vmin.xlane.f32.xlu0 %v4950_v15  ;;  %v2869_v7 = vshra.s32 %v4957_v36, 16  ;;  %v4973_v15 = vsel %vm2145_vm7, %v2342_v18, 2147483647 }
 0x597   : > { %v3642_v19 = vpop.f32.mrb[9].mxu0  ;;  %vm2300_vm4 = vcmp.eq.f32.partialorder %v4591_v29, %v2176_v33  ;;  %v2167_v60 = vpop.xlane.xlu1 %2166  ;;  %6151 = vst [vmem:[#allocation26_spill] sm:$0xff] %v4973_v15 }
 0x598   : > { %v3643_v35 = vadd.f32 %v3642_v19, %v3641_v40  ;;  %vm2297_vm9 = vcmp.eq.f32.partialorder %v4599_v31, %v2167_v60  ;;  %v4970_v24 = vcvt.s32.f32 %v2869_v7  ;;  %v3708_v23 = vpop.f32.mrb[12].mxu1  ;;  %v2348_v36 = vsel %vm2300_vm4, %v4172_v34, 16 }
 0x599   : > { %v2345_v29 = vsel %vm2297_vm9, %v4172_v34, 16  ;;  %v1173_v55 = vpop.f32.mrb[13].mxu1  ;;  %v2689_v31 = vshra.s32 %v4967_v62, 16  ;;  %v2434_v7 = vshra.s32 %v4973_v15, 16  ;;  %v4986_v59 = vsel %vm2145_vm7, %v2348_v36, 2147483647 }
 0x59a   : > { %v3644_v33 = vpop.f32.mrb[10].mxu0  ;;  %2557 = vmin.xlane.f32.xlu0 %v4963_v43  ;;  %2872 = vmin.xlane.f32.xlu1 %v4970_v24  ;;  %v1174_v30 = vadd.f32 %v3643_v35, %v1173_v55  ;;  %v2194_v40 = vpop.xlane.xlu0 %2193  ;;  %v4989_v43 = vsel %vm2145_vm7, %v2345_v29, 2147483647  ;;  %v2524_v36 = vshra.s32 %v4986_v59, 16 }
 0x59b   : > { %v3645_v19 = vpop.f32.mrb[11].mxu0  ;;  %v2185_v60 = vpop.xlane.xlu1 %2184  ;;  %v4993_v15 = vcvt.s32.f32 %v2689_v31  ;;  %v2479_v39 = vshra.s32 %v4989_v43, 16  ;;  %vm2306_vm13 = vcmp.eq.f32.partialorder %v4604_v37, %v2194_v40 }
 0x59c   : > { %v3646_v18 = vadd.f32 %v3645_v19, %v3644_v33  ;;  %3868 = vrcp.f32 %v1174_v30  ;;  %v4995_v33 = vcvt.s32.f32 %v2434_v7  ;;  %v5010_v31 = vcvt.s32.f32 %v2524_v36 }
 0x59d   : > { %vm2303_vm11 = vcmp.eq.f32.partialorder %v4606_v63, %v2185_v60  ;;  %v2354_v37 = vsel %vm2306_vm13, %v4172_v34, 16 }
 0x59e   : > { %v1179_v35 = vadd.f32 %v3708_v23, %v3646_v18  ;;  %2602 = vmin.xlane.f32.xlu0 %v4981_v28  ;;  %2392 = vmin.xlane.f32.xlu1 %v4983_v9  ;;  %v2200_v55 = vpop.xlane.xlu0 %2199  ;;  %6153 = vst [vmem:[#allocation28_spill] sm:$0xff] %v5010_v31  ;;  %v2351_v63 = vsel %vm2303_vm11, %v4172_v34, 16 }
 0x59f   : > { %vm2308_vm10 = vcmp.eq.f32.partialorder %v4633_v42, %v2200_v55  ;;  %v2203_v26 = vpop.xlane.xlu1 %2202  ;;  %v5012_v42 = vcvt.s32.f32 %v2479_v39  ;;  %v1192_v55 = vld [vmem:[%s6026_s11 + $0x40] sm:$0x3]  ;;  %v5049_v40 = vsel %vm2145_vm7, %v2351_v63, 2147483647 }
 0x5a0   : > { %3870 = vrcp.f32 %v1179_v35  ;;  %v2356_v29 = vsel %vm2308_vm10, %v4172_v34, 16  ;;  %v2569_v63 = vshra.s32 %v5049_v40, 16 }
 0x5a1   : > { %v5004_v23 = vsel %vm2152_vm6, %v2356_v29, 2147483647 }
 0x5a2   : > { %2692 = vmin.xlane.f32.xlu0 %v4993_v15  ;;  %2437 = vmin.xlane.f32.xlu1 %v4995_v33  ;;  %6152 = vst [vmem:[#allocation27_spill] sm:$0xff] %v5004_v23  ;;  %v5006_v30 = vpop.xlane.xlu0 %2211  ;;  %v2644_v7 = vshra.s32 %v5004_v23, 16 }
 0x5a3   : > { %v5008_v19 = vpop.xlane.xlu1 %2262  ;;  %vm2312_vm3 = vcmp.eq.f32.partialorder %v4640_v38, %v5006_v30 }
 0x5a4   : > { %v5025_v39 = vcvt.s32.f32 %v2644_v7  ;;  %vm2329_vm0 = vcmp.eq.f32.partialorder %v4645_v45, %v5008_v19  ;;  %v2360_v38 = vsel %vm2312_vm3, %v4172_v34, 16 }
 0x5a6   : > { %2527 = vmin.xlane.f32.xlu0 %v5010_v31  ;;  %2482 = vmin.xlane.f32.xlu1 %v5012_v42  ;;  %v3869_v18 = vpop.eup %3868  ;;  %v2218_v35 = vpop.xlane.xlu0 %2217 }
 0x5a7   : > { %vm2314_vm12 = vcmp.eq.f32.partialorder %v4655_v51, %v2218_v35  ;;  %v5022_v36 = vpop.xlane.xlu1 %2280  ;;  %3579 = vmatmul.mubr.msk.f32.vlgmr.msra.gmra.mrb[14].mxu1 %vm539_vm2, %v3869_v18 }
 0x5a8   : > { %v2362_v29 = vsel %vm2314_vm12, %v4172_v34, 16  ;;  %1279 = vmatprep.mubr.f32.mxu1 %v6140_v27  ;;  %3765 = vmatpush3.bf16.msra.mxu1 %v4788_v53  ;;  %vm2335_vm11 = vcmp.eq.f32.partialorder %v4658_v2, %v5022_v36  ;;  %v6166_v2 = vld [vmem:[#allocation16_spill] sm:$0xff] }
 0x5a9   : > { %v5031_v31 = vsel %vm2152_vm6, %v2362_v29, 2147483647  ;;  %3713 = vmatprep.subr.msk.mxu1 %vm1199_vm8, %v1192_v55 }
 0x5aa   : > { %v3871_v23 = vpop.eup %3870  ;;  %2647 = vmin.xlane.f32.xlu0 %v5025_v39  ;;  %v2236_v51 = vpop.xlane.xlu0 %2235  ;;  %v2734_v60 = vshra.s32 %v5031_v31, 16 }
 0x5ab   : > { %vm2320_vm14 = vcmp.eq.f32.partialorder %v4675_v8, %v2236_v51  ;;  %v5039_v27 = vpop.xlane.xlu1 %2150  ;;  %3580 = vmatmul.mubr.msk.f32.gmra.mrb[16].mxu1 %vm539_vm2, %v3871_v23 }
 0x5ac   : > { %v2368_v53 = vsel %vm2320_vm14, %v4172_v34, 16  ;;  %3715 = vmatprep.mubr.msk.f32.mxu1 %vm539_vm2, %v3869_v18  ;;  %3714 = vmatpush3.msk.msra.mxu1 %vm1199_vm8, %v1192_v55  ;;  %v5045_v7 = vcvt.s32.f32 %v2734_v60  ;;  %v5061_v55 = vsel %vm2145_vm7, %v2354_v37, 2147483647  ;;  %vm2309_vm8 = vcmp.eq.f32.partialorder %v4626_v57, %v2203_v26 }
 0x5ad   : > { %v5052_v35 = vsel %vm2152_vm6, %v2368_v53, 2147483647  ;;  %6155 = vst [vmem:[#allocation30_spill] sm:$0xff] %v5061_v55  ;;  %v5077_v37 = vcvt.s32.f32 %v2569_v63  ;;  %vm2292_vm12 = vcmp.eq.f32.partialorder %v6166_v2, %v5039_v27  ;;  %v6168_v27 = vld [vmem:[#allocation17_spill] sm:$0xff] }
 0x5ae   : > { %6154 = vst [vmem:[#allocation29_spill] sm:$0xff] %v5045_v7  ;;  %v2254_v8 = vpop.xlane.xlu0 %2253  ;;  %2737 = vmin.xlane.f32.xlu0 %v5045_v7  ;;  %v2824_v29 = vshra.s32 %v5052_v35, 16 }
 0x5af   : > { %vm2326_vm15 = vcmp.eq.f32.partialorder %v4695_v0, %v2254_v8  ;;  %v5057_v18 = vpop.xlane.xlu1 %2160  ;;  %3716 = vmatmul.mubr.msk.f32.vlgmr.msra.gmra.mrb[18].mxu1 %vm539_vm2, %v3871_v23  ;;  %v2614_v8 = vshra.s32 %v5061_v55, 16  ;;  %6156 = vst [vmem:[#allocation31_spill] sm:$0xff] %v5077_v37 }
 0x5b0   : > { %v5063_v51 = vcvt.s32.f32 %v2824_v29  ;;  %v2374_v60 = vsel %vm2326_vm15, %v4172_v34, 16  ;;  %v2357_v29 = vsel %vm2309_vm8, %v4172_v34, 16  ;;  %vm2295_vm14 = vcmp.eq.f32.partialorder %v6168_v27, %v5057_v18 }
 0x5b1   : > { %v5075_v23 = vsel %vm2152_vm6, %v2374_v60, 2147483647  ;;  %v5084_v26 = vcvt.s32.f32 %v2614_v8  ;;  %v5088_v60 = vsel %vm2145_vm7, %v2357_v29, 2147483647 }
 0x5b2   : > { %v5068_v53 = vpop.xlane.xlu0 %2169  ;;  %2827 = vmin.xlane.f32.xlu1 %v5063_v51  ;;  %v2914_v55 = vshra.s32 %v5075_v23, 16  ;;  %v2659_v29 = vshra.s32 %v5088_v60, 16 }
 0x5b3   : > { %v5071_v0 = vpop.xlane.xlu1 %2178  ;;  %6157 = vst [vmem:[#allocation32_spill] sm:$0xff] %v5084_v26  ;;  %vm2298_vm8 = vcmp.eq.f32.partialorder %v4709_v25, %v5068_v53 }
 0x5b4   : > { %v5106_v30 = vcvt.s32.f32 %v2914_v55  ;;  %v2346_v53 = vsel %vm2298_vm8, %v4172_v34, 16  ;;  %vm2301_vm3 = vcmp.eq.f32.partialorder %v4716_v50, %v5071_v0 }
 0x5b5   : > { %v2349_v50 = vsel %vm2301_vm3, %v4172_v34, 16 }
 0x5b6   : > { %v2188_v7 = vpop.xlane.xlu0 %2187  ;;  %2572 = vmin.xlane.f32.xlu1 %v5077_v37 }
 0x5b7   : > { %vm2304_vm1 = vcmp.eq.f32.partialorder %v4729_v20, %v2188_v7  ;;  %v2197_v57 = vpop.xlane.xlu1 %2196  ;;  %v2377_v20 = vsel %vm2329_vm0, %v4172_v34, 16 }
 0x5b8   : > { %v2352_v63 = vsel %vm2304_vm1, %v4172_v34, 16  ;;  %vm2307_vm4 = vcmp.eq.f32.partialorder %v4742_v14, %v2197_v57 }
 0x5b9   : > { %v5095_v37 = vsel %vm2145_vm7, %v2352_v63, 2147483647  ;;  %v2355_v45 = vsel %vm2307_vm4, %v4172_v34, 16 }
 0x5ba   : > { %6158 = vst [vmem:[#allocation33_spill] sm:$0xff] %v5095_v37  ;;  %v5100_v19 = vsel %vm2145_vm7, %v2355_v45, 2147483647  ;;  %v2206_v7 = vpop.xlane.xlu0 %2205  ;;  %2617 = vmin.xlane.f32.xlu1 %v5084_v26  ;;  %v2584_v8 = vshra.s32 %v5095_v37, 16  ;;  %v5115_v26 = vsel %vm2152_vm6, %v2377_v20, 2147483647  ;;  %v5130_v20 = vcvt.s32.f32 %v2659_v29 }
 0x5bb   : > { %6159 = vst [vmem:[#allocation34_spill] sm:$0xff] %v5100_v19  ;;  %vm2310_vm9 = vcmp.eq.f32.partialorder %v4762_v21, %v2206_v7  ;;  %v2215_v14 = vpop.xlane.xlu1 %2214  ;;  %v2629_v45 = vshra.s32 %v5100_v19, 16  ;;  %6161 = vst [vmem:[#allocation36_spill] sm:$0xff] %v5115_v26  ;;  %v5124_v7 = vsel %vm2145_vm7, %v2360_v38, 2147483647 }
 0x5bc   : > { %v2358_v57 = vsel %vm2310_vm9, %v4172_v34, 16  ;;  %vm2313_vm10 = vcmp.eq.f32.partialorder %v4764_v46, %v2215_v14  ;;  %v5111_v63 = vcvt.s32.f32 %v2584_v8  ;;  %6163 = vst [vmem:[#allocation38_spill] sm:$0xff] %v5130_v20  ;;  %v2959_v14 = vshra.s32 %v5115_v26, 16 }
 0x5bd   : > { %v5118_v37 = vsel %vm2145_vm7, %v2358_v57, 2147483647  ;;  %v2361_v21 = vsel %vm2313_vm10, %v4172_v34, 16  ;;  %v5132_v8 = vcvt.s32.f32 %v2629_v45  ;;  %v2704_v29 = vshra.s32 %v5124_v7, 16 }
 0x5be   : > { %6160 = vst [vmem:[#allocation35_spill] sm:$0xff] %v5111_v63  ;;  %6162 = vst [vmem:[#allocation37_spill] sm:$0xff] %v5118_v37  ;;  %v2248_v55 = vpop.xlane.xlu0 %2247  ;;  %2587 = vmin.xlane.f32.xlu0 %v5111_v63  ;;  %2917 = vmin.xlane.f32.xlu1 %v5106_v30  ;;  %v2674_v57 = vshra.s32 %v5118_v37, 16  ;;  %v5137_v19 = vsel %vm2145_vm7, %v2361_v21, 2147483647  ;;  %v2383_v63 = vsel %vm2335_vm11, %v4172_v34, 16  ;;  %v5148_v45 = vcvt.s32.f32 %v2959_v14 }
 0x5bf   : > { %v5128_v46 = vpop.xlane.xlu1 %2220  ;;  %6164 = vst [vmem:[#allocation39_spill] sm:$0xff] %v5132_v8  ;;  %6165 = vst [vmem:[#allocation40_spill] sm:$0xff] %v5137_v19  ;;  %vm2324_vm13 = vcmp.eq.f32.partialorder %v4772_v47, %v2248_v55  ;;  %v2719_v37 = vshra.s32 %v5137_v19, 16  ;;  %v5154_v26 = vsel %vm2152_vm6, %v2383_v63, 2147483647  ;;  %v5165_v14 = vcvt.s32.f32 %v2704_v29 }
 0x5c0   : > { %v5150_v21 = vcvt.s32.f32 %v2674_v57  ;;  %v2372_v47 = vsel %vm2324_vm13, %v4172_v34, 16  ;;  %v3049_v57 = vshra.s32 %v5154_v26, 16  ;;  %vm2315_vm9 = vcmp.eq.f32.partialorder %v4774_v54, %v5128_v46 }
 0x5c1   : > { %v5167_v63 = vcvt.s32.f32 %v2719_v37  ;;  %v5176_v18 = vsel %vm2145_vm7, %v2372_v47, 2147483647 }
 0x5c2   : > { %v2266_v38 = vpop.xlane.xlu0 %2265  ;;  %2662 = vmin.xlane.f32.xlu1 %v5130_v20  ;;  %2632 = vmin.xlane.f32.xlu0 %v5132_v8  ;;  %6167 = vst [vmem:[#allocation16_spill] sm:$0xff] %v5150_v21  ;;  %v2340_v8 = vsel %vm2292_vm12, %v4172_v34, 16  ;;  %6170 = vst [vmem:[#allocation41_spill] sm:$0xff] %v5176_v18  ;;  %v5188_v29 = vcvt.s32.f32 %v3049_v57  ;;  %v2884_v25 = vshra.s32 %v5176_v18, 16 }
 0x5c3   : > { %v5144_v36 = vpop.xlane.xlu1 %2229  ;;  %6169 = vst [vmem:[#allocation17_spill] sm:$0xff] %v5167_v63  ;;  %v5171_v2 = vsel %vm2145_vm7, %v2340_v8, 2147483647  ;;  %vm2330_vm0 = vcmp.eq.f32.partialorder %v4801_v41, %v2266_v38 }
 0x5c4   : > { %vm2318_vm11 = vcmp.eq.f32.partialorder %v4792_v17, %v5144_v36 }
 0x5c6   : > { %v5157_v20 = vpop.xlane.xlu0 %2271  ;;  %2962 = vmin.xlane.f32.xlu1 %v5148_v45  ;;  %2677 = vmin.xlane.f32.xlu0 %v5150_v21  ;;  %v2343_v21 = vsel %vm2295_vm14, %v4172_v34, 16 }
 0x5c7   : > { %v2239_v55 = vpop.xlane.xlu1 %2238  ;;  %v5192_v47 = vsel %vm2145_vm7, %v2343_v21, 2147483647 }
 0x5c8   : > { %vm2321_vm15 = vcmp.eq.f32.partialorder %v4811_v56, %v2239_v55  ;;  %v2449_v57 = vshra.s32 %v5192_v47, 16 }
 0x5c9   : > { %v2369_v19 = vsel %vm2321_vm15, %v4172_v34, 16 }
 0x5ca   : > { %v5179_v27 = vsel %vm2145_vm7, %v2369_v19, 2147483647  ;;  %v2284_v56 = vpop.xlane.xlu0 %2283  ;;  %2707 = vmin.xlane.f32.xlu1 %v5165_v14  ;;  %2722 = vmin.xlane.f32.xlu0 %v5167_v63  ;;  %v2404_v19 = vshra.s32 %v5171_v2, 16 }
 0x5cb   : > { %6171 = vst [vmem:[#allocation42_spill] sm:$0xff] %v5179_v27  ;;  %v2257_v37 = vpop.xlane.xlu1 %2256  ;;  %v2839_v8 = vshra.s32 %v5179_v27, 16  ;;  %vm2336_vm10 = vcmp.eq.f32.partialorder %v4837_v11, %v2284_v56 }
 0x5cc   : > { %vm2327_vm1 = vcmp.eq.f32.partialorder %v4835_v58, %v2257_v37  ;;  %v2378_v58 = vsel %vm2330_vm0, %v4172_v34, 16  ;;  %v5208_v21 = vcvt.s32.f32 %v2404_v19  ;;  %v5212_v37 = vsel %vm2145_vm7, %v2346_v53, 2147483647 }
 0x5cd   : > { %v2375_v55 = vsel %vm2327_vm1, %v4172_v34, 16  ;;  %v5195_v63 = vcvt.s32.f32 %v2839_v8  ;;  %v5214_v8 = vcvt.s32.f32 %v2884_v25  ;;  %v5219_v0 = vsel %vm2145_vm7, %v2378_v58, 2147483647 }
 0x5ce   : > { %v5200_v27 = vsel %vm2145_vm7, %v2375_v55, 2147483647  ;;  %v2290_v41 = vpop.xlane.xlu0 %2289  ;;  %3052 = vmin.xlane.f32.xlu1 %v5188_v29  ;;  %6173 = vst [vmem:[#allocation44_spill] sm:$0xff] %v5219_v0  ;;  %v5227_v19 = vcvt.s32.f32 %v2449_v57  ;;  %v2494_v25 = vshra.s32 %v5212_v37, 16  ;;  %v5231_v53 = vsel %vm2145_vm7, %v2349_v50, 2147483647 }
 0x5cf   : > { %6172 = vst [vmem:[#allocation43_spill] sm:$0xff] %v5200_v27  ;;  %2842 = vmin.xlane.f32.xlu0 %v5195_v63  ;;  %v2275_v38 = vpop.xlane.xlu1 %2274  ;;  %v2929_v55 = vshra.s32 %v5200_v27, 16  ;;  %v2363_v27 = vsel %vm2315_vm9, %v4172_v34, 16  ;;  %v2384_v11 = vsel %vm2336_vm10, %v4172_v34, 16  ;;  %vm2338_vm12 = vcmp.eq.f32.partialorder %v4851_v4, %v2290_v41  ;;  %v6177_v4 = vld [vmem:[#allocation18_spill] sm:$0xff] }
 0x5d0   : > { %vm2333_vm4 = vcmp.eq.f32.partialorder %v4847_v61, %v2275_v38  ;;  %v2974_v38 = vshra.s32 %v5219_v0, 16  ;;  %v5246_v56 = vcvt.s32.f32 %v2494_v25  ;;  %v2539_v57 = vshra.s32 %v5231_v53, 16 }
 0x5d1   : > { %v2381_v61 = vsel %vm2333_vm4, %v4172_v34, 16  ;;  %v5233_v58 = vcvt.s32.f32 %v2929_v55  ;;  %v5250_v55 = vsel %vm2145_vm7, %v2363_v27, 2147483647  ;;  %v2366_v0 = vsel %vm2318_vm11, %v4172_v34, 16 }
 0x5d2   : > { %v2224_v18 = vpop.xlane.xlu0 %2223  ;;  %2407 = vmin.xlane.f32.xlu1 %v5208_v21  ;;  %v5238_v54 = vsel %vm2145_vm7, %v2381_v61, 2147483647  ;;  %v5252_v50 = vcvt.s32.f32 %v2974_v38  ;;  %v5257_v17 = vsel %vm2145_vm7, %v2384_v11, 2147483647  ;;  %vm2332_vm13 = vcmp.eq.f32.partialorder %v6177_v4, %v5157_v20 }
 0x5d3   : > { %2887 = vmin.xlane.f32.xlu0 %v5214_v8  ;;  %6174 = vst [vmem:[#allocation45_spill] sm:$0xff] %v5238_v54  ;;  %v3019_v61 = vshra.s32 %v5238_v54, 16  ;;  %6176 = vst [vmem:[#allocation47_spill] sm:$0xff] %v5257_v17  ;;  %v2386_v36 = vsel %vm2338_vm12, %v4172_v34, 16  ;;  %vm2316_vm14 = vcmp.eq.f32.partialorder %v4865_v12, %v2224_v18  ;;  %v5265_v41 = vcvt.s32.f32 %v2539_v57  ;;  %v2251_v18 = vpop.xlane.xlu1 %2250 }
 0x5d4   : > { %6175 = vst [vmem:[#allocation46_spill] sm:$0xff] %v5252_v50  ;;  %v2749_v25 = vshra.s32 %v5250_v55, 16  ;;  %v5269_v38 = vsel %vm2145_vm7, %v2366_v0, 2147483647  ;;  %v3064_v54 = vshra.s32 %v5257_v17, 16  ;;  %v2380_v20 = vsel %vm2332_vm13, %v4172_v34, 16 }
 0x5d5   : > { %v5271_v11 = vcvt.s32.f32 %v3019_v61  ;;  %v5276_v4 = vsel %vm2152_vm6, %v2386_v36, 2147483647  ;;  %v2364_v12 = vsel %vm2316_vm14, %v4172_v34, 16  ;;  %v2794_v57 = vshra.s32 %v5269_v38, 16 }
 0x5d6   : > { %v2233_v46 = vpop.xlane.xlu0 %2232  ;;  %2452 = vmin.xlane.f32.xlu1 %v5227_v19  ;;  %6179 = vst [vmem:[#allocation48_spill] sm:$0xff] %v5276_v4  ;;  %v5283_v0 = vcvt.s32.f32 %v2749_v25  ;;  %v5287_v61 = vsel %vm2152_vm6, %v2380_v20, 2147483647  ;;  %v5289_v36 = vcvt.s32.f32 %v3064_v54  ;;  %v3094_v17 = vshra.s32 %v5276_v4, 16 }
 0x5d7   : > { %2932 = vmin.xlane.f32.xlu0 %v5233_v58  ;;  %6178 = vst [vmem:[#allocation18_spill] sm:$0xff] %v5271_v11  ;;  %vm2319_vm8 = vcmp.eq.f32.partialorder %v4869_v48, %v2233_v46  ;;  %vm2325_vm0 = vcmp.eq.f32.partialorder %v4863_v3, %v2251_v18  ;;  %v3004_v54 = vshra.s32 %v5287_v61, 16  ;;  %v2269_v18 = vpop.xlane.xlu1 %2268 }
 0x5d8   : > { %6180 = vst [vmem:[#allocation49_spill] sm:$0xff] %v5289_v36  ;;  %v2367_v48 = vsel %vm2319_vm8, %v4172_v34, 16  ;;  %v5306_v20 = vcvt.s32.f32 %v3094_v17  ;;  %v2373_v4 = vsel %vm2325_vm0, %v4172_v34, 16  ;;  %vm2331_vm1 = vcmp.eq.f32.partialorder %v4875_v32, %v2269_v18 }
 0x5d9   : > { %v5311_v3 = vsel %vm2145_vm7, %v2367_v48, 2147483647  ;;  %v5320_v17 = vsel %vm2145_vm7, %v2373_v4, 2147483647 }
 0x5da   : > { %2497 = vmin.xlane.f32.xlu1 %v5246_v56  ;;  %v2242_v27 = vpop.xlane.xlu0 %2241  ;;  %6182 = vst [vmem:[#allocation51_spill] sm:$0xff] %v5306_v20  ;;  %6183 = vst [vmem:[#allocation52_spill] sm:$0xff] %v5311_v3 }
 0x5db   : > { %2977 = vmin.xlane.f32.xlu0 %v5252_v50  ;;  %vm2322_vm15 = vcmp.eq.f32.partialorder %v4885_v6, %v2242_v27  ;;  %v5293_v50 = vsel %vm2145_vm7, %v2364_v12, 2147483647  ;;  %v5300_v27 = vcvt.s32.f32 %v2794_v57  ;;  %v5316_v57 = vcvt.s32.f32 %v3004_v54  ;;  %v2287_v32 = vpop.xlane.xlu1 %2286 }
 0x5dc   : > { %6181 = vst [vmem:[#allocation50_spill] sm:$0xff] %v5293_v50  ;;  %v2370_v6 = vsel %vm2322_vm15, %v4172_v34, 16  ;;  %v2764_v12 = vshra.s32 %v5293_v50, 16  ;;  %v2809_v50 = vshra.s32 %v5311_v3, 16  ;;  %v2899_v54 = vshra.s32 %v5320_v17, 16 }
 0x5dd   : > { %v5304_v25 = vsel %vm2145_vm7, %v2370_v6, 2147483647  ;;  %vm2337_vm4 = vcmp.eq.f32.partialorder %v4883_v44, %v2287_v32 }
 0x5de   : > { %2542 = vmin.xlane.f32.xlu1 %v5265_v41  ;;  %v2260_v46 = vpop.xlane.xlu0 %2259  ;;  %v2854_v6 = vshra.s32 %v5304_v25, 16  ;;  %v5341_v18 = vcvt.s32.f32 %v2899_v54  ;;  %v2385_v54 = vsel %vm2337_vm4, %v4172_v34, 16 }
 0x5df   : > { %3022 = vmin.xlane.f32.xlu0 %v5271_v11  ;;  %vm2328_vm6 = vcmp.eq.f32.partialorder %v4891_v49, %v2260_v46 }
 0x5e0   : > { %v2376_v48 = vsel %vm2328_vm6, %v4172_v34, 16  ;;  %v5329_v46 = vcvt.s32.f32 %v2854_v6 }
 0x5e1   : > { %v5333_v4 = vsel %vm2145_vm7, %v2376_v48, 2147483647 }
 0x5e2   : > { %2752 = vmin.xlane.f32.xlu1 %v5283_v0  ;;  %v2278_v49 = vpop.xlane.xlu0 %2277  ;;  %v2944_v6 = vshra.s32 %v5333_v4, 16 }
 0x5e3   : > { %3067 = vmin.xlane.f32.xlu0 %v5289_v36  ;;  %v5322_v36 = vcvt.s32.f32 %v2764_v12  ;;  %v5335_v12 = vcvt.s32.f32 %v2809_v50  ;;  %vm2334_vm3 = vcmp.eq.f32.partialorder %v4895_v52, %v2278_v49 }
 0x5e4   : > { %v2382_v48 = vsel %vm2334_vm3, %v4172_v34, 16  ;;  %v5350_v50 = vcvt.s32.f32 %v2944_v6 }
 0x5e5   : > { %6184 = vst [vmem:[#allocation53_spill] sm:$0xff] %v5322_v36  ;;  %6185 = vst [vmem:[#allocation54_spill] sm:$0xff] %v5335_v12  ;;  %v5354_v49 = vsel %vm2145_vm7, %v2382_v48, 2147483647  ;;  %v2418_v48 = vand.u32 65535, %v4904_v13  ;;  %v2778_v13 = vand.u32 65535, %v4938_v10 }
 0x5e6   : > { %2797 = vmin.xlane.f32.xlu1 %v5300_v27  ;;  %v6196_v10 = vld [vmem:[#allocation21_spill] sm:$0xff] }
 0x5e7   : > { %3097 = vmin.xlane.f32.xlu0 %v5306_v20  ;;  %v2379_v20 = vsel %vm2331_vm1, %v4172_v34, 16 }
 0x5e8   : > { %v5345_v3 = vsel %vm2145_vm7, %v2379_v20, 2147483647  ;;  %v3034_v20 = vshra.s32 %v5354_v49, 16 }
 0x5e9   : > { %v2989_v52 = vshra.s32 %v5345_v3, 16 }
 0x5ea   : > { %3007 = vmin.xlane.f32.xlu1 %v5316_v57  ;;  %v5366_v32 = vcvt.s32.f32 %v3034_v20  ;;  %v2463_v20 = vand.u32 65535, %v4916_v22 }
 0x5eb   : > { %2767 = vmin.xlane.f32.xlu0 %v5322_v36  ;;  %v5362_v36 = vsel %vm2145_vm7, %v2385_v54, 2147483647  ;;  %v2420_v54 = vcvt.s32.f32 %v2418_v48 }
 0x5ec   : > { %6187 = vst [vmem:[#allocation56_spill] sm:$0xff] %v5362_v36  ;;  %v3079_v44 = vshra.s32 %v5362_v36, 16  ;;  %6188 = vst [vmem:[#allocation57_spill] sm:$0xff] %v5366_v32  ;;  %v2465_v48 = vcvt.s32.f32 %v2463_v20 }
 0x5ee   : > { %2857 = vmin.xlane.f32.xlu1 %v5329_v46  ;;  %v5369_v6 = vcvt.s32.f32 %v3079_v44 }
 0x5ef   : > { %2812 = vmin.xlane.f32.xlu0 %v5335_v12  ;;  %v5359_v12 = vcvt.s32.f32 %v2989_v52  ;;  %v2508_v52 = vand.u32 65535, %v4907_v16 }
 0x5f0   : > { %6189 = vst [vmem:[#allocation58_spill] sm:$0xff] %v5369_v6 }
 0x5f1   : > { %6186 = vst [vmem:[#allocation55_spill] sm:$0xff] %v5359_v12  ;;  %v2510_v44 = vcvt.s32.f32 %v2508_v52 }
 0x5f2   : > { %2902 = vmin.xlane.f32.xlu1 %v5341_v18 }
 0x5f6   : > { %2947 = vmin.xlane.f32.xlu1 %v5350_v50 }
 0x5fa   : > { %2992 = vmin.xlane.f32.xlu1 %v5359_v12  ;;  %v2780_v12 = vcvt.s32.f32 %v2778_v13 }
 0x5fe   : > { %3037 = vmin.xlane.f32.xlu1 %v5366_v32  ;;  %v6192_v32 = vld [vmem:[#allocation19_spill] sm:$0xff] }
 0x602   : > { %3082 = vmin.xlane.f32.xlu1 %v5369_v6 }
 0x617   : > { %v5374_v34 = vpop.xlane.xlu1 %2422 }
 0x618   : > { %6190 = vst [vmem:[#allocation59_spill] sm:$0xff] %v5374_v34  ;;  %vm2424_vm7 = vcmp.eq.f32.partialorder %v4912_v5, %v5374_v34 }
 0x619   : > { %v2425_v11 = vsel %vm2424_vm7, %v2420_v54, inf  ;;  %v6194_v54 = vld [vmem:[#allocation24_spill] sm:$0xff] }
 0x61a   : > { %2426 = vmin.xlane.f32.xlu0 %v2425_v11  ;;  %v6193_v11 = vld [vmem:[#allocation20_spill] sm:$0xff]  ;;  %v2868_v34 = vand.u32 65535, %v6194_v54 }
 0x61b   : > { %v5379_v36 = vpop.xlane.xlu1 %2512  ;;  %v2553_v22 = vand.u32 65535, %v6193_v11 }
 0x61c   : > { %6191 = vst [vmem:[#allocation60_spill] sm:$0xff] %v5379_v36  ;;  %vm2514_vm9 = vcmp.eq.f32.partialorder %v4920_v1, %v5379_v36  ;;  %v6195_v1 = vld [vmem:[#allocation22_spill] sm:$0xff] }
 0x61d   : > { %v2515_v6 = vsel %vm2514_vm9, %v2510_v44, inf  ;;  %v2598_v44 = vand.u32 65535, %v6196_v10 }
 0x61e   : > { %2516 = vmin.xlane.f32.xlu1 %v2515_v6 }
 0x61f   : > { %v5384_v16 = vpop.xlane.xlu1 %2467 }
 0x620   : > { %vm2469_vm10 = vcmp.eq.f32.partialorder %v6192_v32, %v5384_v16  ;;  %v2555_v32 = vcvt.s32.f32 %v2553_v22  ;;  %v6198_v22 = vld [vmem:[#allocation23_spill] sm:$0xff] }
 0x621   : > { %v2470_v5 = vsel %vm2469_vm10, %v2465_v48, inf  ;;  %v2870_v48 = vcvt.s32.f32 %v2868_v34  ;;  %v2388_v10 = vand.u32 65535, %v6198_v22 }
 0x622   : > { %2471 = vmin.xlane.f32.xlu0 %v2470_v5  ;;  %v6197_v5 = vld [vmem:[#allocation25_spill] sm:$0xff] }
 0x623   : > { %v5390_v52 = vpop.xlane.xlu0 %2782 }
 0x624   : > { %vm2784_vm11 = vcmp.eq.f32.partialorder %v6195_v1, %v5390_v52 }
 0x625   : > { %v2785_v6 = vsel %vm2784_vm11, %v2780_v12, inf  ;;  %v2688_v12 = vand.u32 65535, %v4967_v62 }
 0x626   : > { %2786 = vmin.xlane.f32.xlu0 %v2785_v6  ;;  %v2600_v6 = vcvt.s32.f32 %v2598_v44  ;;  %v6199_v44 = vld [vmem:[#allocation26_spill] sm:$0xff] }
 0x627   : > { %v5395_v20 = vpop.xlane.xlu0 %2557  ;;  %v5397_v36 = vpop.xlane.xlu1 %2872 }
 0x628   : > { %vm2559_vm12 = vcmp.eq.f32.partialorder %v6197_v5, %v5395_v20  ;;  %vm2874_vm13 = vcmp.eq.f32.partialorder %v4970_v24, %v5397_v36  ;;  %v2690_v24 = vcvt.s32.f32 %v2688_v12 }
 0x629   : > { %v2560_v13 = vsel %vm2559_vm12, %v2555_v32, inf  ;;  %v2875_v11 = vsel %vm2874_vm13, %v2870_v48, inf  ;;  %v2433_v48 = vand.u32 65535, %v6199_v44 }
 0x62a   : > { %2561 = vmin.xlane.f32.xlu0 %v2560_v13  ;;  %2876 = vmin.xlane.f32.xlu1 %v2875_v11  ;;  %v2478_v11 = vand.u32 65535, %v4989_v43  ;;  %v6200_v43 = vld [vmem:[#allocation28_spill] sm:$0xff] }
 0x62b   : > { %v5404_v54 = vpop.xlane.xlu0 %2602  ;;  %v5406_v1 = vpop.xlane.xlu1 %2392 }
 0x62c   : > { %vm2604_vm14 = vcmp.eq.f32.partialorder %v4981_v28, %v5404_v54  ;;  %vm2394_vm8 = vcmp.eq.f32.partialorder %v4983_v9, %v5406_v1  ;;  %v2390_v28 = vcvt.s32.f32 %v2388_v10  ;;  %v2523_v9 = vand.u32 65535, %v4986_v59 }
 0x62d   : > { %v2605_v34 = vsel %vm2604_vm14, %v2600_v6, inf  ;;  %v2435_v6 = vcvt.s32.f32 %v2433_v48  ;;  %v2480_v22 = vcvt.s32.f32 %v2478_v11  ;;  %v2823_v10 = vand.u32 65535, %v5052_v35 }
 0x62e   : > { %2606 = vmin.xlane.f32.xlu0 %v2605_v34  ;;  %v2395_v13 = vsel %vm2394_vm8, %v2390_v28, inf  ;;  %v2525_v48 = vcvt.s32.f32 %v2523_v9 }
 0x62f   : > { %v5411_v5 = vpop.xlane.xlu0 %2692  ;;  %v5415_v32 = vpop.xlane.xlu1 %2437 }
 0x630   : > { %vm2694_vm15 = vcmp.eq.f32.partialorder %v4993_v15, %v5411_v5  ;;  %vm2439_vm0 = vcmp.eq.f32.partialorder %v4995_v33, %v5415_v32 }
 0x631   : > { %v2695_v62 = vsel %vm2694_vm15, %v2690_v24, inf  ;;  %v2440_v34 = vsel %vm2439_vm0, %v2435_v6, inf }
 0x632   : > { %2696 = vmin.xlane.f32.xlu0 %v2695_v62  ;;  %v6201_v62 = vld [vmem:[#allocation27_spill] sm:$0xff] }
 0x633   : > { %v5423_v12 = vpop.xlane.xlu0 %2527  ;;  %v5425_v15 = vpop.xlane.xlu1 %2482  ;;  %v2643_v44 = vand.u32 65535, %v6201_v62 }
 0x634   : > { %vm2484_vm6 = vcmp.eq.f32.partialorder %v5012_v42, %v5425_v15  ;;  %vm2529_vm1 = vcmp.eq.f32.partialorder %v6200_v43, %v5423_v12  ;;  %v2568_v42 = vand.u32 65535, %v5049_v40  ;;  %v6204_v43 = vld [vmem:[#allocation29_spill] sm:$0xff] }
 0x635   : > { %v2485_v33 = vsel %vm2484_vm6, %v2480_v22, inf  ;;  %v2530_v59 = vsel %vm2529_vm1, %v2525_v48, inf  ;;  %v2645_v6 = vcvt.s32.f32 %v2643_v44 }
 0x636   : > { %2396 = vmin.xlane.f32.xlu0 %v2395_v13  ;;  %v2825_v13 = vcvt.s32.f32 %v2823_v10  ;;  %v2570_v22 = vcvt.s32.f32 %v2568_v42  ;;  %v6202_v10 = vld [vmem:[#allocation30_spill] sm:$0xff] }
 0x637   : > { %v5431_v24 = vpop.xlane.xlu0 %2647  ;;  %v2613_v40 = vand.u32 65535, %v6202_v10 }
 0x638   : > { %vm2649_vm4 = vcmp.eq.f32.partialorder %v5025_v39, %v5431_v24 }
 0x639   : > { %v2615_v44 = vcvt.s32.f32 %v2613_v40 }
 0x63a   : > { %2441 = vmin.xlane.f32.xlu0 %v2440_v34  ;;  %v2733_v34 = vand.u32 65535, %v5031_v31  ;;  %v2913_v31 = vand.u32 65535, %v5075_v23 }
 0x63b   : > { %v5443_v11 = vpop.xlane.xlu0 %2737 }
 0x63c   : > { %vm2739_vm9 = vcmp.eq.f32.partialorder %v6204_v43, %v5443_v11  ;;  %v2735_v62 = vcvt.s32.f32 %v2733_v34  ;;  %v2915_v10 = vcvt.s32.f32 %v2913_v31 }
 0x63e   : > { %2486 = vmin.xlane.f32.xlu0 %v2485_v33  ;;  %v6203_v33 = vld [vmem:[#allocation31_spill] sm:$0xff]  ;;  %v2740_v42 = vsel %vm2739_vm9, %v2735_v62, inf }
 0x63f   : > { %v5436_v28 = vpop.xlane.xlu1 %2827 }
 0x640   : > { %vm2829_vm3 = vcmp.eq.f32.partialorder %v5063_v51, %v5436_v28  ;;  %v2650_v51 = vsel %vm2649_vm4, %v2645_v6, inf }
 0x641   : > { %v2830_v35 = vsel %vm2829_vm3, %v2825_v13, inf  ;;  %v6205_v13 = vld [vmem:[#allocation32_spill] sm:$0xff] }
 0x642   : > { %2531 = vmin.xlane.f32.xlu0 %v2530_v59  ;;  %2831 = vmin.xlane.f32.xlu1 %v2830_v35 }
 0x643   : > { %v5446_v9 = vpop.xlane.xlu1 %2572 }
 0x644   : > { %vm2574_vm7 = vcmp.eq.f32.partialorder %v6203_v33, %v5446_v9 }
 0x645   : > { %v2575_v39 = vsel %vm2574_vm7, %v2570_v22, inf  ;;  %v2658_v22 = vand.u32 65535, %v5088_v60 }
 0x646   : > { %2651 = vmin.xlane.f32.xlu0 %v2650_v51  ;;  %2576 = vmin.xlane.f32.xlu1 %v2575_v39  ;;  %v6206_v51 = vld [vmem:[#allocation36_spill] sm:$0xff]  ;;  %v6207_v39 = vld [vmem:[#allocation38_spill] sm:$0xff] }
 0x647   : > { %v5453_v48 = vpop.xlane.xlu1 %2617  ;;  %v2660_v33 = vcvt.s32.f32 %v2658_v22  ;;  %v2958_v43 = vand.u32 65535, %v6206_v51  ;;  %v2403_v51 = vand.u32 65535, %v5171_v2 }
 0x648   : > { %vm2619_vm10 = vcmp.eq.f32.partialorder %v6205_v13, %v5453_v48 }
 0x649   : > { %v2620_v59 = vsel %vm2619_vm10, %v2615_v44, inf  ;;  %v2960_v31 = vcvt.s32.f32 %v2958_v43 }
 0x64a   : > { %2741 = vmin.xlane.f32.xlu0 %v2740_v42  ;;  %2621 = vmin.xlane.f32.xlu1 %v2620_v59 }
 0x64b   : > { %v5458_v35 = vpop.xlane.xlu0 %2587  ;;  %v5460_v6 = vpop.xlane.xlu1 %2917 }
 0x64c   : > { %vm2919_vm11 = vcmp.eq.f32.partialorder %v5106_v30, %v5460_v6  ;;  %v2703_v30 = vand.u32 65535, %v5124_v7 }
 0x64d   : > { %v2920_v34 = vsel %vm2919_vm11, %v2915_v10, inf  ;;  %v3048_v10 = vand.u32 65535, %v5154_v26 }
 0x64e   : > { %2921 = vmin.xlane.f32.xlu1 %v2920_v34  ;;  %v2705_v59 = vcvt.s32.f32 %v2703_v30  ;;  %v2493_v30 = vand.u32 65535, %v5212_v37  ;;  %v6209_v37 = vld [vmem:[#allocation35_spill] sm:$0xff] }
 0x64f   : > { %v5465_v23 = vpop.xlane.xlu0 %2632  ;;  %v5467_v40 = vpop.xlane.xlu1 %2662  ;;  %v3050_v7 = vcvt.s32.f32 %v3048_v10  ;;  %v6208_v10 = vld [vmem:[#allocation33_spill] sm:$0xff]  ;;  %vm2589_vm1 = vcmp.eq.f32.partialorder %v6209_v37, %v5458_v35 }
 0x650   : > { %vm2664_vm12 = vcmp.eq.f32.partialorder %v6207_v39, %v5467_v40  ;;  %v2405_v39 = vcvt.s32.f32 %v2403_v51 }
 0x651   : > { %v2665_v62 = vsel %vm2664_vm12, %v2660_v33, inf }
 0x652   : > { %2666 = vmin.xlane.f32.xlu1 %v2665_v62  ;;  %v2448_v62 = vand.u32 65535, %v5192_v47  ;;  %v2495_v47 = vcvt.s32.f32 %v2493_v30  ;;  %v6211_v30 = vld [vmem:[#allocation39_spill] sm:$0xff] }
 0x653   : > { %v5472_v44 = vpop.xlane.xlu0 %2677  ;;  %v5474_v60 = vpop.xlane.xlu1 %2962  ;;  %vm2634_vm4 = vcmp.eq.f32.partialorder %v6211_v30, %v5465_v23  ;;  %v6217_v30 = vld [vmem:[#allocation17_spill] sm:$0xff] }
 0x654   : > { %vm2964_vm13 = vcmp.eq.f32.partialorder %v5148_v45, %v5474_v60  ;;  %v2450_v2 = vcvt.s32.f32 %v2448_v62  ;;  %v6210_v62 = vld [vmem:[#allocation34_spill] sm:$0xff] }
 0x655   : > { %v2965_v13 = vsel %vm2964_vm13, %v2960_v31, inf }
 0x656   : > { %2966 = vmin.xlane.f32.xlu1 %v2965_v13 }
 0x657   : > { %v5479_v42 = vpop.xlane.xlu1 %2707  ;;  %v5482_v22 = vpop.xlane.xlu0 %2722 }
 0x658   : > { %vm2709_vm14 = vcmp.eq.f32.partialorder %v5165_v14, %v5479_v42  ;;  %vm2724_vm11 = vcmp.eq.f32.partialorder %v6217_v30, %v5482_v22  ;;  %v2898_v30 = vand.u32 65535, %v5320_v17 }
 0x659   : > { %v2710_v34 = vsel %vm2709_vm14, %v2705_v59, inf }
 0x65a   : > { %2711 = vmin.xlane.f32.xlu1 %v2710_v34  ;;  %v2583_v34 = vand.u32 65535, %v6208_v10 }
 0x65b   : > { %v5486_v33 = vpop.xlane.xlu1 %3052 }
 0x65c   : > { %vm3054_vm15 = vcmp.eq.f32.partialorder %v5188_v29, %v5486_v33  ;;  %v5491_v43 = vpop.xlane.xlu0 %2842 }
 0x65d   : > { %v3055_v45 = vsel %vm3054_vm15, %v3050_v7, inf  ;;  %vm2844_vm13 = vcmp.eq.f32.partialorder %v5195_v63, %v5491_v43 }
 0x65e   : > { %3056 = vmin.xlane.f32.xlu1 %v3055_v45  ;;  %v2585_v45 = vcvt.s32.f32 %v2583_v34  ;;  %v6213_v34 = vld [vmem:[#allocation37_spill] sm:$0xff] }
 0x65f   : > { %v5493_v26 = vpop.xlane.xlu1 %2407 }
 0x660   : > { %vm2409_vm8 = vcmp.eq.f32.partialorder %v5208_v21, %v5493_v26  ;;  %v5501_v29 = vpop.xlane.xlu0 %2887  ;;  %v2538_v21 = vand.u32 65535, %v5231_v53  ;;  %v2590_v53 = vsel %vm2589_vm1, %v2585_v45, inf  ;;  %v6214_v45 = vld [vmem:[#allocation16_spill] sm:$0xff] }
 0x661   : > { %v2410_v14 = vsel %vm2409_vm8, %v2405_v39, inf  ;;  %vm2679_vm9 = vcmp.eq.f32.partialorder %v6214_v45, %v5472_v44  ;;  %vm2889_vm15 = vcmp.eq.f32.partialorder %v5214_v8, %v5501_v29 }
 0x662   : > { %2411 = vmin.xlane.f32.xlu0 %v2410_v14  ;;  %v2540_v39 = vcvt.s32.f32 %v2538_v21  ;;  %v2628_v14 = vand.u32 65535, %v6210_v62  ;;  %v2673_v21 = vand.u32 65535, %v6213_v34 }
 0x663   : > { %v5498_v31 = vpop.xlane.xlu1 %2452 }
 0x664   : > { %vm2454_vm0 = vcmp.eq.f32.partialorder %v5227_v19, %v5498_v31  ;;  %v5513_v51 = vpop.xlane.xlu0 %2932  ;;  %v2675_v62 = vcvt.s32.f32 %v2673_v21 }
 0x665   : > { %v2455_v13 = vsel %vm2454_vm0, %v2450_v2, inf  ;;  %v2748_v2 = vand.u32 65535, %v5250_v55  ;;  %vm2934_vm0 = vcmp.eq.f32.partialorder %v5233_v58, %v5513_v51 }
 0x666   : > { %2456 = vmin.xlane.f32.xlu0 %v2455_v13 }
 0x667   : > { %v5505_v59 = vpop.xlane.xlu1 %2497  ;;  %v2750_v10 = vcvt.s32.f32 %v2748_v2  ;;  %v6216_v2 = vld [vmem:[#allocation40_spill] sm:$0xff] }
 0x668   : > { %vm2499_vm6 = vcmp.eq.f32.partialorder %v5246_v56, %v5505_v59  ;;  %v5527_v37 = vpop.xlane.xlu0 %2977 }
 0x669   : > { %v2500_v7 = vsel %vm2499_vm6, %v2495_v47, inf  ;;  %v2630_v47 = vcvt.s32.f32 %v2628_v14 }
 0x66a   : > { %2501 = vmin.xlane.f32.xlu0 %v2500_v7  ;;  %v2793_v7 = vand.u32 65535, %v5269_v38  ;;  %v3003_v38 = vand.u32 65535, %v5287_v61  ;;  %v2853_v61 = vand.u32 65535, %v5304_v25 }
 0x66b   : > { %v5515_v19 = vpop.xlane.xlu1 %2542  ;;  %v2635_v55 = vsel %vm2634_vm4, %v2630_v47, inf }
 0x66c   : > { %vm2544_vm3 = vcmp.eq.f32.partialorder %v5265_v41, %v5515_v19  ;;  %v2795_v14 = vcvt.s32.f32 %v2793_v7  ;;  %v5541_v47 = vpop.xlane.xlu0 %3022  ;;  %v3005_v21 = vcvt.s32.f32 %v3003_v38  ;;  %v6220_v7 = vld [vmem:[#allocation42_spill] sm:$0xff]  ;;  %v2855_v25 = vcvt.s32.f32 %v2853_v61  ;;  %v6225_v61 = vld [vmem:[#allocation15_spill] sm:$0xff] }
 0x66d   : > { %v2545_v56 = vsel %vm2544_vm3, %v2540_v39, inf  ;;  %6218 = vst [vmem:[#allocation24_spill] sm:$0xff] %v5541_v47 }
 0x66e   : > { %2591 = vmin.xlane.f32.xlu0 %v2590_v53  ;;  %2546 = vmin.xlane.f32.xlu1 %v2545_v56  ;;  %v2718_v53 = vand.u32 65535, %v6216_v2  ;;  %v6222_v2 = vld [vmem:[#allocation10_spill] sm:$0xff] }
 0x66f   : > { %v5523_v13 = vpop.xlane.xlu1 %2752 }
 0x670   : > { %6212 = vst [vmem:[#allocation19_spill] sm:$0xff] %v5523_v13  ;;  %vm2754_vm7 = vcmp.eq.f32.partialorder %v5283_v0, %v5523_v13  ;;  %v2680_v0 = vsel %vm2679_vm9, %v2675_v62, inf  ;;  %v2720_v34 = vcvt.s32.f32 %v2718_v53  ;;  %v6221_v62 = vld [vmem:[#allocation41_spill] sm:$0xff] }
 0x671   : > { %v2755_v41 = vsel %vm2754_vm7, %v2750_v10, inf }
 0x672   : > { %2636 = vmin.xlane.f32.xlu0 %v2635_v55  ;;  %2756 = vmin.xlane.f32.xlu1 %v2755_v41  ;;  %v2838_v55 = vand.u32 65535, %v6220_v7 }
 0x673   : > { %v5533_v39 = vpop.xlane.xlu1 %2797 }
 0x674   : > { %6215 = vst [vmem:[#allocation20_spill] sm:$0xff] %v5533_v39  ;;  %vm2799_vm10 = vcmp.eq.f32.partialorder %v5300_v27, %v5533_v39  ;;  %v2725_v27 = vsel %vm2724_vm11, %v2720_v34, inf  ;;  %v6224_v34 = vld [vmem:[#allocation11_spill] sm:$0xff] }
 0x675   : > { %v2800_v56 = vsel %vm2799_vm10, %v2795_v14, inf  ;;  %v2883_v14 = vand.u32 65535, %v6221_v62  ;;  %v2900_v62 = vcvt.s32.f32 %v2898_v30 }
 0x676   : > { %2681 = vmin.xlane.f32.xlu0 %v2680_v0  ;;  %2801 = vmin.xlane.f32.xlu1 %v2800_v56  ;;  %v2840_v56 = vcvt.s32.f32 %v2838_v55 }
 0x677   : > { %v5544_v10 = vpop.xlane.xlu1 %3007 }
 0x678   : > { %6219 = vst [vmem:[#allocation22_spill] sm:$0xff] %v5544_v10  ;;  %vm3009_vm12 = vcmp.eq.f32.partialorder %v5316_v57, %v5544_v10  ;;  %v5557_v57 = vpop.xlane.xlu0 %3067  ;;  %v2845_v7 = vsel %vm2844_vm13, %v2840_v56, inf }
 0x679   : > { %v3010_v41 = vsel %vm3009_vm12, %v3005_v21, inf  ;;  %6223 = vst [vmem:[#allocation21_spill] sm:$0xff] %v5557_v57 }
 0x67a   : > { %v1275_v45 = vpop.f32.mrb[14].mxu1  ;;  %2726 = vmin.xlane.f32.xlu0 %v2725_v27  ;;  %3011 = vmin.xlane.f32.xlu1 %v3010_v41 }
 0x67b   : > { %v1361_v53 = vmul.f32 %v6222_v2, %v1275_v45  ;;  %v1277_v38 = vpop.f32.mrb[15].mxu1  ;;  %v5554_v0 = vpop.xlane.xlu1 %2857  ;;  %v6226_v2 = vld [vmem:[#allocation43_spill] sm:$0xff] }
 0x67c   : > { %v1362_v21 = vmul.f32 %v6224_v34, %v1277_v38  ;;  %vm2859_vm14 = vcmp.eq.f32.partialorder %v5329_v46, %v5554_v0  ;;  %v2885_v46 = vcvt.s32.f32 %v2883_v14  ;;  %v2928_v63 = vand.u32 65535, %v6226_v2  ;;  %v6227_v38 = vld [vmem:[#allocation13_spill] sm:$0xff]  ;;  %v5582_v14 = vpop.xlane.xlu0 %3097 }
 0x67d   : > { %1367 = vst [vmem:[%s5562_s25] sm:$0xff] %v1361_v53  ;;  %v2860_v55 = vsel %vm2859_vm14, %v2855_v25, inf  ;;  %v2943_v53 = vand.u32 65535, %v5333_v4  ;;  %6228 = vst [vmem:[#allocation25_spill] sm:$0xff] %v5582_v14  ;;  %v6229_v4 = vld [vmem:[#allocation44_spill] sm:$0xff] }
 0x67e   : > { %1368 = vst [vmem:[%s5562_s25 + $0x8] sm:$0xff] %v1362_v21  ;;  %v1281_v17 = vpop.f32.mrb[16].mxu1  ;;  %2846 = vmin.xlane.f32.xlu0 %v2845_v7  ;;  %2861 = vmin.xlane.f32.xlu1 %v2860_v55  ;;  %v2890_v8 = vsel %vm2889_vm15, %v2885_v46, inf  ;;  %v2973_v34 = vand.u32 65535, %v6229_v4  ;;  %v6230_v21 = vld [vmem:[#allocation14_spill] sm:$0xff] }
 0x67f   : > { %v1364_v27 = vmul.f32 %v6225_v61, %v1281_v17  ;;  %v1283_v41 = vpop.f32.mrb[17].mxu1  ;;  %v5572_v45 = vpop.xlane.xlu1 %2902  ;;  %v2930_v17 = vcvt.s32.f32 %v2928_v63  ;;  %v2945_v46 = vcvt.s32.f32 %v2943_v53  ;;  %v2988_v61 = vand.u32 65535, %v5345_v3 }
 0x680   : > { %v1365_v56 = vmul.f32 %v6227_v38, %v1283_v41  ;;  %vm2904_vm8 = vcmp.eq.f32.partialorder %v5341_v18, %v5572_v45  ;;  %v6232_v38 = vld [vmem:[#allocation46_spill] sm:$0xff]  ;;  %v3033_v3 = vand.u32 65535, %v5354_v49  ;;  %v2975_v53 = vcvt.s32.f32 %v2973_v34  ;;  %v5608_v58 = vpop.xlane.xlu0 %2767 }
 0x681   : > { %1370 = vst [vmem:[%s5562_s25 + $0x18] sm:$0xff] %v1364_v27  ;;  %v2905_v25 = vsel %vm2904_vm8, %v2900_v62, inf  ;;  %v6231_v27 = vld [vmem:[#allocation12_spill] sm:$0xff]  ;;  %v2935_v62 = vsel %vm2934_vm0, %v2930_v17, inf  ;;  %vm2979_vm1 = vcmp.eq.f32.partialorder %v6232_v38, %v5527_v37  ;;  %6236 = vst [vmem:[#allocation26_spill] sm:$0xff] %v5608_v58 }
 0x682   : > { %1371 = vst [vmem:[%s5562_s25 + $0x20] sm:$0xff] %v1365_v56  ;;  %v3717_v30 = vpop.f32.mrb[18].mxu1  ;;  %2891 = vmin.xlane.f32.xlu0 %v2890_v8  ;;  %2906 = vmin.xlane.f32.xlu1 %v2905_v25  ;;  %v6234_v56 = vld [vmem:[#allocation45_spill] sm:$0xff]  ;;  %v6235_v25 = vld [vmem:[#allocation55_spill] sm:$0xff]  ;;  %v3035_v17 = vcvt.s32.f32 %v3033_v3 }
 0x683   : > { %v1366_v7 = vmul.f32 %v6230_v21, %v3717_v30  ;;  %v1352_v55 = vpop.f32.mrb[19].mxu1  ;;  %v5587_v18 = vpop.xlane.xlu1 %2947  ;;  %v3018_v8 = vand.u32 65535, %v6234_v56  ;;  %v2980_v30 = vsel %vm2979_vm1, %v2975_v53, inf  ;;  %v6237_v21 = vld [vmem:[#allocation18_spill] sm:$0xff] }
 0x684   : > { %v1363_v41 = vmul.f32 %v6231_v27, %v1352_v55  ;;  %vm2949_vm6 = vcmp.eq.f32.partialorder %v5350_v50, %v5587_v18  ;;  %v2990_v50 = vcvt.s32.f32 %v2988_v61  ;;  %v6241_v27 = vld [vmem:[#allocation57_spill] sm:$0xff]  ;;  %v5620_v38 = vpop.xlane.xlu0 %2812 }
 0x685   : > { %1372 = vst.msk [vmem:[%s5562_s25 + $0x28] sm:$0xff] %vm730_vm5, %v1366_v7  ;;  %v2950_v2 = vsel %vm2949_vm6, %v2945_v46, inf  ;;  %v6238_v7 = vld [vmem:[#allocation56_spill] sm:$0xff]  ;;  %v3020_v34 = vcvt.s32.f32 %v3018_v8  ;;  %v6240_v46 = vld [vmem:[#allocation50_spill] sm:$0xff]  ;;  %6243 = vst [vmem:[#allocation27_spill] sm:$0xff] %v5620_v38 }
 0x686   : > { %1369 = vst.msk [vmem:[%s5562_s25 + $0x10] sm:$0xff] %vm730_vm5, %v1363_v41  ;;  %2936 = vmin.xlane.f32.xlu0 %v2935_v62  ;;  %2951 = vmin.xlane.f32.xlu1 %v2950_v2  ;;  %vm3024_vm5 = vcmp.eq.f32.partialorder %v6237_v21, %v5541_v47  ;;  %v3078_v49 = vand.u32 65535, %v6238_v7  ;;  %v2763_v61 = vand.u32 65535, %v6240_v46  ;;  %v6242_v2 = vld [vmem:[#allocation53_spill] sm:$0xff]  ;;  %v6245_v8 = vld [vmem:[#allocation52_spill] sm:$0xff]  ;;  %v6247_v21 = vld [vmem:[#allocation54_spill] sm:$0xff] }
 0x687   : > { %v5603_v63 = vpop.xlane.xlu1 %2992  ;;  %v3025_v41 = vsel %vm3024_vm5, %v3020_v34, inf  ;;  %vm2769_vm7 = vcmp.eq.f32.partialorder %v6242_v2, %v5608_v58  ;;  %v2808_v3 = vand.u32 65535, %v6245_v8  ;;  %vm2814_vm10 = vcmp.eq.f32.partialorder %v6247_v21, %v5620_v38  ;;  %v6248_v34 = vld [vmem:[#allocation47_spill] sm:$0xff]  ;;  %s3878_s25 = scalar_lea.vmem %s3877_s3, 1536 }
 0x688   : > { %6233 = vst [vmem:[#allocation23_spill] sm:$0xff] %v5603_v63  ;;  %vm2994_vm3 = vcmp.eq.f32.partialorder %v6235_v25, %v5603_v63  ;;  %v3080_v56 = vcvt.s32.f32 %v3078_v49  ;;  %v6246_v25 = vld [vmem:[#allocation58_spill] sm:$0xff]  ;;  %v6251_v2 = vld [vmem:[#allocation51_spill] sm:$0xff]  ;;  %p3880_p1 = scmp.lt.s32.totalorder %s3878_s25, %s3872_s28 }
 0x689   : > { %v2995_v4 = vsel %vm2994_vm3, %v2990_v50, inf  ;;  %v2765_v50 = vcvt.s32.f32 %v2763_v61  ;;  %v2810_v7 = vcvt.s32.f32 %v2808_v3  ;;  %v6250_v61 = vld [vmem:[#allocation48_spill] sm:$0xff]  ;;  %vm3099_vm12 = vcmp.eq.f32.partialorder %v6251_v2, %v5582_v14  ;;  %v6252_v8 = vld [vmem:[#allocation59_spill] sm:$0xff] }
 0x68a   : > { %2981 = vmin.xlane.f32.xlu0 %v2980_v30  ;;  %2996 = vmin.xlane.f32.xlu1 %v2995_v4  ;;  %v2429_v3 = vcvt.f32.s32 %v6252_v8  ;;  %p3881_p2 = por %p3880_p1, %p3879_p0 }
 0x68b   : > { %v5613_v55 = vpop.xlane.xlu1 %3037  ;;  %v2770_v30 = vsel %vm2769_vm7, %v2765_v50, inf  ;;  %v2815_v46 = vsel %vm2814_vm10, %v2810_v7, inf  ;;  %v2474_v7 = vcvt.f32.s32 %v5384_v16  ;;  %v2879_v16 = vcvt.f32.s32 %v5397_v36 }
 0x68c   : > { %6239 = vst [vmem:[#allocation28_spill] sm:$0xff] %v5613_v55  ;;  %vm3039_vm4 = vcmp.eq.f32.partialorder %v6241_v27, %v5613_v55  ;;  %v6249_v27 = vld [vmem:[#allocation49_spill] sm:$0xff]  ;;  %p3882_p3 = pnand %p3881_p2, %p3875_p13 }
 0x68d   : > { %v3040_v62 = vsel %vm3039_vm4, %v3035_v17, inf  ;;  %v3063_v17 = vand.u32 65535, %v6248_v34  ;;  %vm3069_vm11 = vcmp.eq.f32.partialorder %v6249_v27, %v5557_v57 }
 0x68e   : > { %3026 = vmin.xlane.f32.xlu0 %v3025_v41  ;;  %3041 = vmin.xlane.f32.xlu1 %v3040_v62  ;;  %v3093_v41 = vand.u32 65535, %v6250_v61 }
 0x68f   : > { %v5622_v53 = vpop.xlane.xlu1 %3082  ;;  %v3065_v49 = vcvt.s32.f32 %v3063_v17  ;;  %v2475_v17 = vshll.u32 %v2474_v7, 16 }
 0x690   : > { %6244 = vst [vmem:[#allocation30_spill] sm:$0xff] %v5622_v53  ;;  %vm3084_vm9 = vcmp.eq.f32.partialorder %v6246_v25, %v5622_v53  ;;  %v3095_v50 = vcvt.s32.f32 %v3093_v41 }
 0x691   : > { %v3085_v4 = vsel %vm3084_vm9, %v3080_v56, inf  ;;  %v3070_v62 = vsel %vm3069_vm11, %v3065_v49, inf }
 0x692   : > { %2771 = vmin.xlane.f32.xlu0 %v2770_v30  ;;  %3086 = vmin.xlane.f32.xlu1 %v3085_v4  ;;  %v3100_v56 = vsel %vm3099_vm12, %v3095_v50, inf  ;;  %v2430_v30 = vshll.u32 %v2429_v3, 16 }
 0x696   : > { %2816 = vmin.xlane.f32.xlu0 %v2815_v46  ;;  %v2789_v46 = vcvt.f32.s32 %v5390_v52 }
 0x69a   : > { %3071 = vmin.xlane.f32.xlu0 %v3070_v62  ;;  %v2790_v62 = vshll.u32 %v2789_v46, 16 }
 0x69e   : > { %3101 = vmin.xlane.f32.xlu0 %v3100_v56  ;;  %v2880_v56 = vshll.u32 %v2879_v16, 16 }
 0x6a7   : > { %v2427_v25 = vpop.xlane.xlu0 %2426 }
 0x6a8   : > { %v2428_v4 = vcvt.f32.s32 %v2427_v25 }
 0x6aa   : > { %v5636_v21 = vadd.s32 %v2430_v30, %v2428_v4 }
 0x6ab   : > { %v5644_v61 = vpop.xlane.xlu1 %2516 }
 0x6af   : > { %v2472_v34 = vpop.xlane.xlu0 %2471 }
 0x6b0   : > { %v2473_v27 = vcvt.f32.s32 %v2472_v34 }
 0x6b2   : > { %v5642_v49 = vadd.s32 %v2475_v17, %v2473_v27 }
 0x6b3   : > { %v2787_v41 = vpop.xlane.xlu0 %2786 }
 0x6b4   : > { %v2788_v52 = vcvt.f32.s32 %v2787_v41 }
 0x6b6   : > { %v5652_v2 = vadd.s32 %v2790_v62, %v2788_v52 }
 0x6b7   : > { %v2877_v50 = vpop.xlane.xlu1 %2876 }
 0x6b8   : > { %6253 = vst [vmem:[#allocation31_spill] sm:$0xff] %v5652_v2  ;;  %v2878_v8 = vcvt.f32.s32 %v2877_v50 }
 0x6b9   : > { %3885 = shalt.err (!%p3882_p3)
}
 0x6ba   : > { %s3886_s1 = scalar_lea.hbm %s5657_s4, 768  ;;  %s3890_s27 = scalar_lea.hbm %s6027_s12, 1536 }
 0x6bb   : > { %p3887_p4 = scmp.ne.s32.totalorder %s5657_s4, %s3886_s1  ;;  %p3891_p9 = scmp.lt.u32.totalorder %s5657_s4, %s6027_s12 }
 0x6bc   : > { %p3892_p10 = scmp.lt.u32.totalorder %s3890_s27, %s3886_s1  ;;  %p3894_p12 = scmp.lt.u32.totalorder %s3886_s1, %s5657_s4 }
 0x6bd   : > { %p3888_p7 = pnand %p3887_p4, %p4099_p5 }
 0x6be   : > { %p3893_p11 = por %p3892_p10, %p3891_p9 }
 0x6bf   : > { %p3889_p8 = pneg %p3888_p7 }
 0x6c0   : > { %p3895_p13 = por %p3894_p12, %p3893_p11 }
 0x6c2   : > { %p3896_p0 = pnand %p3895_p13, %p3889_p8 }
 0x6c4   : > { %3899 = shalt.err (!%p3896_p0)
}
 0x6c5   : > { %s3981_s28 = smov 384   ;;  %s3982_s25 = smov 24   ;;  %v5691_v36 = vadd.s32 %v2880_v56, %v2878_v8 }
 0x6c6   : > { %3768 = dma.vmem_to_hbm [thread:$0]  (%p4099_p5), %s5649_s5, 768, %s5657_s4, %s3361_s2, %s3981_s28, %s3981_s28, %s3982_s25  }
 0x6c7   : > { %s6254_s6 = sshll.u32 %s4082_s17, 8  ;;  %6255 = vst [vmem:[#allocation29_spill] sm:$0xff] %v5691_v36  ;;  %s3371_s27 = scalar_lea.sflag [#allocation5], %s4168_s18 }
 0x6c8   : > { %s5689_s0 = scalar_lea.hbm %s6029_s14, %s6254_s6  ;;  %s3900_s3 = scalar_lea.vmem %s5646_s26, 256 }
 0x6c9   : > { %p3901_p1 = scmp.ne.s32.totalorder %s5646_s26, %s3900_s3  ;;  %s3983_s7 = smov [#allocation4]  }
 0x6ca   : > { %s3904_s8 = sshll.u32 %s3983_s7, 4  ;;  %s3905_s8 = int_to_ptr.vmem [resolvable:$false] %s3904_s8 }
 0x6cb   : > { %p3902_p2 = pnand %p3901_p1, %p4099_p5  ;;  %s3906_s9 = scalar_lea.vmem %s3905_s8, 512 }
 0x6cc   : > { %p3907_p4 = scmp.lt.s32.totalorder %s5646_s26, %s3905_s8  ;;  %p3908_p7 = scmp.lt.s32.totalorder %s3906_s9, %s3900_s3 }
 0x6cd   : > { %p3903_p3 = pneg %p3902_p2 }
 0x6ce   : > { %p3909_p8 = por %p3908_p7, %p3907_p4 }
 0x6d0   : > { %p3910_p9 = pnand %p3909_p8, %p3903_p3 }
 0x6d2   : > { %3913 = shalt.err (!%p3910_p9)
}
 0x6d3   : > { %s3914_s17 = scalar_lea.hbm %s5689_s0, 256  ;;  %s3918_s7 = scalar_lea.hbm %s6029_s14, 512 }
 0x6d4   : > { %p3915_p10 = scmp.ne.s32.totalorder %s5689_s0, %s3914_s17  ;;  %p3919_p13 = scmp.lt.u32.totalorder %s5689_s0, %s6029_s14 }
 0x6d5   : > { %p3920_p0 = scmp.lt.u32.totalorder %s3918_s7, %s3914_s17  ;;  %p3922_p2 = scmp.lt.u32.totalorder %s3914_s17, %s5689_s0 }
 0x6d6   : > { %p3916_p11 = pnand %p3915_p10, %p4099_p5 }
 0x6d7   : > { %p3921_p1 = por %p3920_p0, %p3919_p13 }
 0x6d8   : > { %p3917_p12 = pneg %p3916_p11 }
 0x6d9   : > { %p3923_p3 = por %p3922_p2, %p3921_p1 }
 0x6db   : > { %p3924_p4 = pnand %p3923_p3, %p3917_p12 }
 0x6dd   : > { %3927 = shalt.err (!%p3924_p4)
}
 0x6de   : > { %s3984_s9 = smov 128   ;;  %s3985_s28 = smov 8   ;;  %v5717_v3 = vpop.xlane.xlu0 %2561  ;;  %v2834_v4 = vcvt.f32.s32 %v5436_v28  ;;  %v2832_v34 = vpop.xlane.xlu1 %2831  ;;  %v6257_v8 = vld [vmem:[#allocation60_spill] sm:$0xff]  ;;  %v2564_v14 = vcvt.f32.s32 %v5395_v20  ;;  %v2444_v53 = vcvt.f32.s32 %v5415_v32  ;;  %v2489_v20 = vcvt.f32.s32 %v5425_v15  ;;  %v6259_v58 = vld [vmem:[#allocation9_spill] sm:$0xff] }
 0x6df   : > { %3769 = dma.vmem_to_hbm [thread:$0]  (%p4099_p5), %s5646_s26, 256, %s5689_s0, %s3371_s27, %s3984_s9, %s3984_s9, %s3985_s28   ;;  %v2833_v46 = vcvt.f32.s32 %v2832_v34  ;;  %v2519_v28 = vcvt.f32.s32 %v6257_v8  ;;  %v2534_v8 = vcvt.f32.s32 %v5423_v12  ;;  %v2744_v32 = vcvt.f32.s32 %v5443_v11 }
 0x6e0   : > { %v2835_v17 = vshll.u32 %v2834_v4, 16  ;;  %v6258_v4 = vld [vmem:[#allocation8_spill] sm:$0xff]  ;;  %v5752_v39 = vshll.u32 %v2564_v14, 16  ;;  %v2579_v47 = vcvt.f32.s32 %v5446_v9  ;;  %v2624_v12 = vcvt.f32.s32 %v5453_v48  ;;  %s5910_s26 = scalar_lea.vmem %s6028_s13, %s4123_s20 }
 0x6e1   : > { %v3118_v34 = vadd.s32 4294967280, %v6258_v4  ;;  %v5749_v38 = vshll.u32 %v2519_v28, 16  ;;  %v2445_v28 = vshll.u32 %v2444_v53, 16  ;;  %v2594_v14 = vcvt.f32.s32 %v5458_v35 }
 0x6e2   : > { %v5719_v25 = vpop.xlane.xlu0 %2606  ;;  %v5724_v27 = vadd.s32 %v2835_v17, %v2833_v46  ;;  %v5728_v62 = vpop.xlane.xlu1 %2576  ;;  %v2609_v17 = vcvt.f32.s32 %v5404_v54  ;;  %v2399_v46 = vcvt.f32.s32 %v5406_v1  ;;  %v2654_v54 = vcvt.f32.s32 %v5431_v24 }
 0x6e3   : > { %v5757_v1 = vsub.s32 %v3118_v34, %v6259_v58  ;;  %v5767_v15 = vshll.u32 %v2534_v8, 16  ;;  %v2924_v24 = vcvt.f32.s32 %v5460_v6  ;;  %v2639_v34 = vcvt.f32.s32 %v5465_v23 }
 0x6e4   : > { %6256 = vst [vmem:[#allocation32_spill] sm:$0xff] %v5724_v27  ;;  %v2699_v27 = vcvt.f32.s32 %v5411_v5  ;;  %v5759_v5 = vshll.u32 %v2609_v17, 16  ;;  %v2400_v13 = vshll.u32 %v2399_v46, 16  ;;  %v2414_v17 = vcvt.f32.s32 %v5493_v26 }
 0x6e5   : > { %v2490_v11 = vshll.u32 %v2489_v20, 16  ;;  %v5776_v53 = vshll.u32 %v2654_v54, 16  ;;  %v3111_v48 = vadd.s32 4294967288, %v6258_v4  ;;  %v5779_v63 = vshll.u32 %v2744_v32, 16 }
 0x6e6   : > { %v5721_v30 = vpop.xlane.xlu0 %2696  ;;  %v5732_v52 = vpop.xlane.xlu1 %2621  ;;  %v5761_v55 = vshll.u32 %v2699_v27, 16  ;;  %v2669_v35 = vcvt.f32.s32 %v5467_v40  ;;  %v2684_v6 = vcvt.f32.s32 %v5472_v44  ;;  %v5785_v23 = vsub.s32 %v6258_v4, %v6259_v58 }
 0x6e7   : > { %v2580_v26 = vshll.u32 %v2579_v47, 16  ;;  %v5787_v8 = vshll.u32 %v2624_v12, 16  ;;  %v5789_v10 = vshll.u32 %v2594_v14, 16  ;;  %v2969_v20 = vcvt.f32.s32 %v5474_v60 }
 0x6e8   : > { %v5794_v54 = vshll.u32 %v2639_v34, 16  ;;  %v2415_v32 = vshll.u32 %v2414_v17, 16  ;;  %v2459_v40 = vcvt.f32.s32 %v5498_v31  ;;  %v5799_v4 = vsub.s32 %v3111_v48, %v6259_v58 }
 0x6e9   : > { %v5801_v12 = vshll.u32 %v2669_v35, 16  ;;  %v5803_v14 = vshll.u32 %v2684_v6, 16  ;;  %v2714_v60 = vcvt.f32.s32 %v5479_v42  ;;  %v5809_v17 = vshll.u32 %v2969_v20, 16 }
 0x6ea   : > { %v2397_v7 = vpop.xlane.xlu0 %2396  ;;  %v5736_v56 = vpop.xlane.xlu1 %2921  ;;  %v2460_v58 = vshll.u32 %v2459_v40, 16  ;;  %vm3116_vm13 = vcmask 130112   ;;  %vm3123_vm14 = vcmask 195712   ;;  %v3122_v31 = vrot.slane %v5636_v21, %v5757_v1 }
 0x6eb   : > { %v2398_v9 = vcvt.f32.s32 %v2397_v7  ;;  %v5792_v7 = vshll.u32 %v2924_v24, 16  ;;  %v2504_v24 = vcvt.f32.s32 %v5505_v59  ;;  %6261 = vst [vmem:[#allocation38_spill] sm:$0xff] %v5809_v17  ;;  %v5816_v6 = vshll.u32 %v2714_v60, 16 }
 0x6ec   : > { %vm3335_vm15 = vcmask 1041409   ;;  %vm3337_vm8 = vcmask 1042434   ;;  %vm3339_vm0 = vcmask 1043459   ;;  %vm3341_vm6 = vcmask 1044484  }
 0x6ed   : > { %v2401_v44 = vadd.s32 %v2400_v13, %v2398_v9  ;;  %v2549_v13 = vcvt.f32.s32 %v5515_v19  ;;  %v2505_v20 = vshll.u32 %v2504_v24, 16  ;;  %v2518_v19 = vcvt.f32.s32 %v5644_v61 }
 0x6ee   : > { %v5726_v41 = vpop.xlane.xlu0 %2441  ;;  %v5746_v57 = vpop.xlane.xlu1 %2666  ;;  %vm3343_vm1 = vcmask 1045509   ;;  %vm3345_vm3 = vcmask 1046534   ;;  %vm3347_vm5 = vcmask 1047559  }
 0x6ef   : > { %v2443_v36 = vcvt.f32.s32 %v5726_v41  ;;  %v3110_v48 = vrot.slane %v2401_v44, %v5785_v23 }
 0x6f1   : > { %v2446_v42 = vadd.s32 %v2445_v28, %v2443_v36  ;;  %v2578_v36 = vcvt.f32.s32 %v5728_v62  ;;  %v2608_v62 = vcvt.f32.s32 %v5719_v25 }
 0x6f2   : > { %v5730_v16 = vpop.xlane.xlu0 %2486  ;;  %v5774_v27 = vpop.xlane.xlu1 %2966 }
 0x6f3   : > { %6260 = vst [vmem:[#allocation36_spill] sm:$0xff] %v5774_v27  ;;  %v3128_v24 = vrot.slane %v2446_v42, %v5785_v23 }
 0x6f6   : > { %v5734_v50 = vpop.xlane.xlu0 %2531  ;;  %v5807_v34 = vpop.xlane.xlu1 %2711 }
 0x6fa   : > { %v5744_v2 = vpop.xlane.xlu0 %2651  ;;  %v5824_v28 = vpop.xlane.xlu1 %3056 }
 0x6fe   : > { %v5772_v46 = vpop.xlane.xlu0 %2741 }
 0x702   : > { %v2412_v27 = vpop.xlane.xlu0 %2411 }
 0x703   : > { %v2413_v47 = vcvt.f32.s32 %v2412_v27  ;;  %v2488_v27 = vcvt.f32.s32 %v5730_v16  ;;  %v2533_v16 = vcvt.f32.s32 %v5734_v50  ;;  %v2521_v50 = vadd.s32 %v5749_v38, %v2518_v19 }
 0x704   : > { %v2611_v19 = vadd.s32 %v5759_v5, %v2608_v62 }
 0x705   : > { %v2416_v41 = vadd.s32 %v2415_v32, %v2413_v47  ;;  %v2550_v32 = vshll.u32 %v2549_v13, 16  ;;  %v2491_v17 = vadd.s32 %v2490_v11, %v2488_v27  ;;  %v3137_v13 = vrot.slane %v5642_v49, %v5757_v1  ;;  %v2547_v49 = vpop.xlane.xlu1 %2546 }
 0x706   : > { %v2457_v9 = vpop.xlane.xlu0 %2456  ;;  %v2563_v11 = vcvt.f32.s32 %v5717_v3 }
 0x707   : > { %v3115_v59 = vrot.slane %v2416_v41, %v5799_v4  ;;  %v2458_v35 = vcvt.f32.s32 %v2457_v9  ;;  %v3142_v27 = vrot.slane %v2491_v17, %v5785_v23  ;;  %v2581_v9 = vadd.s32 %v2580_v26, %v2578_v36 }
 0x708   : > { %v2653_v26 = vcvt.f32.s32 %v5744_v2 }
 0x709   : > { %v3117_v40 = vsel %vm3116_vm13, %v3115_v59, %v3110_v48  ;;  %v2461_v47 = vadd.s32 %v2460_v58, %v2458_v35  ;;  %v2623_v48 = vcvt.f32.s32 %v5732_v52  ;;  %v2548_v35 = vcvt.f32.s32 %v2547_v49 }
 0x70a   : > { %v3124_v44 = vsel %vm3123_vm14, %v3122_v31, %v3117_v40  ;;  %v2502_v60 = vpop.xlane.xlu0 %2501  ;;  %v2536_v31 = vadd.s32 %v5767_v15, %v2533_v16  ;;  %v3151_v15 = vrot.slane %v2521_v50, %v5757_v1 }
 0x70b   : > { %v3132_v21 = vrot.slane %v2461_v47, %v5799_v4  ;;  %v2503_v61 = vcvt.f32.s32 %v2502_v60  ;;  %v2551_v40 = vadd.s32 %v2550_v32, %v2548_v35  ;;  %v3170_v47 = vrot.slane %v2581_v9, %v5785_v23 }
 0x70c   : > { %v3156_v52 = vrot.slane %v2536_v31, %v5785_v23  ;;  %v2626_v36 = vadd.s32 %v5787_v8, %v2623_v48  ;;  %v3179_v32 = vrot.slane %v2611_v19, %v5757_v1  ;;  %v2698_v8 = vcvt.f32.s32 %v5721_v30 }
 0x70d   : > { %v3133_v41 = vsel %vm3116_vm13, %v3132_v21, %v3128_v24  ;;  %v2506_v58 = vadd.s32 %v2505_v20, %v2503_v61  ;;  %v2566_v20 = vadd.s32 %v5752_v39, %v2563_v11  ;;  %v5852_v24 = vpop.xlane.xlu1 %2756  ;;  %v3160_v21 = vrot.slane %v2551_v40, %v5799_v4 }
 0x70e   : > { %v3138_v38 = vsel %vm3123_vm14, %v3137_v13, %v3133_v41  ;;  %v2592_v42 = vpop.xlane.xlu0 %2591  ;;  %v3184_v62 = vrot.slane %v2626_v36, %v5785_v23  ;;  %v2713_v31 = vcvt.f32.s32 %v5807_v34  ;;  %v2743_v34 = vcvt.f32.s32 %v5772_v46 }
 0x70f   : > { %v3336_v3 = vsel %vm3335_vm15, %v3138_v38, %v3124_v44  ;;  %v3146_v25 = vrot.slane %v2506_v58, %v5799_v4  ;;  %v2593_v59 = vcvt.f32.s32 %v2592_v42  ;;  %v2668_v44 = vcvt.f32.s32 %v5746_v57 }
 0x710   : > { %v2656_v57 = vadd.s32 %v5776_v53, %v2653_v26  ;;  %v3161_v13 = vsel %vm3116_vm13, %v3160_v21, %v3156_v52  ;;  %v6262_v35 = vcvt.f32.s32 %v5482_v22 }
 0x711   : > { %v3147_v17 = vsel %vm3116_vm13, %v3146_v25, %v3142_v27  ;;  %v2596_v16 = vadd.s32 %v5789_v10, %v2593_v59  ;;  %v3165_v10 = vrot.slane %v2566_v20, %v5757_v1  ;;  %v5868_v9 = vpop.xlane.xlu1 %2801  ;;  %v2671_v30 = vadd.s32 %v5801_v12, %v2668_v44 }
 0x712   : > { %v3152_v60 = vsel %vm3123_vm14, %v3151_v15, %v3147_v17  ;;  %v2637_v39 = vpop.xlane.xlu0 %2636  ;;  %v3193_v42 = vrot.slane %v2656_v57, %v5757_v1  ;;  %v3059_v25 = vcvt.f32.s32 %v5486_v33  ;;  %v2730_v15 = vshll.u32 %v6262_v35, 16 }
 0x713   : > { %v3338_v2 = vsel %vm3337_vm8, %v3152_v60, %v3336_v3  ;;  %v3174_v5 = vrot.slane %v2596_v16, %v5799_v4  ;;  %v2638_v61 = vcvt.f32.s32 %v2637_v39  ;;  %v3166_v58 = vsel %vm3123_vm14, %v3165_v10, %v3161_v13 }
 0x714   : > { %v3340_v53 = vsel %vm3339_vm0, %v3166_v58, %v3338_v2  ;;  %v2849_v3 = vcvt.f32.s32 %v5491_v43  ;;  %v2864_v20 = vcvt.f32.s32 %v5554_v0  ;;  %v3198_v43 = vrot.slane %v2671_v30, %v5785_v23 }
 0x715   : > { %v3175_v50 = vsel %vm3116_vm13, %v3174_v5, %v3170_v47  ;;  %v2641_v11 = vadd.s32 %v5794_v54, %v2638_v61  ;;  %v2701_v54 = vadd.s32 %v5761_v55, %v2698_v8  ;;  %v2716_v55 = vadd.s32 %v5816_v6, %v2713_v31  ;;  %v5886_v26 = vpop.xlane.xlu1 %3011 }
 0x716   : > { %v3180_v41 = vsel %vm3123_vm14, %v3179_v32, %v3175_v50  ;;  %v2682_v27 = vpop.xlane.xlu0 %2681  ;;  %v2746_v0 = vadd.s32 %v5779_v63, %v2743_v34  ;;  %v2850_v6 = vshll.u32 %v2849_v3, 16  ;;  %v5894_v16 = vshll.u32 %v3059_v25, 16 }
 0x717   : > { %v3188_v48 = vrot.slane %v2641_v11, %v5799_v4  ;;  %v2683_v38 = vcvt.f32.s32 %v2682_v27  ;;  %v3342_v49 = vsel %vm3341_vm6, %v3180_v41, %v3340_v53  ;;  %v3207_v22 = vrot.slane %v2701_v54, %v5757_v1 }
 0x718   : > { %v2865_v36 = vshll.u32 %v2864_v20, 16  ;;  %v2909_v44 = vcvt.f32.s32 %v5572_v45  ;;  %v3212_v60 = vrot.slane %v2716_v55, %v5785_v23  ;;  %v2939_v32 = vcvt.f32.s32 %v5513_v51 }
 0x719   : > { %v3189_v59 = vsel %vm3116_vm13, %v3188_v48, %v3184_v62  ;;  %v2686_v12 = vadd.s32 %v5803_v14, %v2683_v38  ;;  %v2894_v14 = vcvt.f32.s32 %v5501_v29  ;;  %v2862_v2 = vpop.xlane.xlu1 %2861  ;;  %v3221_v8 = vrot.slane %v2746_v0, %v5757_v1  ;;  %v6263_v48 = vld [vmem:[#allocation29_spill] sm:$0xff] }
 0x71a   : > { %v3194_v19 = vsel %vm3123_vm14, %v3193_v42, %v3189_v59  ;;  %v2727_v46 = vpop.xlane.xlu0 %2726  ;;  %v2863_v61 = vcvt.f32.s32 %v2862_v2  ;;  %v2923_v45 = vcvt.f32.s32 %v5736_v56  ;;  %v2984_v11 = vcvt.f32.s32 %v5527_v37  ;;  %v6264_v37 = vld [vmem:[#allocation36_spill] sm:$0xff]  ;;  %v6265_v59 = vld [vmem:[#allocation22_spill] sm:$0xff] }
 0x71b   : > { %v3344_v33 = vsel %vm3343_vm1, %v3194_v19, %v3342_v49  ;;  %v3202_v52 = vrot.slane %v2686_v12, %v5799_v4  ;;  %v2728_v17 = vcvt.f32.s32 %v2727_v46  ;;  %v2895_v10 = vshll.u32 %v2894_v14, 16  ;;  %v6269_v2 = vld [vmem:[#allocation28_spill] sm:$0xff] }
 0x71c   : > { %v2866_v13 = vadd.s32 %v2865_v36, %v2863_v61  ;;  %v2910_v62 = vshll.u32 %v2909_v44, 16  ;;  %v2954_v31 = vcvt.f32.s32 %v5587_v18  ;;  %v3263_v38 = vrot.slane %v6263_v48, %v5757_v1 }
 0x71d   : > { %v3203_v40 = vsel %vm3116_vm13, %v3202_v52, %v3198_v43  ;;  %v2731_v47 = vadd.s32 %v2730_v15, %v2728_v17  ;;  %v2907_v56 = vpop.xlane.xlu1 %2906  ;;  %v2926_v54 = vadd.s32 %v5792_v7, %v2923_v45  ;;  %v2968_v42 = vcvt.f32.s32 %v6264_v37  ;;  %v6266_v15 = vld [vmem:[#allocation23_spill] sm:$0xff] }
 0x71e   : > { %v3208_v39 = vsel %vm3123_vm14, %v3207_v22, %v3203_v40  ;;  %v2847_v29 = vpop.xlane.xlu0 %2846  ;;  %v3258_v27 = vrot.slane %v2866_v13, %v5799_v4  ;;  %v2908_v53 = vcvt.f32.s32 %v2907_v56  ;;  %v2940_v34 = vshll.u32 %v2939_v32, 16  ;;  %v6267_v22 = vld [vmem:[#allocation38_spill] sm:$0xff]  ;;  %v6268_v40 = vld [vmem:[#allocation24_spill] sm:$0xff]  ;;  %v6270_v45 = vld [vmem:[#allocation19_spill] sm:$0xff] }
 0x71f   : > { %v3346_v5 = vsel %vm3345_vm3, %v3208_v39, %v3344_v33  ;;  %v3216_v63 = vrot.slane %v2731_v47, %v5799_v4  ;;  %v2848_v21 = vcvt.f32.s32 %v2847_v29  ;;  %v3014_v12 = vcvt.f32.s32 %v6265_v59  ;;  %v6271_v56 = vld [vmem:[#allocation26_spill] sm:$0xff] }
 0x720   : > { %v2911_v25 = vadd.s32 %v2910_v62, %v2908_v53  ;;  %v2955_v35 = vshll.u32 %v2954_v31, 16  ;;  %v2999_v20 = vcvt.f32.s32 %v6266_v15  ;;  %v2985_v17 = vshll.u32 %v2984_v11, 16  ;;  %v6273_v15 = vld [vmem:[#allocation27_spill] sm:$0xff] }
 0x721   : > { %v3217_v57 = vsel %vm3116_vm13, %v3216_v63, %v3212_v60  ;;  %v2851_v50 = vadd.s32 %v2850_v6, %v2848_v21  ;;  %v2952_v19 = vpop.xlane.xlu1 %2951  ;;  %v3277_v14 = vrot.slane %v2926_v54, %v5757_v1  ;;  %v2971_v0 = vadd.s32 %v6267_v22, %v2968_v42 }
 0x722   : > { %v3222_v51 = vsel %vm3123_vm14, %v3221_v8, %v3217_v57  ;;  %v2892_v41 = vpop.xlane.xlu0 %2891  ;;  %v3272_v43 = vrot.slane %v2911_v25, %v5799_v4  ;;  %v2953_v52 = vcvt.f32.s32 %v2952_v19  ;;  %v3013_v6 = vcvt.f32.s32 %v5886_v26 }
 0x723   : > { %v3254_v58 = vrot.slane %v2851_v50, %v5785_v23  ;;  %v2893_v30 = vcvt.f32.s32 %v2892_v41  ;;  %v3348_v18 = vsel %vm3347_vm5, %v3222_v51, %v3346_v5  ;;  %v3029_v47 = vcvt.f32.s32 %v6268_v40 }
 0x724   : > { %3356 = vst.msk [vmem:[%s5910_s26] sm:$0xff] %vm539_vm2, %v3348_v18  ;;  %v2956_v60 = vadd.s32 %v2955_v35, %v2953_v52  ;;  %v3015_v39 = vshll.u32 %v3014_v12, 16  ;;  %v3000_v29 = vshll.u32 %v2999_v20, 16  ;;  %v3044_v5 = vcvt.f32.s32 %v6269_v2 }
 0x725   : > { %v3259_v49 = vsel %vm3116_vm13, %v3258_v27, %v3254_v58  ;;  %v2896_v3 = vadd.s32 %v2895_v10, %v2893_v30  ;;  %v2997_v61 = vpop.xlane.xlu1 %2996  ;;  %v2759_v57 = vcvt.f32.s32 %v6270_v45  ;;  %v3291_v50 = vrot.slane %v2971_v0, %v5757_v1  ;;  %v6274_v0 = vld [vmem:[#allocation30_spill] sm:$0xff] }
 0x726   : > { %v5928_v55 = vsel %vm3123_vm14, %v3263_v38, %v3259_v49  ;;  %v2937_v7 = vpop.xlane.xlu0 %2936  ;;  %v3286_v32 = vrot.slane %v2956_v60, %v5799_v4  ;;  %v2998_v8 = vcvt.f32.s32 %v2997_v61  ;;  %v3058_v13 = vcvt.f32.s32 %v5824_v28 }
 0x727   : > { %v3268_v46 = vrot.slane %v2896_v3, %v5785_v23  ;;  %v2938_v33 = vcvt.f32.s32 %v2937_v7  ;;  %v3016_v11 = vadd.s32 %v3015_v39, %v3013_v6  ;;  %v3030_v62 = vshll.u32 %v3029_v47, 16  ;;  %v6272_v3 = vld [vmem:[#allocation20_spill] sm:$0xff] }
 0x728   : > { %v3001_v41 = vadd.s32 %v3000_v29, %v2998_v8  ;;  %v2774_v58 = vcvt.f32.s32 %v6271_v56  ;;  %v3045_v27 = vshll.u32 %v3044_v5, 16  ;;  %v2758_v30 = vcvt.f32.s32 %v5852_v24 }
 0x729   : > { %v3273_v36 = vsel %vm3116_vm13, %v3272_v43, %v3268_v46  ;;  %v2941_v44 = vadd.s32 %v2940_v34, %v2938_v33  ;;  %v3042_v38 = vpop.xlane.xlu1 %3041  ;;  %v2760_v18 = vshll.u32 %v2759_v57, 16  ;;  %v3061_v34 = vadd.s32 %v5894_v16, %v3058_v13 }
 0x72a   : > { %v5939_v63 = vsel %vm3123_vm14, %v3277_v14, %v3273_v36  ;;  %v2982_v21 = vpop.xlane.xlu0 %2981  ;;  %v3300_v28 = vrot.slane %v3001_v41, %v5799_v4  ;;  %v3043_v42 = vcvt.f32.s32 %v3042_v38  ;;  %v3305_v49 = vrot.slane %v3016_v11, %v5757_v1  ;;  %v6275_v36 = vld [vmem:[#allocation21_spill] sm:$0xff] }
 0x72b   : > { %v3282_v10 = vrot.slane %v2941_v44, %v5785_v23  ;;  %v2983_v26 = vcvt.f32.s32 %v2982_v21  ;;  %v2804_v25 = vcvt.f32.s32 %v6272_v3  ;;  %v2775_v35 = vshll.u32 %v2774_v58, 16  ;;  %v6278_v58 = vld [vmem:[#allocation32_spill] sm:$0xff] }
 0x72c   : > { %v3046_v12 = vadd.s32 %v3045_v27, %v3043_v42  ;;  %v2819_v20 = vcvt.f32.s32 %v6273_v15  ;;  %v2761_v7 = vadd.s32 %v2760_v18, %v2758_v30  ;;  %v2803_v43 = vcvt.f32.s32 %v5868_v9 }
 0x72d   : > { %v3287_v31 = vsel %vm3116_vm13, %v3286_v32, %v3282_v10  ;;  %v2986_v51 = vadd.s32 %v2985_v17, %v2983_v26  ;;  %v3319_v17 = vrot.slane %v3061_v34, %v5757_v1  ;;  %v3087_v14 = vpop.xlane.xlu1 %3086  ;;  %v2805_v22 = vshll.u32 %v2804_v25, 16  ;;  %v6276_v10 = vld [vmem:[#allocation31_spill] sm:$0xff] }
 0x72e   : > { %v5950_v53 = vsel %vm3123_vm14, %v3291_v50, %v3287_v31  ;;  %v3027_v48 = vpop.xlane.xlu0 %3026  ;;  %v3314_v16 = vrot.slane %v3046_v12, %v5799_v4  ;;  %v3089_v6 = vcvt.f32.s32 %v6274_v0  ;;  %v3074_v44 = vcvt.f32.s32 %v6275_v36  ;;  %v6277_v50 = vld [vmem:[#allocation25_spill] sm:$0xff] }
 0x72f   : > { %v3296_v54 = vrot.slane %v2986_v51, %v5785_v23  ;;  %v3028_v37 = vcvt.f32.s32 %v3027_v48  ;;  %v2820_v60 = vshll.u32 %v2819_v20, 16  ;;  %v3226_v39 = vrot.slane %v2761_v7, %v5785_v23 }
 0x730   : > { %v2806_v2 = vadd.s32 %v2805_v22, %v2803_v43  ;;  %v3088_v21 = vcvt.f32.s32 %v3087_v14  ;;  %v3235_v32 = vrot.slane %v6276_v10, %v5757_v1  ;;  %v3090_v26 = vshll.u32 %v3089_v6, 16 }
 0x731   : > { %v3301_v24 = vsel %vm3116_vm13, %v3300_v28, %v3296_v54  ;;  %v3031_v59 = vadd.s32 %v3030_v62, %v3028_v37  ;;  %v3075_v57 = vshll.u32 %v3074_v44, 16  ;;  %v3104_v13 = vcvt.f32.s32 %v6277_v50 }
 0x732   : > { %v3306_v19 = vsel %vm3123_vm14, %v3305_v49, %v3301_v24  ;;  %v2772_v46 = vpop.xlane.xlu0 %2771  ;;  %v3240_v31 = vrot.slane %v2806_v2, %v5785_v23  ;;  %v3091_v51 = vadd.s32 %v3090_v26, %v3088_v21  ;;  %v3249_v27 = vrot.slane %v6278_v58, %v5757_v1 }
 0x733   : > { %v3310_v33 = vrot.slane %v3031_v59, %v5785_v23  ;;  %v2773_v52 = vcvt.f32.s32 %v2772_v46  ;;  %v3105_v38 = vshll.u32 %v3104_v13, 16 }
 0x734   : > { %v3328_v37 = vrot.slane %v3091_v51, %v5799_v4 }
 0x735   : > { %v3315_v40 = vsel %vm3116_vm13, %v3314_v16, %v3310_v33  ;;  %v2776_v47 = vadd.s32 %v2775_v35, %v2773_v52 }
 0x736   : > { %v3320_v9 = vsel %vm3123_vm14, %v3319_v17, %v3315_v40  ;;  %v2817_v29 = vpop.xlane.xlu0 %2816 }
 0x737   : > { %v3230_v5 = vrot.slane %v2776_v47, %v5799_v4  ;;  %v2818_v61 = vcvt.f32.s32 %v2817_v29 }
 0x739   : > { %v3231_v8 = vsel %vm3116_vm13, %v3230_v5, %v3226_v39  ;;  %v2821_v45 = vadd.s32 %v2820_v60, %v2818_v61 }
 0x73a   : > { %v3236_v11 = vsel %vm3123_vm14, %v3235_v32, %v3231_v8  ;;  %v3072_v62 = vpop.xlane.xlu0 %3071 }
 0x73b   : > { %v3244_v41 = vrot.slane %v2821_v45, %v5799_v4  ;;  %v3073_v56 = vcvt.f32.s32 %v3072_v62 }
 0x73d   : > { %v3245_v30 = vsel %vm3116_vm13, %v3244_v41, %v3240_v31  ;;  %v3076_v48 = vadd.s32 %v3075_v57, %v3073_v56 }
 0x73e   : > { %v3250_v54 = vsel %vm3123_vm14, %v3249_v27, %v3245_v30  ;;  %v3102_v28 = vpop.xlane.xlu0 %3101 }
 0x73f   : > { %v3349_v42 = vsel %vm3335_vm15, %v3250_v54, %v3236_v11  ;;  %v3324_v18 = vrot.slane %v3076_v48, %v5785_v23  ;;  %v3103_v34 = vcvt.f32.s32 %v3102_v28 }
 0x740   : > { %v3350_v49 = vsel %vm3337_vm8, %v5928_v55, %v3349_v42 }
 0x741   : > { %v3351_v3 = vsel %vm3339_vm0, %v5939_v63, %v3350_v49  ;;  %v3329_v25 = vsel %vm3116_vm13, %v3328_v37, %v3324_v18  ;;  %v3106_v24 = vadd.s32 %v3105_v38, %v3103_v34 }
 0x742   : > { %v3352_v59 = vsel %vm3341_vm6, %v5950_v53, %v3351_v3 }
 0x743   : > { %v3333_v12 = vrot.slane %v3106_v24, %v5757_v1  ;;  %v3353_v4 = vsel %vm3343_vm1, %v3306_v19, %v3352_v59 }
 0x744   : > { %v3354_v35 = vsel %vm3345_vm3, %v3320_v9, %v3353_v4 }
 0x745   : > { %v3334_v23 = vsel %vm3123_vm14, %v3333_v12, %v3329_v25 }
 0x746   : > { %v3355_v15 = vsel %vm3347_vm5, %v3334_v23, %v3354_v35 }
 0x747   : > { %3357 = vst.msk [vmem:[%s5910_s26 + $0x8] sm:$0xff] %vm539_vm2, %v3355_v15 }
 0x748 PF: > { %p3779_p5 = scmp.ge.s32.totalorder %s3966_s16, 2  ;;  %s3420_s20 = sand.u32 1, %s3954_s29  }
 0x749   : > { %s3421_s25 = scalar_lea.sflag [#allocation3], %s3420_s20 }
 0x74a   : > { %p3773_p7 = pnand %p3779_p5, %p4103_p6 }
 0x74c   : > { %3945 = dma.done.wait (!%p3773_p7), %s3421_s25, 768  }
 0x74d   : > { %3947 = vsyncadd (!%p3773_p7), %s3421_s25, 4294966528  ;;  %s3438_s6 = scalar_lea.sflag [#allocation5], %s3420_s20 }
 0x74e   : > { %3949 = dma.done.wait (!%p3773_p7), %s3438_s6, 256  }
 0x74f   : > { %3951 = vsyncadd (!%p3773_p7), %s3438_s6, 4294967040  ;;  %p28_p8 = scmp.ge.s32.totalorder %s4086_s19, 4   ;;  %s6279_s29 = smov %s3958_s30 }
 0x750   : > { %s6280_s30 = smov %s3962_s15  ;;  %s6281_s15 = smov %s4097_s22 }
 0x751   : > { %s6282_s16 = smov %s4086_s19  ;;  %30 = sbr.rel (!%p28_p8) target bundleno = 16 (0x10), region = 135 }
 0x758   :  { %3443 = vsyncpa [#allocation3], 1 }
 0x759   :  { %3445 = vsyncpa [#allocation3 + $0x1], 1 }
 0x75a   :  { %3446 = vsyncpa [#allocation5], 1 }
 0x75b   :  { %3448 = vsyncpa [#allocation5 + $0x1], 1 }

</bundles_post_ra>
